<compile_context>
chip_gen: v6e
topology: v6e:2x2x1
jax: 0.10.0
libtpu: 0.0.40
codegen_flags: <defaults>
</compile_context>

<pallas_src>
import math

import jax
import jax.numpy as jnp
from jax.experimental import pallas as pl
from jax.experimental.pallas import tpu as pltpu


def _round_up(x, m):
    return (x + m - 1) // m * m


# ---------------------------------------------------------------------------
# Fused conv-as-GEMM kernel:  out = patches @ w_t + bias
# ---------------------------------------------------------------------------
def _conv_gemm_kernel(p_ref, w_ref, b_ref, o_ref, acc_ref):
    # zero the f32 accumulator on the first K step
    @pl.when(pl.program_id(1) == 0)
    def _():
        acc_ref[...] = jnp.zeros_like(acc_ref)

    # MXU matmul (bf16 or f32 operands), f32 accumulation
    acc_ref[...] += jnp.dot(p_ref[...], w_ref[...],
                            preferred_element_type=jnp.float32)

    # fuse bias add + store on the last K step
    @pl.when(pl.program_id(1) == pl.num_programs(1) - 1)
    def _():
        o_ref[...] = (acc_ref[...] + b_ref[...]).astype(o_ref.dtype)


def _conv_gemm(patches, w_t, bias2d, *, tile_m, tile_k):
    """patches: (M, K), w_t: (K, N), bias2d: (1, N) f32 -> (M, N) f32."""
    M, K = patches.shape
    N = w_t.shape[1]
    grid = (M // tile_m, K // tile_k)
    return pl.pallas_call(
        _conv_gemm_kernel,
        out_shape=jax.ShapeDtypeStruct((M, N), jnp.float32),
        grid_spec=pltpu.PrefetchScalarGridSpec(
            num_scalar_prefetch=0,
            grid=grid,
            in_specs=[
                pl.BlockSpec((tile_m, tile_k), lambda i, k: (i, k)),   # patches
                pl.BlockSpec((tile_k, N), lambda i, k: (k, 0)),        # weights
                pl.BlockSpec((1, N), lambda i, k: (0, 0)),             # bias
            ],
            out_specs=pl.BlockSpec((tile_m, N), lambda i, k: (i, 0)),
            scratch_shapes=[pltpu.VMEM((tile_m, N), jnp.float32)],
        ),
        compiler_params=pltpu.CompilerParams(
            dimension_semantics=("parallel", "arbitrary")),
    )(patches, w_t, bias2d)


# ---------------------------------------------------------------------------
# ImageEncoder forward
# ---------------------------------------------------------------------------
def image_encoder_forward(x, weight, bias, *, compute_dtype=jnp.bfloat16,
                          tile_m=256, tile_k=1024):
    """
    x:      (B, Cin, H, W)      float32
    weight: (Cout, Cin, 2, 2)   float32   (PyTorch Conv2d layout)
    bias:   (Cout,)             float32
    returns (B, Cout, OH*OW)    float32   == conv(x).view(B, Cout, -1)
    """
    B, C, H, W = x.shape
    C_out, C_in, KH, KW = weight.shape
    assert C == C_in and (KH, KW) == (2, 2)
    OH, OW = (H - 2) // 2 + 1, (W - 2) // 2 + 1          # stride 2, no padding

    # --- im2col / space-to-depth (pure layout; non-overlapping 2x2 patches) ---
    xc = x[:, :, :2 * OH, :2 * OW]
    x6 = xc.reshape(B, C, OH, 2, OW, 2)                  # (B,C,OH,kh,OW,kw)
    patches = jnp.transpose(x6, (0, 2, 4, 1, 3, 5)).reshape(B * OH * OW, C * 4)
    w_t = weight.reshape(C_out, C * 4).T                 # (K, Cout), (c,kh,kw) order
    bias2d = bias.reshape(1, C_out).astype(jnp.float32)

    M, K = patches.shape
    tile_m = tile_m if M >= tile_m else _round_up(M, 8)
    tile_k = tile_k if K >= tile_k else _round_up(K, 128)
    M_pad, K_pad = _round_up(M, tile_m), _round_up(K, tile_k)

    patches = patches.astype(compute_dtype)
    w_t = w_t.astype(compute_dtype)
    if M_pad != M or K_pad != K:
        patches = jnp.pad(patches, ((0, M_pad - M), (0, K_pad - K)))
    if K_pad != K:
        w_t = jnp.pad(w_t, ((0, K_pad - K), (0, 0)))

    out = _conv_gemm(patches, w_t, bias2d, tile_m=tile_m, tile_k=tile_k)
    out = out[:M]                                        # (B*OH*OW, Cout) f32
    return jnp.transpose(out.reshape(B, OH * OW, C_out), (0, 2, 1))


# ---------------------------------------------------------------------------
# Deterministic parameters (PyTorch Conv2d default init bounds)
# ---------------------------------------------------------------------------
def make_params(key, c_in=2048, c_out=512):
    fan_in = c_in * 2 * 2
    bound = 1.0 / math.sqrt(fan_in)
    kw, kb = jax.random.split(key)
    weight = jax.random.uniform(kw, (c_out, c_in, 2, 2), jnp.float32, -bound, bound)
    bias = jax.random.uniform(kb, (c_out,), jnp.float32, -bound, bound)
    return weight, bias


if __name__ == "__main__":
    # small shapes consistent with the module (Cin/Cout fixed by the spec)
    batch, c_in, c_out, H, W = 2, 2048, 512, 16, 16
    key = jax.random.PRNGKey(0)
    kx, kp = jax.random.split(key)
    x = jax.random.normal(kx, (batch, c_in, H, W), jnp.float32)
    weight, bias = make_params(kp, c_in, c_out)

    # Reference: accurate f32 convolution with identical semantics
    ref = jax.lax.conv_general_dilated(
        x, weight, window_strides=(2, 2), padding="VALID",
        dimension_numbers=("NCHW", "OIHW", "NCHW"),
        precision=jax.lax.Precision.HIGHEST)
    ref = (ref + bias.reshape(1, c_out, 1, 1)).reshape(batch, c_out, -1)

    # f32-operand Pallas run (semantics check)
    out_f32 = image_encoder_forward(x, weight, bias, compute_dtype=jnp.float32)
    jax.block_until_ready(out_f32)
    assert out_f32.shape == (batch, c_out, (H // 2) * (W // 2))
    assert jnp.allclose(out_f32, ref, atol=2e-2, rtol=2e-2)

    # bf16-operand Pallas run (performance path; f32 accumulation in-kernel)
    out_bf16 = image_encoder_forward(x, weight, bias, compute_dtype=jnp.bfloat16)
    jax.block_until_ready(out_bf16)
    assert out_bf16.dtype == jnp.float32
    assert jnp.allclose(out_bf16, ref, atol=5e-2, rtol=5e-2)

    print("KERNEL_OK")
</pallas_src>

<mosaic_0001>
module attributes {stable_mosaic.version = 11 : i64} {
  func.func @_conv_gemm_kernel(%arg0: i32, %arg1: i32, %arg2: memref<128x1024xf32, #tpu.memory_space<vmem>>, %arg3: memref<1024x512xf32, #tpu.memory_space<vmem>>, %arg4: memref<1x512xf32, #tpu.memory_space<vmem>>, %arg5: memref<128x512xf32, #tpu.memory_space<vmem>>, %arg6: memref<128x512xf32, #tpu.memory_space<vmem>>) attributes {dimension_semantics = [#tpu.dimension_semantics<parallel>, #tpu.dimension_semantics<arbitrary>], iteration_bounds = array<i64: 1, 8>, scalar_prefetch = 0 : i64, scratch_operands = 1 : i64, tpu.core_type = #tpu.core_type<tc>, window_params = [{transform_indices = @transform_0, window_bounds = array<i64: 128, 1024>}, {transform_indices = @transform_1, window_bounds = array<i64: 1024, 512>}, {pipeline_mode = #tpu.pipeline_mode<synchronous>, transform_indices = @transform_2, window_bounds = array<i64: 1, 512>}, {transform_indices = @transform_3, window_bounds = array<i64: 128, 512>}]} {
    %c0_i32 = arith.constant 0 : i32
    %0 = arith.cmpi eq, %arg1, %c0_i32 : i32
    %1 = arith.extui %0 : i1 to i32
    %c0_i32_0 = arith.constant 0 : i32
    %2 = arith.cmpi ne, %1, %c0_i32_0 : i32
    scf.if %2 {
      %cst_9 = arith.constant 0.000000e+00 : f32
      %12 = vector.broadcast %cst_9 : f32 to vector<128x512xf32>
      %c0_10 = arith.constant 0 : index
      %c0_11 = arith.constant 0 : index
      %13 = vector.load %arg6[%c0_10, %c0_11] : memref<128x512xf32, #tpu.memory_space<vmem>>, vector<128x512xf32>
      tpu.vector_store %arg6[%c0_10, %c0_11], %12 {strides = array<i32>} : memref<128x512xf32, #tpu.memory_space<vmem>>, vector<128x512xf32>,
    } else {
    }
    %c0 = arith.constant 0 : index
    %c0_1 = arith.constant 0 : index
    %3 = vector.load %arg6[%c0, %c0_1] : memref<128x512xf32, #tpu.memory_space<vmem>>, vector<128x512xf32>
    %c0_2 = arith.constant 0 : index
    %c0_3 = arith.constant 0 : index
    %4 = vector.load %arg2[%c0_2, %c0_3] : memref<128x1024xf32, #tpu.memory_space<vmem>>, vector<128x1024xf32>
    %c0_4 = arith.constant 0 : index
    %c0_5 = arith.constant 0 : index
    %5 = vector.load %arg3[%c0_4, %c0_5] : memref<1024x512xf32, #tpu.memory_space<vmem>>, vector<1024x512xf32>
    %cst = arith.constant dense<0.000000e+00> : vector<128x512xf32>
    %6 = tpu.matmul %4, %5, %cst {dimension_numbers = #tpu.dot_dimension_numbers<[1], [0], [0], [1], [0, 0, 1, 1], [], []>} : vector<128x1024xf32>, vector<1024x512xf32>, vector<128x512xf32> -> vector<128x512xf32>
    %7 = arith.addf %3, %6 : vector<128x512xf32>
    %c0_6 = arith.constant 0 : index
    %c0_7 = arith.constant 0 : index
    %8 = vector.load %arg6[%c0_6, %c0_7] : memref<128x512xf32, #tpu.memory_space<vmem>>, vector<128x512xf32>
    tpu.vector_store %arg6[%c0_6, %c0_7], %7 {strides = array<i32>} : memref<128x512xf32, #tpu.memory_space<vmem>>, vector<128x512xf32>,
    %c7_i32 = arith.constant 7 : i32
    %9 = arith.cmpi eq, %arg1, %c7_i32 : i32
    %10 = arith.extui %9 : i1 to i32
    %c0_i32_8 = arith.constant 0 : i32
    %11 = arith.cmpi ne, %10, %c0_i32_8 : i32
    scf.if %11 {
      %c0_9 = arith.constant 0 : index
      %c0_10 = arith.constant 0 : index
      %12 = vector.load %arg6[%c0_9, %c0_10] : memref<128x512xf32, #tpu.memory_space<vmem>>, vector<128x512xf32>
      %c0_11 = arith.constant 0 : index
      %c0_12 = arith.constant 0 : index
      %13 = vector.load %arg4[%c0_11, %c0_12] : memref<1x512xf32, #tpu.memory_space<vmem>>, vector<1x512xf32>
      %14 = vector.broadcast %13 : vector<1x512xf32> to vector<128x512xf32>
      %15 = arith.addf %12, %14 : vector<128x512xf32>
      %c0_13 = arith.constant 0 : index
      %c0_14 = arith.constant 0 : index
      %16 = vector.load %arg5[%c0_13, %c0_14] : memref<128x512xf32, #tpu.memory_space<vmem>>, vector<128x512xf32>
      tpu.vector_store %arg5[%c0_13, %c0_14], %15 {strides = array<i32>} : memref<128x512xf32, #tpu.memory_space<vmem>>, vector<128x512xf32>,
    } else {
    }
    return
  }
  func.func @transform_0(%arg0: i32, %arg1: i32) -> (i32, i32) {
    %c0_i32 = arith.constant 0 : i32
    return %arg0, %arg1 : i32, i32
  }
  func.func @transform_1(%arg0: i32, %arg1: i32) -> (i32, i32) {
    %c0_i32 = arith.constant 0 : i32
    %c0_i32_0 = arith.constant 0 : i32
    return %arg1, %c0_i32 : i32, i32
  }
  func.func @transform_2(%arg0: i32, %arg1: i32) -> (i32, i32) {
    %c0_i32 = arith.constant 0 : i32
    %c0_i32_0 = arith.constant 0 : i32
    %c0_i32_1 = arith.constant 0 : i32
    return %c0_i32, %c0_i32_0 : i32, i32
  }
  func.func @transform_3(%arg0: i32, %arg1: i32) -> (i32, i32) {
    %c0_i32 = arith.constant 0 : i32
    %c0_i32_0 = arith.constant 0 : i32
    return %arg0, %c0_i32 : i32, i32
  }
}

</mosaic_0001>

<bundles_post_ra>
// kernel: tpu_custom_call.1
= control target key start
LH: loop header
LB: loop body
LE: loop exit
PB: predicated region body
PF: predicated region fallthrough
CT: control target
= control target key end

     0   :  { %s4583_s0 = inlined_call_operand.hbm [shape: f32[128,8192], index: 0, kind: input, shape index: {}]   ;;  %s4584_s1 = inlined_call_operand.hbm [shape: f32[8192,512], index: 1, kind: input, shape index: {}]   ;;  %s4585_s2 = inlined_call_operand.hbm [shape: f32[1,512], index: 2, kind: input, shape index: {}]   ;;  %s4586_s3 = inlined_call_operand.hbm [shape: f32[128,512], index: 3, kind: output, shape index: {}]  }
   0x1   :  { %4590 = sst [smem:[#allocation31_spill]] %s4583_s0 }
   0x2   :  { %4591 = sst [smem:[#allocation32_spill]] %s4585_s2 }
   0x3   :  { %8 = vsyncpa [#allocation4], 0 }
   0x4   :  { %10 = vsyncpa [#allocation4 + $0x1], 0 }
   0x5   :  { %11 = vsyncpa [#allocation7], 0 }
   0x6   :  { %13 = vsyncpa [#allocation7 + $0x1], 0 }
   0x7   :  { %14 = vsyncpa [#allocation5], 0  ;;  %s3211_s12 = smov 0   ;;  %s3213_s13 = smov 0  }
   0x8   :  { %s3215_s14 = smov 0   ;;  %s3217_s15 = smov 0  }
   0x9   :  { %s3219_s16 = smov 0   ;;  %s3221_s17 = smov 0  }
   0xa LB: > { %s3240_s18 = sadd.s32 4294967295, %s3177_s17   ;;  %s41_s19 = sadd.s32 1, %s3165_s14  ;;  %s3177_s17 = sphi %s3221_s17, %s20_s17   ;;  %s3173_s16 = sphi %s3219_s16, %s4638_s16   ;;  %s3169_s15 = sphi %s3217_s15, %s4637_s15   ;;  %s3165_s14 = sphi %s3215_s14, %s4636_s14   ;;  %s3161_s13 = sphi %s3213_s13, %s4635_s13   ;;  %s3157_s12 = sphi %s3211_s12, %s4634_s12  }
   0xb   : > { %p48_p0 = scmp.ne.s32.totalorder %s3165_s14, %s3161_s13  ;;  %p49_p1 = scmp.eq.s32.totalorder %s3177_s17, 0 }
   0xc   : > { %p54_p2 = scmp.ne.s32.totalorder %s3161_s13, %s3157_s12  ;;  %p55_p3 = scmp.eq.s32.totalorder %s3240_s18, 0 }
   0xd   : > { %p50_p4 = por %p49_p1, %p48_p0  ;;  %p2772_p5 = scmp.ge.s32.totalorder %s3177_s17, 1 }
   0xe   : > { %p3251_p6 = por %p55_p3, %p54_p2  ;;  %p138_p7 = scmp.lt.s32.totalorder %s3177_s17, 9 }
   0xf   : > { %s3179_s22 = smov [#allocation8]   ;;  %p2819_p10 = scmp.lt.s32.totalorder %s3177_s17, 8 }
  0x10   : > { %s4592_s20 = scalar_select %p3251_p6, 1, 0 }
  0x11   : > { %p3256_p8 = pnand %p2772_p5, %p138_p7  ;;  %s151_s23 = sshll.u32 %s3179_s22, 4  ;;  %s152_s23 = int_to_ptr.vmem [resolvable:$true] %s151_s23 }
  0x12   : > { %s3264_s24 = sand.u32 1, %s3165_s14   ;;  %p3268_p12 = pnand %p2819_p10, %p50_p4 }
  0x13   : > { %s4593_s21 = scalar_select %p3256_p8, 1, 0 }
  0x14   : > { %p2807_p9 = pneg %p3256_p8  ;;  %s3020_s26 = scalar_lea.vmem %s152_s23, 64 }
  0x15   : > { %p3021_p0 = scmp.ne.s32.totalorder %s152_s23, %s3020_s26  ;;  %p3028_p5 = scmp.lt.s32.totalorder %s152_s23, %s152_s23 }
  0x16   : > { %p2808_p11 = pnand %p2807_p9, %p55_p3  ;;  %p3029_p7 = scmp.lt.s32.totalorder %s3020_s26, %s3020_s26 }
  0x18   : > { %p3011_p13 = pneg %p2808_p11  ;;  %p3030_p6 = por %p3029_p7, %p3028_p5 }
  0x1a   : > { %p3023_p1 = pnand %p3021_p0, %p3011_p13 }
  0x1c   : > { %p3024_p2 = pneg %p3023_p1 }
  0x1e   : > { %p3031_p8 = pnand %p3030_p6, %p3024_p2 }
  0x20   : > { %3034 = shalt.err (!%p3031_p8)
}
  0x21   : > { %s4595_s2 = sld [smem:[#allocation32_spill]]  ;;  %s29_s29 = sadd.s32 1, %s3173_s16 }
  0x22   : > { %s2775_s30 = sshll.u32 %s3264_s24, 10  ;;  %p30_p4 = scmp.ge.s32.totalorder %s29_s29, 8 }
  0x23   : > { %s2792_s4 = sshll.u32 %s3173_s16, 10  ;;  %s166_s5 = scalar_lea.vmem [#allocation3], %s2775_s30 }
  0x24   : > { %s176_s6 = sshll.u32 %s166_s5, 4  ;;  %s4640_s29 = smov (%p30_p4, %s29_s29), 0  ;;  %s177_s6 = int_to_ptr.vmem [resolvable:$true] %s176_s6 }
  0x25   : > { %4596 = sst [smem:[#allocation14_spill]] %s4640_s29  ;;  %s37_s10 = ssub.s32 %s3173_s16, %s4640_s29 }
  0x26   : > { %s4597_s0 = sld [smem:[#allocation31_spill]]  ;;  %p39_p6 = scmp.eq.s32.totalorder %s37_s10, 0 }
  0x27   : > { %2810 = dma.hbm_to_vmem [thread:$0]  (!%p2808_p11), %s4595_s2, 64, %s152_s23, [#allocation7]  }
  0x28   : > { %s186_s11 = sand.u32 1, %s3177_s17   ;;  %s163_s22 = scalar_lea.sflag [#allocation4], %s3264_s24 }
  0x29   : > { %s3289_s12 = scalar_select %p39_p6, %s3165_s14, %s41_s19  }
  0x2a   : > { %p3037_p8 = pneg %p3268_p12  ;;  %s3048_s23 = scalar_lea.vmem %s177_s6, 16384 }
  0x2b   : > { %p3049_p9 = scmp.ne.s32.totalorder %s177_s6, %s3048_s23  ;;  %s3180_s26 = smov [#allocation3]  }
  0x2c   : > { %s175_s9 = scalar_lea.hbm %s4597_s0, %s2792_s4  ;;  %s3053_s27 = sshll.u32 %s3180_s26, 4  ;;  %s3054_s27 = int_to_ptr.vmem [resolvable:$false] %s3053_s27 }
  0x2d   : > { %p3051_p10 = pnand %p3049_p9, %p3037_p8  ;;  %s3055_s28 = scalar_lea.vmem %s3054_s27, 32768 }
  0x2e   : > { %p3056_p13 = scmp.lt.s32.totalorder %s177_s6, %s3054_s27  ;;  %p3057_p0 = scmp.lt.s32.totalorder %s3055_s28, %s3048_s23 }
  0x2f   : > { %p3052_p11 = pneg %p3051_p10 }
  0x30   : > { %p3058_p1 = por %p3057_p0, %p3056_p13 }
  0x32   : > { %p3059_p2 = pnand %p3058_p1, %p3052_p11 }
  0x34   : > { %3062 = shalt.err (!%p3059_p2)
}
  0x35   : > { %s3181_s19 = smov 8192   ;;  %s3182_s30 = smov 1024  }
  0x36   : > { %s3183_s4 = smov 64   ;;  %s2778_s5 = sshll.u32 %s3264_s24, 12 }
  0x37   : > { %2814 = dma.hbm_to_vmem [thread:$0]  (!%p3268_p12), %s175_s9, 16384, %s177_s6, %s163_s22, %s3181_s19, %s3182_s30, %s3183_s4  }
  0x38   : > { %s2794_s7 = sshll.u32 %s3173_s16, 16  ;;  %s190_s27 = scalar_lea.vmem [#allocation6], %s2778_s5 }
  0x39   : > { %s197_s26 = scalar_lea.hbm %s4584_s1, %s2794_s7  ;;  %s198_s23 = sshll.u32 %s190_s27, 4  ;;  %s199_s23 = int_to_ptr.vmem [resolvable:$true] %s198_s23 }
  0x3a   : > { %s187_s28 = scalar_lea.sflag [#allocation7], %s186_s11  ;;  %s3076_s0 = scalar_lea.vmem %s199_s23, 65536 }
  0x3b   : > { %p3077_p5 = scmp.ne.s32.totalorder %s199_s23, %s3076_s0  ;;  %s3184_s2 = smov [#allocation6]  }
  0x3c   : > { %s3081_s29 = sshll.u32 %s3184_s2, 4  ;;  %s3082_s29 = int_to_ptr.vmem [resolvable:$false] %s3081_s29 }
  0x3d   : > { %p3079_p7 = pnand %p3077_p5, %p3037_p8  ;;  %s3083_s6 = scalar_lea.vmem %s3082_s29, 131072 }
  0x3e   : > { %p3084_p6 = scmp.lt.s32.totalorder %s199_s23, %s3082_s29  ;;  %p3085_p9 = scmp.lt.s32.totalorder %s3083_s6, %s3076_s0 }
  0x3f   : > { %p3080_p4 = pneg %p3079_p7 }
  0x40   : > { %p3086_p10 = por %p3085_p9, %p3084_p6 }
  0x42   : > { %p3087_p11 = pnand %p3086_p10, %p3080_p4 }
  0x44   : > { %3090 = shalt.err (!%p3087_p11)
}
  0x45   : > { %s3185_s24 = smov 512   ;;  %s3186_s9 = smov 32  }
  0x46   : > { %2817 = dma.hbm_to_vmem [thread:$0]  (!%p3268_p12), %s197_s26, 65536, %s199_s23, %s187_s28, %s3185_s24, %s3185_s24, %s3186_s9  }
  0x47   : > { %p4598_p13 = scmp.ne.s32.totalorder %s4593_s21, 0 }
  0x49   : > { %210 = sbr.rel (%p4598_p13) target bundleno = 800 (0x320), region = 32 }
  0x4e   : > { %s212_s11 = sand.u32 1, %s3161_s13   ;;  %p4599_p8 = scmp.ne.s32.totalorder %s4592_s20, 0 }
  0x4f   : > { %s2783_s22 = sshll.u32 %s212_s11, 10  ;;  %s213_s2 = scalar_lea.sflag [#allocation4], %s212_s11 }
  0x50   : > { %s3312_s19 = scalar_lea.vmem [#allocation3], %s2783_s22 }
  0x51   : > { %3140 = dma.done.wait (%p4599_p8), %s213_s2, 16384  }
  0x52   : > { %3142 = vsyncadd (%p4599_p8), %s213_s2, 4294950912  ;;  %s221_s0 = sand.u32 1, %s3240_s18   ;;  %s2784_s25 = sshll.u32 %s212_s11, 12 }
  0x53   : > { %s222_s29 = scalar_lea.sflag [#allocation7], %s221_s0  ;;  %s3319_s30 = scalar_lea.vmem [#allocation6], %s2784_s25 }
  0x54   : > { %3144 = dma.done.wait (%p4599_p8), %s222_s29, 65536  }
  0x55   : > { %3146 = vsyncadd (%p4599_p8), %s222_s29, 4294901760 }
  0x56   : > { %3148 = dma.done.wait (%p55_p3), [#allocation7], 64  }
  0x57   : > { %3150 = vsyncadd (%p55_p3), [#allocation7], 4294967232  ;;  %p2786_p12 = scmp.ne.s32.totalorder %s3169_s15, 0 }
  0x59   : > { %259 = sbr.rel (%p2786_p12) target bundleno = 127 (0x7f), region = 48 }
  0x5e   : > { %v3187_v0 = vmov 0.0  }
  0x5f   : > { %260 = vst [vmem:[#allocation2 + $0xb0] sm:$0xff] %v3187_v0  ;;  %261 = vst [vmem:[#allocation2 + $0x1b0] sm:$0xff] %v3187_v0 }
  0x60   : > { %262 = vst [vmem:[#allocation2 + $0xd8] sm:$0xff] %v3187_v0  ;;  %263 = vst [vmem:[#allocation2 + $0x18] sm:$0xff] %v3187_v0 }
  0x61   : > { %264 = vst [vmem:[#allocation2 + $0x50] sm:$0xff] %v3187_v0  ;;  %265 = vst [vmem:[#allocation2 + $0x168] sm:$0xff] %v3187_v0 }
  0x62   : > { %266 = vst [vmem:[#allocation2 + $0x130] sm:$0xff] %v3187_v0  ;;  %267 = vst [vmem:[#allocation2 + $0x48] sm:$0xff] %v3187_v0 }
  0x63   : > { %268 = vst [vmem:[#allocation2 + $0x180] sm:$0xff] %v3187_v0  ;;  %269 = vst [vmem:[#allocation2 + $0x110] sm:$0xff] %v3187_v0 }
  0x64   : > { %270 = vst [vmem:[#allocation2 + $0x118] sm:$0xff] %v3187_v0  ;;  %271 = vst [vmem:[#allocation2 + $0x98] sm:$0xff] %v3187_v0 }
  0x65   : > { %272 = vst [vmem:[#allocation2 + $0x120] sm:$0xff] %v3187_v0  ;;  %273 = vst [vmem:[#allocation2 + $0x150] sm:$0xff] %v3187_v0 }
  0x66   : > { %274 = vst [vmem:[#allocation2 + $0x108] sm:$0xff] %v3187_v0  ;;  %275 = vst [vmem:[#allocation2 + $0x60] sm:$0xff] %v3187_v0 }
  0x67   : > { %276 = vst [vmem:[#allocation2 + $0xe0] sm:$0xff] %v3187_v0  ;;  %277 = vst [vmem:[#allocation2 + $0x188] sm:$0xff] %v3187_v0 }
  0x68   : > { %278 = vst [vmem:[#allocation2 + $0x138] sm:$0xff] %v3187_v0  ;;  %279 = vst [vmem:[#allocation2 + $0x140] sm:$0xff] %v3187_v0 }
  0x69   : > { %280 = vst [vmem:[#allocation2 + $0x80] sm:$0xff] %v3187_v0  ;;  %281 = vst [vmem:[#allocation2 + $0x1a8] sm:$0xff] %v3187_v0 }
  0x6a   : > { %282 = vst [vmem:[#allocation2 + $0x1b8] sm:$0xff] %v3187_v0  ;;  %283 = vst [vmem:[#allocation2 + $0x28] sm:$0xff] %v3187_v0 }
  0x6b   : > { %284 = vst [vmem:[#allocation2 + $0x1e8] sm:$0xff] %v3187_v0  ;;  %285 = vst [vmem:[#allocation2 + $0xf8] sm:$0xff] %v3187_v0 }
  0x6c   : > { %286 = vst [vmem:[#allocation2 + $0x160] sm:$0xff] %v3187_v0  ;;  %287 = vst [vmem:[#allocation2 + $0x30] sm:$0xff] %v3187_v0 }
  0x6d   : > { %288 = vst [vmem:[#allocation2 + $0x1e0] sm:$0xff] %v3187_v0  ;;  %289 = vst [vmem:[#allocation2] sm:$0xff] %v3187_v0 }
  0x6e   : > { %290 = vst [vmem:[#allocation2 + $0xf0] sm:$0xff] %v3187_v0  ;;  %291 = vst [vmem:[#allocation2 + $0x8] sm:$0xff] %v3187_v0 }
  0x6f   : > { %292 = vst [vmem:[#allocation2 + $0x148] sm:$0xff] %v3187_v0  ;;  %293 = vst [vmem:[#allocation2 + $0x1d0] sm:$0xff] %v3187_v0 }
  0x70   : > { %294 = vst [vmem:[#allocation2 + $0x100] sm:$0xff] %v3187_v0  ;;  %295 = vst [vmem:[#allocation2 + $0xc8] sm:$0xff] %v3187_v0 }
  0x71   : > { %296 = vst [vmem:[#allocation2 + $0x40] sm:$0xff] %v3187_v0  ;;  %297 = vst [vmem:[#allocation2 + $0x1f8] sm:$0xff] %v3187_v0 }
  0x72   : > { %298 = vst [vmem:[#allocation2 + $0x20] sm:$0xff] %v3187_v0  ;;  %299 = vst [vmem:[#allocation2 + $0x128] sm:$0xff] %v3187_v0 }
  0x73   : > { %300 = vst [vmem:[#allocation2 + $0x1a0] sm:$0xff] %v3187_v0  ;;  %301 = vst [vmem:[#allocation2 + $0x1f0] sm:$0xff] %v3187_v0 }
  0x74   : > { %302 = vst [vmem:[#allocation2 + $0xe8] sm:$0xff] %v3187_v0  ;;  %303 = vst [vmem:[#allocation2 + $0x78] sm:$0xff] %v3187_v0 }
  0x75   : > { %304 = vst [vmem:[#allocation2 + $0x70] sm:$0xff] %v3187_v0  ;;  %305 = vst [vmem:[#allocation2 + $0x90] sm:$0xff] %v3187_v0 }
  0x76   : > { %306 = vst [vmem:[#allocation2 + $0x1d8] sm:$0xff] %v3187_v0  ;;  %307 = vst [vmem:[#allocation2 + $0xd0] sm:$0xff] %v3187_v0 }
  0x77   : > { %308 = vst [vmem:[#allocation2 + $0xb8] sm:$0xff] %v3187_v0  ;;  %309 = vst [vmem:[#allocation2 + $0x88] sm:$0xff] %v3187_v0 }
  0x78   : > { %310 = vst [vmem:[#allocation2 + $0xa8] sm:$0xff] %v3187_v0  ;;  %311 = vst [vmem:[#allocation2 + $0x1c8] sm:$0xff] %v3187_v0 }
  0x79   : > { %312 = vst [vmem:[#allocation2 + $0x170] sm:$0xff] %v3187_v0  ;;  %313 = vst [vmem:[#allocation2 + $0x178] sm:$0xff] %v3187_v0 }
  0x7a   : > { %314 = vst [vmem:[#allocation2 + $0x68] sm:$0xff] %v3187_v0  ;;  %315 = vst [vmem:[#allocation2 + $0x190] sm:$0xff] %v3187_v0 }
  0x7b   : > { %316 = vst [vmem:[#allocation2 + $0x198] sm:$0xff] %v3187_v0  ;;  %317 = vst [vmem:[#allocation2 + $0x38] sm:$0xff] %v3187_v0 }
  0x7c   : > { %318 = vst [vmem:[#allocation2 + $0xc0] sm:$0xff] %v3187_v0  ;;  %319 = vst [vmem:[#allocation2 + $0x1c0] sm:$0xff] %v3187_v0 }
  0x7d   : > { %320 = vst [vmem:[#allocation2 + $0x158] sm:$0xff] %v3187_v0  ;;  %321 = vst [vmem:[#allocation2 + $0x10] sm:$0xff] %v3187_v0 }
  0x7e   : > { %322 = vst [vmem:[#allocation2 + $0x58] sm:$0xff] %v3187_v0  ;;  %323 = vst [vmem:[#allocation2 + $0xa0] sm:$0xff] %v3187_v0 }
  0x7f PF: > { %v577_v1 = vld [vmem:[%s3319_s30 + $0x1e8] sm:$0xff]  ;;  %v576_v3 = vld [vmem:[%s3319_s30 + $0x1e0] sm:$0xff]  ;;  %p2787_p3 = scmp.ne.s32.totalorder %s3169_s15, 7 }
  0x80   : > { %v705_v2 = vld [vmem:[%s3319_s30 + $0x5e8] sm:$0xff]  ;;  %1028 = vmatprep.subr.mxu0 %v577_v1  ;;  %v704_v4 = vld [vmem:[%s3319_s30 + $0x5e0] sm:$0xff] }
  0x81   : > { %1189 = vmatprep.subr.mxu1 %v705_v2  ;;  %v573_v5 = vld [vmem:[%s3319_s30 + $0x1c8] sm:$0xff]  ;;  %1029 = vmatpush1.msra.mxu0 %v576_v3  ;;  %v572_v7 = vld [vmem:[%s3319_s30 + $0x1c0] sm:$0xff] }
  0x82   : > { %v701_v6 = vld [vmem:[%s3319_s30 + $0x5c8] sm:$0xff]  ;;  %1190 = vmatpush1.msra.mxu1 %v704_v4  ;;  %v700_v8 = vld [vmem:[%s3319_s30 + $0x5c0] sm:$0xff]  ;;  %1030 = vmatprep.subr.mxu0 %v573_v5 }
  0x83   : > { %v569_v9 = vld [vmem:[%s3319_s30 + $0x1a8] sm:$0xff]  ;;  %1191 = vmatprep.subr.mxu1 %v701_v6  ;;  %v568_v11 = vld [vmem:[%s3319_s30 + $0x1a0] sm:$0xff]  ;;  %1031 = vmatpush1.msra.mxu0 %v572_v7 }
  0x84   : > { %v697_v10 = vld [vmem:[%s3319_s30 + $0x5a8] sm:$0xff]  ;;  %v696_v12 = vld [vmem:[%s3319_s30 + $0x5a0] sm:$0xff]  ;;  %1192 = vmatpush1.msra.mxu1 %v700_v8  ;;  %1032 = vmatprep.subr.mxu0 %v569_v9 }
  0x85   : > { %v565_v13 = vld [vmem:[%s3319_s30 + $0x188] sm:$0xff]  ;;  %1193 = vmatprep.subr.mxu1 %v697_v10  ;;  %v564_v15 = vld [vmem:[%s3319_s30 + $0x180] sm:$0xff]  ;;  %1033 = vmatpush1.msra.mxu0 %v568_v11 }
  0x86   : > { %v693_v14 = vld [vmem:[%s3319_s30 + $0x588] sm:$0xff]  ;;  %v692_v16 = vld [vmem:[%s3319_s30 + $0x580] sm:$0xff]  ;;  %1194 = vmatpush1.msra.mxu1 %v696_v12  ;;  %1034 = vmatprep.subr.mxu0 %v565_v13 }
  0x87   : > { %v561_v17 = vld [vmem:[%s3319_s30 + $0x168] sm:$0xff]  ;;  %1195 = vmatprep.subr.mxu1 %v693_v14  ;;  %v560_v19 = vld [vmem:[%s3319_s30 + $0x160] sm:$0xff]  ;;  %1035 = vmatpush1.msra.mxu0 %v564_v15 }
  0x88   : > { %v689_v18 = vld [vmem:[%s3319_s30 + $0x568] sm:$0xff]  ;;  %v688_v20 = vld [vmem:[%s3319_s30 + $0x560] sm:$0xff]  ;;  %1196 = vmatpush1.msra.mxu1 %v692_v16  ;;  %1036 = vmatprep.subr.mxu0 %v561_v17 }
  0x89   : > { %v557_v21 = vld [vmem:[%s3319_s30 + $0x148] sm:$0xff]  ;;  %1197 = vmatprep.subr.mxu1 %v689_v18  ;;  %v556_v23 = vld [vmem:[%s3319_s30 + $0x140] sm:$0xff]  ;;  %1037 = vmatpush1.msra.mxu0 %v560_v19 }
  0x8a   : > { %v685_v22 = vld [vmem:[%s3319_s30 + $0x548] sm:$0xff]  ;;  %v684_v24 = vld [vmem:[%s3319_s30 + $0x540] sm:$0xff]  ;;  %1198 = vmatpush1.msra.mxu1 %v688_v20  ;;  %1038 = vmatprep.subr.mxu0 %v557_v21 }
  0x8b   : > { %v553_v25 = vld [vmem:[%s3319_s30 + $0x128] sm:$0xff]  ;;  %1199 = vmatprep.subr.mxu1 %v685_v22  ;;  %v552_v27 = vld [vmem:[%s3319_s30 + $0x120] sm:$0xff]  ;;  %1039 = vmatpush1.msra.mxu0 %v556_v23 }
  0x8c   : > { %v681_v26 = vld [vmem:[%s3319_s30 + $0x528] sm:$0xff]  ;;  %v680_v28 = vld [vmem:[%s3319_s30 + $0x520] sm:$0xff]  ;;  %1200 = vmatpush1.msra.mxu1 %v684_v24  ;;  %1040 = vmatprep.subr.mxu0 %v553_v25 }
  0x8d   : > { %v549_v29 = vld [vmem:[%s3319_s30 + $0x108] sm:$0xff]  ;;  %1201 = vmatprep.subr.mxu1 %v681_v26  ;;  %v548_v31 = vld [vmem:[%s3319_s30 + $0x100] sm:$0xff]  ;;  %1041 = vmatpush1.msra.mxu0 %v552_v27 }
  0x8e   : > { %v677_v30 = vld [vmem:[%s3319_s30 + $0x508] sm:$0xff]  ;;  %v676_v32 = vld [vmem:[%s3319_s30 + $0x500] sm:$0xff]  ;;  %1202 = vmatpush1.msra.mxu1 %v680_v28  ;;  %1042 = vmatprep.subr.mxu0 %v549_v29 }
  0x8f   : > { %v545_v33 = vld [vmem:[%s3319_s30 + $0xe8] sm:$0xff]  ;;  %1203 = vmatprep.subr.mxu1 %v677_v30  ;;  %v544_v35 = vld [vmem:[%s3319_s30 + $0xe0] sm:$0xff]  ;;  %1043 = vmatpush1.msra.mxu0 %v548_v31 }
  0x90   : > { %v673_v34 = vld [vmem:[%s3319_s30 + $0x4e8] sm:$0xff]  ;;  %v672_v36 = vld [vmem:[%s3319_s30 + $0x4e0] sm:$0xff]  ;;  %1204 = vmatpush1.msra.mxu1 %v676_v32  ;;  %1044 = vmatprep.subr.mxu0 %v545_v33 }
  0x91   : > { %v541_v37 = vld [vmem:[%s3319_s30 + $0xc8] sm:$0xff]  ;;  %1205 = vmatprep.subr.mxu1 %v673_v34  ;;  %v540_v39 = vld [vmem:[%s3319_s30 + $0xc0] sm:$0xff]  ;;  %1045 = vmatpush1.msra.mxu0 %v544_v35 }
  0x92   : > { %v669_v38 = vld [vmem:[%s3319_s30 + $0x4c8] sm:$0xff]  ;;  %v668_v40 = vld [vmem:[%s3319_s30 + $0x4c0] sm:$0xff]  ;;  %1206 = vmatpush1.msra.mxu1 %v672_v36  ;;  %1046 = vmatprep.subr.mxu0 %v541_v37 }
  0x93   : > { %v537_v41 = vld [vmem:[%s3319_s30 + $0xa8] sm:$0xff]  ;;  %1207 = vmatprep.subr.mxu1 %v669_v38  ;;  %v536_v43 = vld [vmem:[%s3319_s30 + $0xa0] sm:$0xff]  ;;  %1047 = vmatpush1.msra.mxu0 %v540_v39 }
  0x94   : > { %v665_v42 = vld [vmem:[%s3319_s30 + $0x4a8] sm:$0xff]  ;;  %v664_v44 = vld [vmem:[%s3319_s30 + $0x4a0] sm:$0xff]  ;;  %1208 = vmatpush1.msra.mxu1 %v668_v40  ;;  %1048 = vmatprep.subr.mxu0 %v537_v41 }
  0x95   : > { %v533_v45 = vld [vmem:[%s3319_s30 + $0x88] sm:$0xff]  ;;  %1209 = vmatprep.subr.mxu1 %v665_v42  ;;  %v532_v47 = vld [vmem:[%s3319_s30 + $0x80] sm:$0xff]  ;;  %1049 = vmatpush1.msra.mxu0 %v536_v43 }
  0x96   : > { %v661_v46 = vld [vmem:[%s3319_s30 + $0x488] sm:$0xff]  ;;  %v660_v48 = vld [vmem:[%s3319_s30 + $0x480] sm:$0xff]  ;;  %1210 = vmatpush1.msra.mxu1 %v664_v44  ;;  %1050 = vmatprep.subr.mxu0 %v533_v45 }
  0x97   : > { %v529_v49 = vld [vmem:[%s3319_s30 + $0x68] sm:$0xff]  ;;  %1211 = vmatprep.subr.mxu1 %v661_v46  ;;  %v528_v51 = vld [vmem:[%s3319_s30 + $0x60] sm:$0xff]  ;;  %1051 = vmatpush1.msra.mxu0 %v532_v47 }
  0x98   : > { %v657_v50 = vld [vmem:[%s3319_s30 + $0x468] sm:$0xff]  ;;  %v656_v52 = vld [vmem:[%s3319_s30 + $0x460] sm:$0xff]  ;;  %1212 = vmatpush1.msra.mxu1 %v660_v48  ;;  %1052 = vmatprep.subr.mxu0 %v529_v49 }
  0x99   : > { %v525_v53 = vld [vmem:[%s3319_s30 + $0x48] sm:$0xff]  ;;  %1213 = vmatprep.subr.mxu1 %v657_v50  ;;  %v524_v55 = vld [vmem:[%s3319_s30 + $0x40] sm:$0xff]  ;;  %1053 = vmatpush1.msra.mxu0 %v528_v51 }
  0x9a   : > { %v653_v54 = vld [vmem:[%s3319_s30 + $0x448] sm:$0xff]  ;;  %v652_v56 = vld [vmem:[%s3319_s30 + $0x440] sm:$0xff]  ;;  %1214 = vmatpush1.msra.mxu1 %v656_v52  ;;  %1054 = vmatprep.subr.mxu0 %v525_v53 }
  0x9b   : > { %v521_v57 = vld [vmem:[%s3319_s30 + $0x28] sm:$0xff]  ;;  %1215 = vmatprep.subr.mxu1 %v653_v54  ;;  %v520_v59 = vld [vmem:[%s3319_s30 + $0x20] sm:$0xff]  ;;  %1055 = vmatpush1.msra.mxu0 %v524_v55 }
  0x9c   : > { %v649_v58 = vld [vmem:[%s3319_s30 + $0x428] sm:$0xff]  ;;  %v648_v60 = vld [vmem:[%s3319_s30 + $0x420] sm:$0xff]  ;;  %1216 = vmatpush1.msra.mxu1 %v652_v56  ;;  %1056 = vmatprep.subr.mxu0 %v521_v57 }
  0x9d   : > { %v517_v61 = vld [vmem:[%s3319_s30 + $0x8] sm:$0xff]  ;;  %1217 = vmatprep.subr.mxu1 %v649_v58  ;;  %v516_v63 = vld [vmem:[%s3319_s30] sm:$0xff]  ;;  %1057 = vmatpush1.msra.mxu0 %v520_v59 }
  0x9e   : > { %v645_v62 = vld [vmem:[%s3319_s30 + $0x408] sm:$0xff]  ;;  %v644_v0 = vld [vmem:[%s3319_s30 + $0x400] sm:$0xff]  ;;  %1218 = vmatpush1.msra.mxu1 %v648_v60  ;;  %1058 = vmatprep.subr.mxu0 %v517_v61 }
  0x9f   : > { %v641_v1 = vld [vmem:[%s3319_s30 + $0x3e8] sm:$0xff]  ;;  %1219 = vmatprep.subr.mxu1 %v645_v62  ;;  %v640_v3 = vld [vmem:[%s3319_s30 + $0x3e0] sm:$0xff]  ;;  %1059 = vmatpush1.msra.mxu0 %v516_v63 }
  0xa0   : > { %v769_v2 = vld [vmem:[%s3319_s30 + $0x7e8] sm:$0xff]  ;;  %v768_v4 = vld [vmem:[%s3319_s30 + $0x7e0] sm:$0xff]  ;;  %1220 = vmatpush1.msra.mxu1 %v644_v0  ;;  %1060 = vmatprep.subr.mxu0 %v641_v1 }
  0xa1   : > { %v637_v5 = vld [vmem:[%s3319_s30 + $0x3c8] sm:$0xff]  ;;  %1221 = vmatprep.subr.mxu1 %v769_v2  ;;  %v636_v7 = vld [vmem:[%s3319_s30 + $0x3c0] sm:$0xff]  ;;  %1061 = vmatpush2.msra.mxu0 %v640_v3  ;;  %v391_v2 = vld [vmem:[%s3312_s19 + $0x18] sm:$0xff] }
  0xa2   : > { %v765_v6 = vld [vmem:[%s3319_s30 + $0x7c8] sm:$0xff]  ;;  %v764_v8 = vld [vmem:[%s3319_s30 + $0x7c0] sm:$0xff]  ;;  %1222 = vmatpush2.msra.mxu1 %v768_v4  ;;  %1062 = vmatprep.subr.mxu0 %v637_v5  ;;  %v390_v4 = vld [vmem:[%s3312_s19 + $0x10] sm:$0xff] }
  0xa3   : > { %v633_v9 = vld [vmem:[%s3319_s30 + $0x3a8] sm:$0xff]  ;;  %1223 = vmatprep.subr.mxu1 %v765_v6  ;;  %v632_v11 = vld [vmem:[%s3319_s30 + $0x3a0] sm:$0xff]  ;;  %1063 = vmatpush2.msra.mxu0 %v636_v7 }
  0xa4   : > { %v761_v10 = vld [vmem:[%s3319_s30 + $0x7a8] sm:$0xff]  ;;  %v760_v12 = vld [vmem:[%s3319_s30 + $0x7a0] sm:$0xff]  ;;  %1224 = vmatpush2.msra.mxu1 %v764_v8  ;;  %1064 = vmatprep.subr.mxu0 %v633_v9 }
  0xa5   : > { %v629_v13 = vld [vmem:[%s3319_s30 + $0x388] sm:$0xff]  ;;  %1225 = vmatprep.subr.mxu1 %v761_v10  ;;  %v628_v15 = vld [vmem:[%s3319_s30 + $0x380] sm:$0xff]  ;;  %1065 = vmatpush2.msra.mxu0 %v632_v11 }
  0xa6   : > { %v757_v14 = vld [vmem:[%s3319_s30 + $0x788] sm:$0xff]  ;;  %v756_v16 = vld [vmem:[%s3319_s30 + $0x780] sm:$0xff]  ;;  %1226 = vmatpush2.msra.mxu1 %v760_v12  ;;  %1066 = vmatprep.subr.mxu0 %v629_v13  ;;  %v399_v12 = vld [vmem:[%s3312_s19 + $0x58] sm:$0xff] }
  0xa7   : > { %v625_v17 = vld [vmem:[%s3319_s30 + $0x368] sm:$0xff]  ;;  %1227 = vmatprep.subr.mxu1 %v757_v14  ;;  %v624_v19 = vld [vmem:[%s3319_s30 + $0x360] sm:$0xff]  ;;  %1067 = vmatpush2.msra.mxu0 %v628_v15 }
  0xa8   : > { %v753_v18 = vld [vmem:[%s3319_s30 + $0x768] sm:$0xff]  ;;  %v752_v20 = vld [vmem:[%s3319_s30 + $0x760] sm:$0xff]  ;;  %1228 = vmatpush2.msra.mxu1 %v756_v16  ;;  %1068 = vmatprep.subr.mxu0 %v625_v17  ;;  %v398_v16 = vld [vmem:[%s3312_s19 + $0x50] sm:$0xff] }
  0xa9   : > { %v621_v21 = vld [vmem:[%s3319_s30 + $0x348] sm:$0xff]  ;;  %1229 = vmatprep.subr.mxu1 %v753_v18  ;;  %v620_v23 = vld [vmem:[%s3319_s30 + $0x340] sm:$0xff]  ;;  %1069 = vmatpush2.msra.mxu0 %v624_v19 }
  0xaa   : > { %v749_v22 = vld [vmem:[%s3319_s30 + $0x748] sm:$0xff]  ;;  %v748_v24 = vld [vmem:[%s3319_s30 + $0x740] sm:$0xff]  ;;  %1230 = vmatpush2.msra.mxu1 %v752_v20  ;;  %1070 = vmatprep.subr.mxu0 %v621_v21 }
  0xab   : > { %v617_v25 = vld [vmem:[%s3319_s30 + $0x328] sm:$0xff]  ;;  %1231 = vmatprep.subr.mxu1 %v749_v22  ;;  %v616_v27 = vld [vmem:[%s3319_s30 + $0x320] sm:$0xff]  ;;  %1071 = vmatpush2.msra.mxu0 %v620_v23 }
  0xac   : > { %v745_v26 = vld [vmem:[%s3319_s30 + $0x728] sm:$0xff]  ;;  %v744_v28 = vld [vmem:[%s3319_s30 + $0x720] sm:$0xff]  ;;  %1232 = vmatpush2.msra.mxu1 %v748_v24  ;;  %1072 = vmatprep.subr.mxu0 %v617_v25  ;;  %v407_v24 = vld [vmem:[%s3312_s19 + $0x98] sm:$0xff] }
  0xad   : > { %v613_v29 = vld [vmem:[%s3319_s30 + $0x308] sm:$0xff]  ;;  %1233 = vmatprep.subr.mxu1 %v745_v26  ;;  %v612_v31 = vld [vmem:[%s3319_s30 + $0x300] sm:$0xff]  ;;  %1073 = vmatpush2.msra.mxu0 %v616_v27 }
  0xae   : > { %v741_v30 = vld [vmem:[%s3319_s30 + $0x708] sm:$0xff]  ;;  %v740_v32 = vld [vmem:[%s3319_s30 + $0x700] sm:$0xff]  ;;  %1234 = vmatpush2.msra.mxu1 %v744_v28  ;;  %1074 = vmatprep.subr.mxu0 %v613_v29  ;;  %v406_v28 = vld [vmem:[%s3312_s19 + $0x90] sm:$0xff] }
  0xaf   : > { %v609_v33 = vld [vmem:[%s3319_s30 + $0x2e8] sm:$0xff]  ;;  %1235 = vmatprep.subr.mxu1 %v741_v30  ;;  %v608_v35 = vld [vmem:[%s3319_s30 + $0x2e0] sm:$0xff]  ;;  %1075 = vmatpush2.msra.mxu0 %v612_v31 }
  0xb0   : > { %v737_v34 = vld [vmem:[%s3319_s30 + $0x6e8] sm:$0xff]  ;;  %v736_v36 = vld [vmem:[%s3319_s30 + $0x6e0] sm:$0xff]  ;;  %1236 = vmatpush2.msra.mxu1 %v740_v32  ;;  %1076 = vmatprep.subr.mxu0 %v609_v33 }
  0xb1   : > { %v605_v37 = vld [vmem:[%s3319_s30 + $0x2c8] sm:$0xff]  ;;  %1237 = vmatprep.subr.mxu1 %v737_v34  ;;  %v604_v39 = vld [vmem:[%s3319_s30 + $0x2c0] sm:$0xff]  ;;  %1077 = vmatpush2.msra.mxu0 %v608_v35 }
  0xb2   : > { %v733_v38 = vld [vmem:[%s3319_s30 + $0x6c8] sm:$0xff]  ;;  %v732_v40 = vld [vmem:[%s3319_s30 + $0x6c0] sm:$0xff]  ;;  %1238 = vmatpush2.msra.mxu1 %v736_v36  ;;  %1078 = vmatprep.subr.mxu0 %v605_v37  ;;  %v415_v36 = vld [vmem:[%s3312_s19 + $0xd8] sm:$0xff] }
  0xb3   : > { %v601_v41 = vld [vmem:[%s3319_s30 + $0x2a8] sm:$0xff]  ;;  %1239 = vmatprep.subr.mxu1 %v733_v38  ;;  %v600_v43 = vld [vmem:[%s3319_s30 + $0x2a0] sm:$0xff]  ;;  %1079 = vmatpush2.msra.mxu0 %v604_v39 }
  0xb4   : > { %v729_v42 = vld [vmem:[%s3319_s30 + $0x6a8] sm:$0xff]  ;;  %v728_v44 = vld [vmem:[%s3319_s30 + $0x6a0] sm:$0xff]  ;;  %1240 = vmatpush2.msra.mxu1 %v732_v40  ;;  %1080 = vmatprep.subr.mxu0 %v601_v41  ;;  %v414_v40 = vld [vmem:[%s3312_s19 + $0xd0] sm:$0xff] }
  0xb5   : > { %v597_v45 = vld [vmem:[%s3319_s30 + $0x288] sm:$0xff]  ;;  %1241 = vmatprep.subr.mxu1 %v729_v42  ;;  %v596_v47 = vld [vmem:[%s3319_s30 + $0x280] sm:$0xff]  ;;  %1081 = vmatpush2.msra.mxu0 %v600_v43 }
  0xb6   : > { %v725_v46 = vld [vmem:[%s3319_s30 + $0x688] sm:$0xff]  ;;  %v724_v48 = vld [vmem:[%s3319_s30 + $0x680] sm:$0xff]  ;;  %1242 = vmatpush2.msra.mxu1 %v728_v44  ;;  %1082 = vmatprep.subr.mxu0 %v597_v45 }
  0xb7   : > { %v593_v49 = vld [vmem:[%s3319_s30 + $0x268] sm:$0xff]  ;;  %1243 = vmatprep.subr.mxu1 %v725_v46  ;;  %v592_v51 = vld [vmem:[%s3319_s30 + $0x260] sm:$0xff]  ;;  %1083 = vmatpush2.msra.mxu0 %v596_v47 }
  0xb8   : > { %v721_v50 = vld [vmem:[%s3319_s30 + $0x668] sm:$0xff]  ;;  %v720_v52 = vld [vmem:[%s3319_s30 + $0x660] sm:$0xff]  ;;  %1244 = vmatpush2.msra.mxu1 %v724_v48  ;;  %1084 = vmatprep.subr.mxu0 %v593_v49  ;;  %v423_v48 = vld [vmem:[%s3312_s19 + $0x118] sm:$0xff] }
  0xb9   : > { %v589_v53 = vld [vmem:[%s3319_s30 + $0x248] sm:$0xff]  ;;  %1245 = vmatprep.subr.mxu1 %v721_v50  ;;  %v588_v55 = vld [vmem:[%s3319_s30 + $0x240] sm:$0xff]  ;;  %1085 = vmatpush2.msra.mxu0 %v592_v51 }
  0xba   : > { %v717_v54 = vld [vmem:[%s3319_s30 + $0x648] sm:$0xff]  ;;  %v716_v56 = vld [vmem:[%s3319_s30 + $0x640] sm:$0xff]  ;;  %1246 = vmatpush2.msra.mxu1 %v720_v52  ;;  %1086 = vmatprep.subr.mxu0 %v589_v53  ;;  %v422_v52 = vld [vmem:[%s3312_s19 + $0x110] sm:$0xff] }
  0xbb   : > { %v585_v57 = vld [vmem:[%s3319_s30 + $0x228] sm:$0xff]  ;;  %1247 = vmatprep.subr.mxu1 %v717_v54  ;;  %v584_v59 = vld [vmem:[%s3319_s30 + $0x220] sm:$0xff]  ;;  %1087 = vmatpush2.msra.mxu0 %v588_v55 }
  0xbc   : > { %v713_v58 = vld [vmem:[%s3319_s30 + $0x628] sm:$0xff]  ;;  %v712_v60 = vld [vmem:[%s3319_s30 + $0x620] sm:$0xff]  ;;  %1248 = vmatpush2.msra.mxu1 %v716_v56  ;;  %1088 = vmatprep.subr.mxu0 %v585_v57 }
  0xbd   : > { %v581_v61 = vld [vmem:[%s3319_s30 + $0x208] sm:$0xff]  ;;  %1249 = vmatprep.subr.mxu1 %v713_v58  ;;  %v580_v63 = vld [vmem:[%s3319_s30 + $0x200] sm:$0xff]  ;;  %1089 = vmatpush2.msra.mxu0 %v584_v59 }
  0xbe   : > { %v709_v62 = vld [vmem:[%s3319_s30 + $0x608] sm:$0xff]  ;;  %1250 = vmatpush2.msra.mxu1 %v712_v60  ;;  %v708_v1 = vld [vmem:[%s3319_s30 + $0x600] sm:$0xff]  ;;  %1090 = vmatprep.subr.mxu0 %v581_v61  ;;  %v431_v60 = vld [vmem:[%s3312_s19 + $0x158] sm:$0xff] }
  0xbf   : > { %v389_v0 = vld [vmem:[%s3312_s19 + $0x8] sm:$0xff]  ;;  %1251 = vmatprep.subr.mxu1 %v709_v62  ;;  %v388_v3 = vld [vmem:[%s3312_s19] sm:$0xff]  ;;  %1091 = vmatpush2.msra.mxu0 %v580_v63 }
  0xc0   : > { %1092 = vmatprep.mubr.f32.mxu0 %v389_v0  ;;  %v833_v5 = vld [vmem:[%s3319_s30 + $0x9e8] sm:$0xff]  ;;  %1252 = vmatpush2.msra.mxu1 %v708_v1  ;;  %v832_v7 = vld [vmem:[%s3319_s30 + $0x9e0] sm:$0xff]  ;;  %v430_v0 = vld [vmem:[%s3312_s19 + $0x150] sm:$0xff] }
  0xc1   : > { %v961_v6 = vld [vmem:[%s3319_s30 + $0xde8] sm:$0xff]  ;;  %1253 = vmatprep.mubr.f32.mxu1 %v391_v2  ;;  %v960_v8 = vld [vmem:[%s3319_s30 + $0xde0] sm:$0xff]  ;;  %1093 = vmatmul.mubr.f32.vlgmr.msra.gmra.mxu0 %v388_v3 }
  0xc2   : > { %1254 = vmatmul.mubr.f32.vlgmr.msra.gmra.mxu1 %v390_v4  ;;  %v829_v9 = vld [vmem:[%s3319_s30 + $0x9c8] sm:$0xff]  ;;  %1350 = vmatprep.subr.mxu0 %v833_v5  ;;  %v828_v13 = vld [vmem:[%s3319_s30 + $0x9c0] sm:$0xff] }
  0xc3   : > { %v957_v10 = vld [vmem:[%s3319_s30 + $0xdc8] sm:$0xff]  ;;  %1511 = vmatprep.subr.mxu1 %v961_v6  ;;  %1351 = vmatpush1.msra.mxu0 %v832_v7  ;;  %v956_v14 = vld [vmem:[%s3319_s30 + $0xdc0] sm:$0xff] }
  0xc4   : > { %v397_v11 = vld [vmem:[%s3312_s19 + $0x48] sm:$0xff]  ;;  %1512 = vmatpush1.msra.mxu1 %v960_v8  ;;  %1352 = vmatprep.subr.mxu0 %v829_v9  ;;  %v396_v15 = vld [vmem:[%s3312_s19 + $0x40] sm:$0xff]  ;;  %v439_v8 = vld [vmem:[%s3312_s19 + $0x198] sm:$0xff] }
  0xc5   : > { %1513 = vmatprep.subr.mxu1 %v957_v10  ;;  %1098 = vmatprep.mubr.f32.mxu0 %v397_v11  ;;  %v825_v17 = vld [vmem:[%s3319_s30 + $0x9a8] sm:$0xff]  ;;  %v824_v19 = vld [vmem:[%s3319_s30 + $0x9a0] sm:$0xff] }
  0xc6   : > { %1259 = vmatprep.mubr.f32.mxu1 %v399_v12  ;;  %v953_v18 = vld [vmem:[%s3319_s30 + $0xda8] sm:$0xff]  ;;  %1353 = vmatpush1.msra.mxu0 %v828_v13  ;;  %v952_v20 = vld [vmem:[%s3319_s30 + $0xda0] sm:$0xff]  ;;  %v438_v12 = vld [vmem:[%s3312_s19 + $0x190] sm:$0xff] }
  0xc7   : > { %1514 = vmatpush1.msra.mxu1 %v956_v14  ;;  %1099 = vmatmul.mubr.f32.gmra.mxu0 %v396_v15  ;;  %v821_v21 = vld [vmem:[%s3319_s30 + $0x988] sm:$0xff]  ;;  %v820_v25 = vld [vmem:[%s3319_s30 + $0x980] sm:$0xff] }
  0xc8   : > { %1260 = vmatmul.mubr.f32.gmra.mxu1 %v398_v16  ;;  %v949_v22 = vld [vmem:[%s3319_s30 + $0xd88] sm:$0xff]  ;;  %1354 = vmatprep.subr.mxu0 %v825_v17  ;;  %v948_v26 = vld [vmem:[%s3319_s30 + $0xd80] sm:$0xff] }
  0xc9   : > { %1515 = vmatprep.subr.mxu1 %v953_v18  ;;  %v405_v23 = vld [vmem:[%s3312_s19 + $0x88] sm:$0xff]  ;;  %1355 = vmatpush1.msra.mxu0 %v824_v19  ;;  %v404_v27 = vld [vmem:[%s3312_s19 + $0x80] sm:$0xff] }
  0xca   : > { %1516 = vmatpush1.msra.mxu1 %v952_v20  ;;  %1356 = vmatprep.subr.mxu0 %v821_v21  ;;  %v817_v29 = vld [vmem:[%s3319_s30 + $0x968] sm:$0xff]  ;;  %v816_v31 = vld [vmem:[%s3319_s30 + $0x960] sm:$0xff]  ;;  %v447_v20 = vld [vmem:[%s3312_s19 + $0x1d8] sm:$0xff] }
  0xcb   : > { %1517 = vmatprep.subr.mxu1 %v949_v22  ;;  %1104 = vmatprep.mubr.f32.mxu0 %v405_v23  ;;  %v945_v30 = vld [vmem:[%s3319_s30 + $0xd68] sm:$0xff]  ;;  %v944_v32 = vld [vmem:[%s3319_s30 + $0xd60] sm:$0xff] }
  0xcc   : > { %1265 = vmatprep.mubr.f32.mxu1 %v407_v24  ;;  %1357 = vmatpush1.msra.mxu0 %v820_v25  ;;  %v813_v33 = vld [vmem:[%s3319_s30 + $0x948] sm:$0xff]  ;;  %v812_v37 = vld [vmem:[%s3319_s30 + $0x940] sm:$0xff]  ;;  %v446_v24 = vld [vmem:[%s3312_s19 + $0x1d0] sm:$0xff] }
  0xcd   : > { %1518 = vmatpush1.msra.mxu1 %v948_v26  ;;  %1105 = vmatmul.mubr.f32.gmra.mxu0 %v404_v27  ;;  %v941_v34 = vld [vmem:[%s3319_s30 + $0xd48] sm:$0xff]  ;;  %v940_v38 = vld [vmem:[%s3319_s30 + $0xd40] sm:$0xff] }
  0xce   : > { %1266 = vmatmul.mubr.f32.gmra.mxu1 %v406_v28  ;;  %1358 = vmatprep.subr.mxu0 %v817_v29  ;;  %v413_v35 = vld [vmem:[%s3312_s19 + $0xc8] sm:$0xff]  ;;  %v412_v39 = vld [vmem:[%s3312_s19 + $0xc0] sm:$0xff] }
  0xcf   : > { %1519 = vmatprep.subr.mxu1 %v945_v30  ;;  %1359 = vmatpush1.msra.mxu0 %v816_v31  ;;  %v809_v41 = vld [vmem:[%s3319_s30 + $0x928] sm:$0xff]  ;;  %v808_v43 = vld [vmem:[%s3319_s30 + $0x920] sm:$0xff] }
  0xd0   : > { %1520 = vmatpush1.msra.mxu1 %v944_v32  ;;  %1360 = vmatprep.subr.mxu0 %v813_v33  ;;  %v937_v42 = vld [vmem:[%s3319_s30 + $0xd28] sm:$0xff]  ;;  %v936_v44 = vld [vmem:[%s3319_s30 + $0xd20] sm:$0xff]  ;;  %v455_v32 = vld [vmem:[%s3312_s19 + $0x218] sm:$0xff] }
  0xd1   : > { %1521 = vmatprep.subr.mxu1 %v941_v34  ;;  %1110 = vmatprep.mubr.f32.mxu0 %v413_v35  ;;  %v805_v45 = vld [vmem:[%s3319_s30 + $0x908] sm:$0xff]  ;;  %v804_v49 = vld [vmem:[%s3319_s30 + $0x900] sm:$0xff] }
  0xd2   : > { %1271 = vmatprep.mubr.f32.mxu1 %v415_v36  ;;  %1361 = vmatpush1.msra.mxu0 %v812_v37  ;;  %v933_v46 = vld [vmem:[%s3319_s30 + $0xd08] sm:$0xff]  ;;  %v932_v50 = vld [vmem:[%s3319_s30 + $0xd00] sm:$0xff]  ;;  %v454_v36 = vld [vmem:[%s3312_s19 + $0x210] sm:$0xff] }
  0xd3   : > { %1522 = vmatpush1.msra.mxu1 %v940_v38  ;;  %1111 = vmatmul.mubr.f32.gmra.mxu0 %v412_v39  ;;  %v421_v47 = vld [vmem:[%s3312_s19 + $0x108] sm:$0xff]  ;;  %v420_v51 = vld [vmem:[%s3312_s19 + $0x100] sm:$0xff] }
  0xd4   : > { %1272 = vmatmul.mubr.f32.gmra.mxu1 %v414_v40  ;;  %1362 = vmatprep.subr.mxu0 %v809_v41  ;;  %v801_v53 = vld [vmem:[%s3319_s30 + $0x8e8] sm:$0xff]  ;;  %v800_v55 = vld [vmem:[%s3319_s30 + $0x8e0] sm:$0xff] }
  0xd5   : > { %1523 = vmatprep.subr.mxu1 %v937_v42  ;;  %1363 = vmatpush1.msra.mxu0 %v808_v43  ;;  %v929_v54 = vld [vmem:[%s3319_s30 + $0xce8] sm:$0xff]  ;;  %v928_v56 = vld [vmem:[%s3319_s30 + $0xce0] sm:$0xff] }
  0xd6   : > { %1524 = vmatpush1.msra.mxu1 %v936_v44  ;;  %1364 = vmatprep.subr.mxu0 %v805_v45  ;;  %v797_v57 = vld [vmem:[%s3319_s30 + $0x8c8] sm:$0xff]  ;;  %v796_v61 = vld [vmem:[%s3319_s30 + $0x8c0] sm:$0xff]  ;;  %v463_v44 = vld [vmem:[%s3312_s19 + $0x258] sm:$0xff] }
  0xd7   : > { %1525 = vmatprep.subr.mxu1 %v933_v46  ;;  %1116 = vmatprep.mubr.f32.mxu0 %v421_v47  ;;  %v925_v58 = vld [vmem:[%s3319_s30 + $0xcc8] sm:$0xff]  ;;  %v924_v62 = vld [vmem:[%s3319_s30 + $0xcc0] sm:$0xff] }
  0xd8   : > { %1277 = vmatprep.mubr.f32.mxu1 %v423_v48  ;;  %1365 = vmatpush1.msra.mxu0 %v804_v49  ;;  %v429_v59 = vld [vmem:[%s3312_s19 + $0x148] sm:$0xff]  ;;  %v428_v63 = vld [vmem:[%s3312_s19 + $0x140] sm:$0xff]  ;;  %v462_v48 = vld [vmem:[%s3312_s19 + $0x250] sm:$0xff] }
  0xd9   : > { %1526 = vmatpush1.msra.mxu1 %v932_v50  ;;  %1117 = vmatmul.mubr.f32.gmra.mxu0 %v420_v51  ;;  %v793_v1 = vld [vmem:[%s3319_s30 + $0x8a8] sm:$0xff]  ;;  %v792_v3 = vld [vmem:[%s3319_s30 + $0x8a0] sm:$0xff] }
  0xda   : > { %1278 = vmatmul.mubr.f32.gmra.mxu1 %v422_v52  ;;  %1366 = vmatprep.subr.mxu0 %v801_v53  ;;  %v921_v2 = vld [vmem:[%s3319_s30 + $0xca8] sm:$0xff]  ;;  %v920_v4 = vld [vmem:[%s3319_s30 + $0xca0] sm:$0xff] }
  0xdb   : > { %1527 = vmatprep.subr.mxu1 %v929_v54  ;;  %1367 = vmatpush1.msra.mxu0 %v800_v55  ;;  %v789_v5 = vld [vmem:[%s3319_s30 + $0x888] sm:$0xff]  ;;  %v788_v9 = vld [vmem:[%s3319_s30 + $0x880] sm:$0xff] }
  0xdc   : > { %1528 = vmatpush1.msra.mxu1 %v928_v56  ;;  %1368 = vmatprep.subr.mxu0 %v797_v57  ;;  %v917_v6 = vld [vmem:[%s3319_s30 + $0xc88] sm:$0xff]  ;;  %v916_v10 = vld [vmem:[%s3319_s30 + $0xc80] sm:$0xff]  ;;  %v471_v56 = vld [vmem:[%s3312_s19 + $0x298] sm:$0xff] }
  0xdd   : > { %1529 = vmatprep.subr.mxu1 %v925_v58  ;;  %1122 = vmatprep.mubr.f32.mxu0 %v429_v59  ;;  %v437_v7 = vld [vmem:[%s3312_s19 + $0x188] sm:$0xff]  ;;  %v436_v11 = vld [vmem:[%s3312_s19 + $0x180] sm:$0xff] }
  0xde   : > { %1283 = vmatprep.mubr.f32.mxu1 %v431_v60  ;;  %1369 = vmatpush1.msra.mxu0 %v796_v61  ;;  %v785_v13 = vld [vmem:[%s3319_s30 + $0x868] sm:$0xff]  ;;  %v784_v15 = vld [vmem:[%s3319_s30 + $0x860] sm:$0xff]  ;;  %v470_v60 = vld [vmem:[%s3312_s19 + $0x290] sm:$0xff] }
  0xdf   : > { %1530 = vmatpush1.msra.mxu1 %v924_v62  ;;  %1123 = vmatmul.mubr.f32.gmra.mxu0 %v428_v63  ;;  %v913_v14 = vld [vmem:[%s3319_s30 + $0xc68] sm:$0xff]  ;;  %v912_v16 = vld [vmem:[%s3319_s30 + $0xc60] sm:$0xff] }
  0xe0   : > { %1284 = vmatmul.mubr.f32.gmra.mxu1 %v430_v0  ;;  %1370 = vmatprep.subr.mxu0 %v793_v1  ;;  %v781_v17 = vld [vmem:[%s3319_s30 + $0x848] sm:$0xff]  ;;  %v780_v21 = vld [vmem:[%s3319_s30 + $0x840] sm:$0xff] }
  0xe1   : > { %1531 = vmatprep.subr.mxu1 %v921_v2  ;;  %1371 = vmatpush1.msra.mxu0 %v792_v3  ;;  %v909_v18 = vld [vmem:[%s3319_s30 + $0xc48] sm:$0xff]  ;;  %v908_v22 = vld [vmem:[%s3319_s30 + $0xc40] sm:$0xff] }
  0xe2   : > { %1532 = vmatpush1.msra.mxu1 %v920_v4  ;;  %1372 = vmatprep.subr.mxu0 %v789_v5  ;;  %v445_v19 = vld [vmem:[%s3312_s19 + $0x1c8] sm:$0xff]  ;;  %v444_v23 = vld [vmem:[%s3312_s19 + $0x1c0] sm:$0xff]  ;;  %v479_v4 = vld [vmem:[%s3312_s19 + $0x2d8] sm:$0xff] }
  0xe3   : > { %1533 = vmatprep.subr.mxu1 %v917_v6  ;;  %1128 = vmatprep.mubr.f32.mxu0 %v437_v7  ;;  %v777_v25 = vld [vmem:[%s3319_s30 + $0x828] sm:$0xff]  ;;  %v776_v27 = vld [vmem:[%s3319_s30 + $0x820] sm:$0xff] }
  0xe4   : > { %1289 = vmatprep.mubr.f32.mxu1 %v439_v8  ;;  %1373 = vmatpush1.msra.mxu0 %v788_v9  ;;  %v905_v26 = vld [vmem:[%s3319_s30 + $0xc28] sm:$0xff]  ;;  %v904_v28 = vld [vmem:[%s3319_s30 + $0xc20] sm:$0xff]  ;;  %v478_v8 = vld [vmem:[%s3312_s19 + $0x2d0] sm:$0xff] }
  0xe5   : > { %1534 = vmatpush1.msra.mxu1 %v916_v10  ;;  %1129 = vmatmul.mubr.f32.gmra.mxu0 %v436_v11  ;;  %v773_v29 = vld [vmem:[%s3319_s30 + $0x808] sm:$0xff]  ;;  %v772_v33 = vld [vmem:[%s3319_s30 + $0x800] sm:$0xff] }
  0xe6   : > { %1290 = vmatmul.mubr.f32.gmra.mxu1 %v438_v12  ;;  %1374 = vmatprep.subr.mxu0 %v785_v13  ;;  %v901_v30 = vld [vmem:[%s3319_s30 + $0xc08] sm:$0xff]  ;;  %v900_v34 = vld [vmem:[%s3319_s30 + $0xc00] sm:$0xff] }
  0xe7   : > { %1535 = vmatprep.subr.mxu1 %v913_v14  ;;  %1375 = vmatpush1.msra.mxu0 %v784_v15  ;;  %v453_v31 = vld [vmem:[%s3312_s19 + $0x208] sm:$0xff]  ;;  %v452_v35 = vld [vmem:[%s3312_s19 + $0x200] sm:$0xff] }
  0xe8   : > { %1536 = vmatpush1.msra.mxu1 %v912_v16  ;;  %1376 = vmatprep.subr.mxu0 %v781_v17  ;;  %v897_v37 = vld [vmem:[%s3319_s30 + $0xbe8] sm:$0xff]  ;;  %v896_v39 = vld [vmem:[%s3319_s30 + $0xbe0] sm:$0xff]  ;;  %v487_v16 = vld [vmem:[%s3312_s19 + $0x318] sm:$0xff] }
  0xe9   : > { %1537 = vmatprep.subr.mxu1 %v909_v18  ;;  %1134 = vmatprep.mubr.f32.mxu0 %v445_v19  ;;  %v1025_v38 = vld [vmem:[%s3319_s30 + $0xfe8] sm:$0xff]  ;;  %v1024_v40 = vld [vmem:[%s3319_s30 + $0xfe0] sm:$0xff] }
  0xea   : > { %1295 = vmatprep.mubr.f32.mxu1 %v447_v20  ;;  %1377 = vmatpush1.msra.mxu0 %v780_v21  ;;  %v893_v41 = vld [vmem:[%s3319_s30 + $0xbc8] sm:$0xff]  ;;  %v892_v45 = vld [vmem:[%s3319_s30 + $0xbc0] sm:$0xff]  ;;  %v486_v20 = vld [vmem:[%s3312_s19 + $0x310] sm:$0xff] }
  0xeb   : > { %1538 = vmatpush1.msra.mxu1 %v908_v22  ;;  %1135 = vmatmul.mubr.f32.gmra.mxu0 %v444_v23  ;;  %v1021_v42 = vld [vmem:[%s3319_s30 + $0xfc8] sm:$0xff]  ;;  %v1020_v46 = vld [vmem:[%s3319_s30 + $0xfc0] sm:$0xff] }
  0xec   : > { %1296 = vmatmul.mubr.f32.gmra.mxu1 %v446_v24  ;;  %1378 = vmatprep.subr.mxu0 %v777_v25  ;;  %v461_v43 = vld [vmem:[%s3312_s19 + $0x248] sm:$0xff]  ;;  %v460_v47 = vld [vmem:[%s3312_s19 + $0x240] sm:$0xff] }
  0xed   : > { %1539 = vmatprep.subr.mxu1 %v905_v26  ;;  %1379 = vmatpush1.msra.mxu0 %v776_v27  ;;  %v889_v49 = vld [vmem:[%s3319_s30 + $0xba8] sm:$0xff]  ;;  %v888_v51 = vld [vmem:[%s3319_s30 + $0xba0] sm:$0xff] }
  0xee   : > { %1540 = vmatpush1.msra.mxu1 %v904_v28  ;;  %1380 = vmatprep.subr.mxu0 %v773_v29  ;;  %v1017_v50 = vld [vmem:[%s3319_s30 + $0xfa8] sm:$0xff]  ;;  %v1016_v52 = vld [vmem:[%s3319_s30 + $0xfa0] sm:$0xff]  ;;  %v495_v28 = vld [vmem:[%s3312_s19 + $0x358] sm:$0xff] }
  0xef   : > { %1541 = vmatprep.subr.mxu1 %v901_v30  ;;  %1140 = vmatprep.mubr.f32.mxu0 %v453_v31  ;;  %v885_v53 = vld [vmem:[%s3319_s30 + $0xb88] sm:$0xff]  ;;  %v884_v57 = vld [vmem:[%s3319_s30 + $0xb80] sm:$0xff] }
  0xf0   : > { %1301 = vmatprep.mubr.f32.mxu1 %v455_v32  ;;  %1381 = vmatpush1.msra.mxu0 %v772_v33  ;;  %v1013_v54 = vld [vmem:[%s3319_s30 + $0xf88] sm:$0xff]  ;;  %v1012_v58 = vld [vmem:[%s3319_s30 + $0xf80] sm:$0xff]  ;;  %v494_v32 = vld [vmem:[%s3312_s19 + $0x350] sm:$0xff] }
  0xf1   : > { %1542 = vmatpush1.msra.mxu1 %v900_v34  ;;  %1141 = vmatmul.mubr.f32.gmra.mxu0 %v452_v35  ;;  %v469_v55 = vld [vmem:[%s3312_s19 + $0x288] sm:$0xff]  ;;  %v468_v59 = vld [vmem:[%s3312_s19 + $0x280] sm:$0xff] }
  0xf2   : > { %1302 = vmatmul.mubr.f32.gmra.mxu1 %v454_v36  ;;  %1382 = vmatprep.subr.mxu0 %v897_v37  ;;  %v881_v61 = vld [vmem:[%s3319_s30 + $0xb68] sm:$0xff]  ;;  %v880_v63 = vld [vmem:[%s3319_s30 + $0xb60] sm:$0xff] }
  0xf3   : > { %1543 = vmatprep.subr.mxu1 %v1025_v38  ;;  %1383 = vmatpush2.msra.mxu0 %v896_v39  ;;  %v1009_v62 = vld [vmem:[%s3319_s30 + $0xf68] sm:$0xff]  ;;  %v1008_v0 = vld [vmem:[%s3319_s30 + $0xf60] sm:$0xff] }
  0xf4   : > { %1544 = vmatpush2.msra.mxu1 %v1024_v40  ;;  %1384 = vmatprep.subr.mxu0 %v893_v41  ;;  %v877_v1 = vld [vmem:[%s3319_s30 + $0xb48] sm:$0xff]  ;;  %v876_v5 = vld [vmem:[%s3319_s30 + $0xb40] sm:$0xff]  ;;  %v503_v40 = vld [vmem:[%s3312_s19 + $0x398] sm:$0xff] }
  0xf5   : > { %1545 = vmatprep.subr.mxu1 %v1021_v42  ;;  %1146 = vmatprep.mubr.f32.mxu0 %v461_v43  ;;  %v1005_v2 = vld [vmem:[%s3319_s30 + $0xf48] sm:$0xff]  ;;  %v1004_v6 = vld [vmem:[%s3319_s30 + $0xf40] sm:$0xff] }
  0xf6   : > { %1307 = vmatprep.mubr.f32.mxu1 %v463_v44  ;;  %1385 = vmatpush2.msra.mxu0 %v892_v45  ;;  %v477_v3 = vld [vmem:[%s3312_s19 + $0x2c8] sm:$0xff]  ;;  %v476_v7 = vld [vmem:[%s3312_s19 + $0x2c0] sm:$0xff]  ;;  %v502_v44 = vld [vmem:[%s3312_s19 + $0x390] sm:$0xff] }
  0xf7   : > { %1546 = vmatpush2.msra.mxu1 %v1020_v46  ;;  %1147 = vmatmul.mubr.f32.gmra.mxu0 %v460_v47  ;;  %v873_v9 = vld [vmem:[%s3319_s30 + $0xb28] sm:$0xff]  ;;  %v872_v11 = vld [vmem:[%s3319_s30 + $0xb20] sm:$0xff] }
  0xf8   : > { %1308 = vmatmul.mubr.f32.gmra.mxu1 %v462_v48  ;;  %1386 = vmatprep.subr.mxu0 %v889_v49  ;;  %v1001_v10 = vld [vmem:[%s3319_s30 + $0xf28] sm:$0xff]  ;;  %v1000_v12 = vld [vmem:[%s3319_s30 + $0xf20] sm:$0xff] }
  0xf9   : > { %1547 = vmatprep.subr.mxu1 %v1017_v50  ;;  %1387 = vmatpush2.msra.mxu0 %v888_v51  ;;  %v869_v13 = vld [vmem:[%s3319_s30 + $0xb08] sm:$0xff]  ;;  %v868_v17 = vld [vmem:[%s3319_s30 + $0xb00] sm:$0xff] }
  0xfa   : > { %1548 = vmatpush2.msra.mxu1 %v1016_v52  ;;  %1388 = vmatprep.subr.mxu0 %v885_v53  ;;  %v997_v14 = vld [vmem:[%s3319_s30 + $0xf08] sm:$0xff]  ;;  %v996_v18 = vld [vmem:[%s3319_s30 + $0xf00] sm:$0xff]  ;;  %v511_v52 = vld [vmem:[%s3312_s19 + $0x3d8] sm:$0xff] }
  0xfb   : > { %1549 = vmatprep.subr.mxu1 %v1013_v54  ;;  %1152 = vmatprep.mubr.f32.mxu0 %v469_v55  ;;  %v485_v15 = vld [vmem:[%s3312_s19 + $0x308] sm:$0xff]  ;;  %v484_v19 = vld [vmem:[%s3312_s19 + $0x300] sm:$0xff] }
  0xfc   : > { %1313 = vmatprep.mubr.f32.mxu1 %v471_v56  ;;  %1389 = vmatpush2.msra.mxu0 %v884_v57  ;;  %v865_v21 = vld [vmem:[%s3319_s30 + $0xae8] sm:$0xff]  ;;  %v864_v23 = vld [vmem:[%s3319_s30 + $0xae0] sm:$0xff]  ;;  %v510_v56 = vld [vmem:[%s3312_s19 + $0x3d0] sm:$0xff] }
  0xfd   : > { %1550 = vmatpush2.msra.mxu1 %v1012_v58  ;;  %1153 = vmatmul.mubr.f32.gmra.mxu0 %v468_v59  ;;  %v993_v22 = vld [vmem:[%s3319_s30 + $0xee8] sm:$0xff]  ;;  %v992_v24 = vld [vmem:[%s3319_s30 + $0xee0] sm:$0xff] }
  0xfe   : > { %1314 = vmatmul.mubr.f32.gmra.mxu1 %v470_v60  ;;  %1390 = vmatprep.subr.mxu0 %v881_v61  ;;  %v861_v25 = vld [vmem:[%s3319_s30 + $0xac8] sm:$0xff]  ;;  %v860_v29 = vld [vmem:[%s3319_s30 + $0xac0] sm:$0xff] }
  0xff   : > { %1551 = vmatprep.subr.mxu1 %v1009_v62  ;;  %1391 = vmatpush2.msra.mxu0 %v880_v63  ;;  %v989_v26 = vld [vmem:[%s3319_s30 + $0xec8] sm:$0xff]  ;;  %v988_v30 = vld [vmem:[%s3319_s30 + $0xec0] sm:$0xff] }
 0x100   : > { %1552 = vmatpush2.msra.mxu1 %v1008_v0  ;;  %1392 = vmatprep.subr.mxu0 %v877_v1  ;;  %v493_v27 = vld [vmem:[%s3312_s19 + $0x348] sm:$0xff]  ;;  %v492_v31 = vld [vmem:[%s3312_s19 + $0x340] sm:$0xff] }
 0x101   : > { %1553 = vmatprep.subr.mxu1 %v1005_v2  ;;  %1158 = vmatprep.mubr.f32.mxu0 %v477_v3  ;;  %v857_v33 = vld [vmem:[%s3319_s30 + $0xaa8] sm:$0xff]  ;;  %v856_v35 = vld [vmem:[%s3319_s30 + $0xaa0] sm:$0xff]  ;;  %v395_v2 = vld [vmem:[%s3312_s19 + $0x38] sm:$0xff] }
 0x102   : > { %1319 = vmatprep.mubr.f32.mxu1 %v479_v4  ;;  %1393 = vmatpush2.msra.mxu0 %v876_v5  ;;  %v985_v34 = vld [vmem:[%s3319_s30 + $0xea8] sm:$0xff]  ;;  %v984_v36 = vld [vmem:[%s3319_s30 + $0xea0] sm:$0xff]  ;;  %v394_v4 = vld [vmem:[%s3312_s19 + $0x30] sm:$0xff] }
 0x103   : > { %1554 = vmatpush2.msra.mxu1 %v1004_v6  ;;  %1159 = vmatmul.mubr.f32.gmra.mxu0 %v476_v7  ;;  %v853_v37 = vld [vmem:[%s3319_s30 + $0xa88] sm:$0xff]  ;;  %v852_v41 = vld [vmem:[%s3319_s30 + $0xa80] sm:$0xff]  ;;  %v579_v5 = vld [vmem:[%s3319_s30 + $0x1f8] sm:$0xff] }
 0x104   : > { %1320 = vmatmul.mubr.f32.gmra.mxu1 %v478_v8  ;;  %1394 = vmatprep.subr.mxu0 %v873_v9  ;;  %v981_v38 = vld [vmem:[%s3319_s30 + $0xe88] sm:$0xff]  ;;  %v980_v42 = vld [vmem:[%s3319_s30 + $0xe80] sm:$0xff]  ;;  %v707_v6 = vld [vmem:[%s3319_s30 + $0x5f8] sm:$0xff] }
 0x105   : > { %1555 = vmatprep.subr.mxu1 %v1001_v10  ;;  %1395 = vmatpush2.msra.mxu0 %v872_v11  ;;  %v501_v39 = vld [vmem:[%s3312_s19 + $0x388] sm:$0xff]  ;;  %v500_v43 = vld [vmem:[%s3312_s19 + $0x380] sm:$0xff]  ;;  %v578_v7 = vld [vmem:[%s3319_s30 + $0x1f0] sm:$0xff] }
 0x106   : > { %1556 = vmatpush2.msra.mxu1 %v1000_v12  ;;  %1396 = vmatprep.subr.mxu0 %v869_v13  ;;  %v849_v45 = vld [vmem:[%s3319_s30 + $0xa68] sm:$0xff]  ;;  %v848_v47 = vld [vmem:[%s3319_s30 + $0xa60] sm:$0xff]  ;;  %v706_v8 = vld [vmem:[%s3319_s30 + $0x5f0] sm:$0xff] }
 0x107   : > { %1557 = vmatprep.subr.mxu1 %v997_v14  ;;  %1164 = vmatprep.mubr.f32.mxu0 %v485_v15  ;;  %v977_v46 = vld [vmem:[%s3319_s30 + $0xe68] sm:$0xff]  ;;  %v976_v48 = vld [vmem:[%s3319_s30 + $0xe60] sm:$0xff]  ;;  %v575_v9 = vld [vmem:[%s3319_s30 + $0x1d8] sm:$0xff] }
 0x108   : > { %1325 = vmatprep.mubr.f32.mxu1 %v487_v16  ;;  %1397 = vmatpush2.msra.mxu0 %v868_v17  ;;  %v845_v49 = vld [vmem:[%s3319_s30 + $0xa48] sm:$0xff]  ;;  %v844_v53 = vld [vmem:[%s3319_s30 + $0xa40] sm:$0xff]  ;;  %v703_v10 = vld [vmem:[%s3319_s30 + $0x5d8] sm:$0xff] }
 0x109   : > { %1558 = vmatpush2.msra.mxu1 %v996_v18  ;;  %1165 = vmatmul.mubr.f32.gmra.mxu0 %v484_v19  ;;  %v973_v50 = vld [vmem:[%s3319_s30 + $0xe48] sm:$0xff]  ;;  %v972_v54 = vld [vmem:[%s3319_s30 + $0xe40] sm:$0xff]  ;;  %v403_v12 = vld [vmem:[%s3312_s19 + $0x78] sm:$0xff] }
 0x10a   : > { %1326 = vmatmul.mubr.f32.gmra.mxu1 %v486_v20  ;;  %1398 = vmatprep.subr.mxu0 %v865_v21  ;;  %v509_v51 = vld [vmem:[%s3312_s19 + $0x3c8] sm:$0xff]  ;;  %v508_v55 = vld [vmem:[%s3312_s19 + $0x3c0] sm:$0xff]  ;;  %v574_v13 = vld [vmem:[%s3319_s30 + $0x1d0] sm:$0xff] }
 0x10b   : > { %1559 = vmatprep.subr.mxu1 %v993_v22  ;;  %1399 = vmatpush2.msra.mxu0 %v864_v23  ;;  %v841_v57 = vld [vmem:[%s3319_s30 + $0xa28] sm:$0xff]  ;;  %v840_v59 = vld [vmem:[%s3319_s30 + $0xa20] sm:$0xff]  ;;  %v702_v14 = vld [vmem:[%s3319_s30 + $0x5d0] sm:$0xff] }
 0x10c   : > { %1560 = vmatpush2.msra.mxu1 %v992_v24  ;;  %1400 = vmatprep.subr.mxu0 %v861_v25  ;;  %v969_v58 = vld [vmem:[%s3319_s30 + $0xe28] sm:$0xff]  ;;  %v968_v60 = vld [vmem:[%s3319_s30 + $0xe20] sm:$0xff]  ;;  %v402_v16 = vld [vmem:[%s3312_s19 + $0x70] sm:$0xff] }
 0x10d   : > { %1561 = vmatprep.subr.mxu1 %v989_v26  ;;  %1170 = vmatprep.mubr.f32.mxu0 %v493_v27  ;;  %v837_v61 = vld [vmem:[%s3319_s30 + $0xa08] sm:$0xff]  ;;  %v836_v63 = vld [vmem:[%s3319_s30 + $0xa00] sm:$0xff]  ;;  %v571_v17 = vld [vmem:[%s3319_s30 + $0x1b8] sm:$0xff] }
 0x10e   : > { %1331 = vmatprep.mubr.f32.mxu1 %v495_v28  ;;  %1401 = vmatpush2.msra.mxu0 %v860_v29  ;;  %v965_v62 = vld [vmem:[%s3319_s30 + $0xe08] sm:$0xff]  ;;  %v964_v1 = vld [vmem:[%s3319_s30 + $0xe00] sm:$0xff]  ;;  %v699_v18 = vld [vmem:[%s3319_s30 + $0x5b8] sm:$0xff] }
 0x10f   : > { %1562 = vmatpush2.msra.mxu1 %v988_v30  ;;  %1171 = vmatmul.mubr.f32.gmra.mxu0 %v492_v31  ;;  %v393_v0 = vld [vmem:[%s3312_s19 + $0x28] sm:$0xff]  ;;  %v392_v3 = vld [vmem:[%s3312_s19 + $0x20] sm:$0xff]  ;;  %v570_v19 = vld [vmem:[%s3319_s30 + $0x1b0] sm:$0xff] }
 0x110   : > { %1332 = vmatmul.mubr.f32.gmra.mxu1 %v494_v32  ;;  %1402 = vmatprep.subr.mxu0 %v857_v33  ;;  %v401_v11 = vld [vmem:[%s3312_s19 + $0x68] sm:$0xff]  ;;  %v400_v15 = vld [vmem:[%s3312_s19 + $0x60] sm:$0xff]  ;;  %v698_v20 = vld [vmem:[%s3319_s30 + $0x5b0] sm:$0xff] }
 0x111   : > { %1563 = vmatprep.subr.mxu1 %v985_v34  ;;  %1403 = vmatpush2.msra.mxu0 %v856_v35  ;;  %v567_v21 = vld [vmem:[%s3319_s30 + $0x198] sm:$0xff]  ;;  %v409_v23 = vld [vmem:[%s3312_s19 + $0xa8] sm:$0xff]  ;;  %v566_v25 = vld [vmem:[%s3319_s30 + $0x190] sm:$0xff] }
 0x112   : > { %1564 = vmatpush2.msra.mxu1 %v984_v36  ;;  %1404 = vmatprep.subr.mxu0 %v853_v37  ;;  %v695_v22 = vld [vmem:[%s3319_s30 + $0x598] sm:$0xff]  ;;  %v694_v26 = vld [vmem:[%s3319_s30 + $0x590] sm:$0xff]  ;;  %v408_v27 = vld [vmem:[%s3312_s19 + $0xa0] sm:$0xff] }
 0x113   : > { %1565 = vmatprep.subr.mxu1 %v981_v38  ;;  %1176 = vmatprep.mubr.f32.mxu0 %v501_v39  ;;  %v411_v24 = vld [vmem:[%s3312_s19 + $0xb8] sm:$0xff]  ;;  %v410_v28 = vld [vmem:[%s3312_s19 + $0xb0] sm:$0xff]  ;;  %v417_v35 = vld [vmem:[%s3312_s19 + $0xe8] sm:$0xff] }
 0x114   : > { %1337 = vmatprep.mubr.f32.mxu1 %v503_v40  ;;  %1405 = vmatpush2.msra.mxu0 %v852_v41  ;;  %v563_v29 = vld [vmem:[%s3319_s30 + $0x178] sm:$0xff]  ;;  %v562_v31 = vld [vmem:[%s3319_s30 + $0x170] sm:$0xff]  ;;  %v416_v39 = vld [vmem:[%s3312_s19 + $0xe0] sm:$0xff] }
 0x115   : > { %1566 = vmatpush2.msra.mxu1 %v980_v42  ;;  %1177 = vmatmul.mubr.f32.gmra.mxu0 %v500_v43  ;;  %v691_v30 = vld [vmem:[%s3319_s30 + $0x578] sm:$0xff]  ;;  %v690_v32 = vld [vmem:[%s3319_s30 + $0x570] sm:$0xff] }
 0x116   : > { %1338 = vmatmul.mubr.f32.gmra.mxu1 %v502_v44  ;;  %1406 = vmatprep.subr.mxu0 %v849_v45  ;;  %v559_v33 = vld [vmem:[%s3319_s30 + $0x158] sm:$0xff]  ;;  %v558_v37 = vld [vmem:[%s3319_s30 + $0x150] sm:$0xff] }
 0x117   : > { %1567 = vmatprep.subr.mxu1 %v977_v46  ;;  %1407 = vmatpush2.msra.mxu0 %v848_v47  ;;  %v687_v34 = vld [vmem:[%s3319_s30 + $0x558] sm:$0xff]  ;;  %v686_v38 = vld [vmem:[%s3319_s30 + $0x550] sm:$0xff]  ;;  %v425_v47 = vld [vmem:[%s3312_s19 + $0x128] sm:$0xff] }
 0x118   : > { %1568 = vmatpush2.msra.mxu1 %v976_v48  ;;  %1408 = vmatprep.subr.mxu0 %v845_v49  ;;  %v419_v36 = vld [vmem:[%s3312_s19 + $0xf8] sm:$0xff]  ;;  %v418_v40 = vld [vmem:[%s3312_s19 + $0xf0] sm:$0xff] }
 0x119   : > { %1569 = vmatprep.subr.mxu1 %v973_v50  ;;  %1182 = vmatprep.mubr.f32.mxu0 %v509_v51  ;;  %v555_v41 = vld [vmem:[%s3319_s30 + $0x138] sm:$0xff]  ;;  %v554_v43 = vld [vmem:[%s3319_s30 + $0x130] sm:$0xff]  ;;  %v424_v51 = vld [vmem:[%s3312_s19 + $0x120] sm:$0xff] }
 0x11a   : > { %1343 = vmatprep.mubr.f32.mxu1 %v511_v52  ;;  %1409 = vmatpush2.msra.mxu0 %v844_v53  ;;  %v683_v42 = vld [vmem:[%s3319_s30 + $0x538] sm:$0xff]  ;;  %v682_v44 = vld [vmem:[%s3319_s30 + $0x530] sm:$0xff] }
 0x11b   : > { %1570 = vmatpush2.msra.mxu1 %v972_v54  ;;  %1183 = vmatmul.mubr.f32.gmra.mxu0 %v508_v55  ;;  %v551_v45 = vld [vmem:[%s3319_s30 + $0x118] sm:$0xff]  ;;  %v550_v49 = vld [vmem:[%s3319_s30 + $0x110] sm:$0xff] }
 0x11c   : > { %1344 = vmatmul.mubr.f32.gmra.mxu1 %v510_v56  ;;  %1410 = vmatprep.subr.mxu0 %v841_v57  ;;  %v679_v46 = vld [vmem:[%s3319_s30 + $0x518] sm:$0xff]  ;;  %v678_v50 = vld [vmem:[%s3319_s30 + $0x510] sm:$0xff] }
 0x11d   : > { %1571 = vmatprep.subr.mxu1 %v969_v58  ;;  %1411 = vmatpush2.msra.mxu0 %v840_v59  ;;  %v427_v48 = vld [vmem:[%s3312_s19 + $0x138] sm:$0xff]  ;;  %v426_v52 = vld [vmem:[%s3312_s19 + $0x130] sm:$0xff]  ;;  %v433_v59 = vld [vmem:[%s3312_s19 + $0x168] sm:$0xff] }
 0x11e   : > { %1572 = vmatpush2.msra.mxu1 %v968_v60  ;;  %1412 = vmatprep.subr.mxu0 %v837_v61  ;;  %v547_v53 = vld [vmem:[%s3319_s30 + $0xf8] sm:$0xff]  ;;  %v546_v55 = vld [vmem:[%s3319_s30 + $0xf0] sm:$0xff] }
 0x11f   : > { %1573 = vmatprep.subr.mxu1 %v965_v62  ;;  %1413 = vmatpush2.msra.mxu0 %v836_v63  ;;  %v675_v54 = vld [vmem:[%s3319_s30 + $0x4f8] sm:$0xff]  ;;  %v674_v56 = vld [vmem:[%s3319_s30 + $0x4f0] sm:$0xff]  ;;  %v432_v63 = vld [vmem:[%s3312_s19 + $0x160] sm:$0xff] }
 0x120   : > { %1414 = vmatprep.mubr.f32.mxu0 %v393_v0  ;;  %1574 = vmatpush2.msra.mxu1 %v964_v1  ;;  %v543_v57 = vld [vmem:[%s3319_s30 + $0xd8] sm:$0xff]  ;;  %v542_v61 = vld [vmem:[%s3319_s30 + $0xd0] sm:$0xff] }
 0x121   : > { %1575 = vmatprep.mubr.f32.mxu1 %v395_v2  ;;  %1415 = vmatmul.mubr.f32.vlgmr.msra.gmra.mxu0 %v392_v3  ;;  %v671_v58 = vld [vmem:[%s3319_s30 + $0x4d8] sm:$0xff]  ;;  %v670_v62 = vld [vmem:[%s3319_s30 + $0x4d0] sm:$0xff] }
 0x122   : > { %1576 = vmatmul.mubr.f32.vlgmr.msra.gmra.mxu1 %v394_v4  ;;  %1672 = vmatprep.subr.mxu0 %v579_v5  ;;  %v435_v60 = vld [vmem:[%s3312_s19 + $0x178] sm:$0xff]  ;;  %v434_v0 = vld [vmem:[%s3312_s19 + $0x170] sm:$0xff] }
 0x123   : > { %1833 = vmatprep.subr.mxu1 %v707_v6  ;;  %1673 = vmatpush1.msra.mxu0 %v578_v7  ;;  %v539_v1 = vld [vmem:[%s3319_s30 + $0xb8] sm:$0xff]  ;;  %v538_v3 = vld [vmem:[%s3319_s30 + $0xb0] sm:$0xff]  ;;  %v441_v7 = vld [vmem:[%s3312_s19 + $0x1a8] sm:$0xff] }
 0x124   : > { %1834 = vmatpush1.msra.mxu1 %v706_v8  ;;  %1674 = vmatprep.subr.mxu0 %v575_v9  ;;  %v667_v2 = vld [vmem:[%s3319_s30 + $0x4b8] sm:$0xff]  ;;  %v666_v4 = vld [vmem:[%s3319_s30 + $0x4b0] sm:$0xff] }
 0x125   : > { %1835 = vmatprep.subr.mxu1 %v703_v10  ;;  %1420 = vmatprep.mubr.f32.mxu0 %v401_v11  ;;  %v535_v5 = vld [vmem:[%s3319_s30 + $0x98] sm:$0xff]  ;;  %v534_v9 = vld [vmem:[%s3319_s30 + $0x90] sm:$0xff]  ;;  %v440_v11 = vld [vmem:[%s3312_s19 + $0x1a0] sm:$0xff] }
 0x126   : > { %1581 = vmatprep.mubr.f32.mxu1 %v403_v12  ;;  %1675 = vmatpush1.msra.mxu0 %v574_v13  ;;  %v663_v6 = vld [vmem:[%s3319_s30 + $0x498] sm:$0xff]  ;;  %v662_v10 = vld [vmem:[%s3319_s30 + $0x490] sm:$0xff] }
 0x127   : > { %1836 = vmatpush1.msra.mxu1 %v702_v14  ;;  %1421 = vmatmul.mubr.f32.gmra.mxu0 %v400_v15  ;;  %v443_v8 = vld [vmem:[%s3312_s19 + $0x1b8] sm:$0xff]  ;;  %v442_v12 = vld [vmem:[%s3312_s19 + $0x1b0] sm:$0xff] }
 0x128   : > { %1582 = vmatmul.mubr.f32.gmra.mxu1 %v402_v16  ;;  %1676 = vmatprep.subr.mxu0 %v571_v17  ;;  %v531_v13 = vld [vmem:[%s3319_s30 + $0x78] sm:$0xff]  ;;  %v530_v15 = vld [vmem:[%s3319_s30 + $0x70] sm:$0xff] }
 0x129   : > { %1837 = vmatprep.subr.mxu1 %v699_v18  ;;  %1677 = vmatpush1.msra.mxu0 %v570_v19  ;;  %v659_v14 = vld [vmem:[%s3319_s30 + $0x478] sm:$0xff]  ;;  %v658_v16 = vld [vmem:[%s3319_s30 + $0x470] sm:$0xff]  ;;  %v449_v19 = vld [vmem:[%s3312_s19 + $0x1e8] sm:$0xff] }
 0x12a   : > { %1838 = vmatpush1.msra.mxu1 %v698_v20  ;;  %1678 = vmatprep.subr.mxu0 %v567_v21  ;;  %v527_v17 = vld [vmem:[%s3319_s30 + $0x58] sm:$0xff]  ;;  %v526_v21 = vld [vmem:[%s3319_s30 + $0x50] sm:$0xff] }
 0x12b   : > { %1839 = vmatprep.subr.mxu1 %v695_v22  ;;  %1426 = vmatprep.mubr.f32.mxu0 %v409_v23  ;;  %v655_v18 = vld [vmem:[%s3319_s30 + $0x458] sm:$0xff]  ;;  %v654_v22 = vld [vmem:[%s3319_s30 + $0x450] sm:$0xff]  ;;  %v448_v23 = vld [vmem:[%s3312_s19 + $0x1e0] sm:$0xff] }
 0x12c   : > { %1587 = vmatprep.mubr.f32.mxu1 %v411_v24  ;;  %1679 = vmatpush1.msra.mxu0 %v566_v25  ;;  %v451_v20 = vld [vmem:[%s3312_s19 + $0x1f8] sm:$0xff]  ;;  %v450_v24 = vld [vmem:[%s3312_s19 + $0x1f0] sm:$0xff] }
 0x12d   : > { %1840 = vmatpush1.msra.mxu1 %v694_v26  ;;  %1427 = vmatmul.mubr.f32.gmra.mxu0 %v408_v27  ;;  %v523_v25 = vld [vmem:[%s3319_s30 + $0x38] sm:$0xff]  ;;  %v522_v27 = vld [vmem:[%s3319_s30 + $0x30] sm:$0xff] }
 0x12e   : > { %1588 = vmatmul.mubr.f32.gmra.mxu1 %v410_v28  ;;  %1680 = vmatprep.subr.mxu0 %v563_v29  ;;  %v651_v26 = vld [vmem:[%s3319_s30 + $0x438] sm:$0xff]  ;;  %v650_v28 = vld [vmem:[%s3319_s30 + $0x430] sm:$0xff] }
 0x12f   : > { %1841 = vmatprep.subr.mxu1 %v691_v30  ;;  %1681 = vmatpush1.msra.mxu0 %v562_v31  ;;  %v519_v29 = vld [vmem:[%s3319_s30 + $0x18] sm:$0xff]  ;;  %v457_v31 = vld [vmem:[%s3312_s19 + $0x228] sm:$0xff] }
 0x130   : > { %1842 = vmatpush1.msra.mxu1 %v690_v32  ;;  %1682 = vmatprep.subr.mxu0 %v559_v33  ;;  %v647_v30 = vld [vmem:[%s3319_s30 + $0x418] sm:$0xff]  ;;  %v518_v33 = vld [vmem:[%s3319_s30 + $0x10] sm:$0xff] }
 0x131   : > { %1843 = vmatprep.subr.mxu1 %v687_v34  ;;  %1432 = vmatprep.mubr.f32.mxu0 %v417_v35  ;;  %v459_v32 = vld [vmem:[%s3312_s19 + $0x238] sm:$0xff]  ;;  %v646_v34 = vld [vmem:[%s3319_s30 + $0x410] sm:$0xff]  ;;  %v456_v35 = vld [vmem:[%s3312_s19 + $0x220] sm:$0xff] }
 0x132   : > { %1593 = vmatprep.mubr.f32.mxu1 %v419_v36  ;;  %1683 = vmatpush1.msra.mxu0 %v558_v37  ;;  %v458_v36 = vld [vmem:[%s3312_s19 + $0x230] sm:$0xff]  ;;  %v643_v37 = vld [vmem:[%s3319_s30 + $0x3f8] sm:$0xff] }
 0x133   : > { %1844 = vmatpush1.msra.mxu1 %v686_v38  ;;  %1433 = vmatmul.mubr.f32.gmra.mxu0 %v416_v39  ;;  %v771_v38 = vld [vmem:[%s3319_s30 + $0x7f8] sm:$0xff]  ;;  %v642_v39 = vld [vmem:[%s3319_s30 + $0x3f0] sm:$0xff] }
 0x134   : > { %1594 = vmatmul.mubr.f32.gmra.mxu1 %v418_v40  ;;  %1684 = vmatprep.subr.mxu0 %v555_v41  ;;  %v770_v40 = vld [vmem:[%s3319_s30 + $0x7f0] sm:$0xff]  ;;  %v639_v41 = vld [vmem:[%s3319_s30 + $0x3d8] sm:$0xff] }
 0x135   : > { %1845 = vmatprep.subr.mxu1 %v683_v42  ;;  %1685 = vmatpush1.msra.mxu0 %v554_v43  ;;  %v767_v42 = vld [vmem:[%s3319_s30 + $0x7d8] sm:$0xff]  ;;  %v465_v43 = vld [vmem:[%s3312_s19 + $0x268] sm:$0xff] }
 0x136   : > { %1846 = vmatpush1.msra.mxu1 %v682_v44  ;;  %1686 = vmatprep.subr.mxu0 %v551_v45  ;;  %v467_v44 = vld [vmem:[%s3312_s19 + $0x278] sm:$0xff]  ;;  %v638_v45 = vld [vmem:[%s3319_s30 + $0x3d0] sm:$0xff] }
 0x137   : > { %1847 = vmatprep.subr.mxu1 %v679_v46  ;;  %1438 = vmatprep.mubr.f32.mxu0 %v425_v47  ;;  %v766_v46 = vld [vmem:[%s3319_s30 + $0x7d0] sm:$0xff]  ;;  %v464_v47 = vld [vmem:[%s3312_s19 + $0x260] sm:$0xff] }
 0x138   : > { %1599 = vmatprep.mubr.f32.mxu1 %v427_v48  ;;  %1687 = vmatpush1.msra.mxu0 %v550_v49  ;;  %v466_v48 = vld [vmem:[%s3312_s19 + $0x270] sm:$0xff]  ;;  %v635_v49 = vld [vmem:[%s3319_s30 + $0x3b8] sm:$0xff] }
 0x139   : > { %1848 = vmatpush1.msra.mxu1 %v678_v50  ;;  %1439 = vmatmul.mubr.f32.gmra.mxu0 %v424_v51  ;;  %v763_v50 = vld [vmem:[%s3319_s30 + $0x7b8] sm:$0xff]  ;;  %v634_v51 = vld [vmem:[%s3319_s30 + $0x3b0] sm:$0xff] }
 0x13a   : > { %1600 = vmatmul.mubr.f32.gmra.mxu1 %v426_v52  ;;  %1688 = vmatprep.subr.mxu0 %v547_v53  ;;  %v762_v52 = vld [vmem:[%s3319_s30 + $0x7b0] sm:$0xff]  ;;  %v631_v53 = vld [vmem:[%s3319_s30 + $0x398] sm:$0xff] }
 0x13b   : > { %1849 = vmatprep.subr.mxu1 %v675_v54  ;;  %1689 = vmatpush1.msra.mxu0 %v546_v55  ;;  %v759_v54 = vld [vmem:[%s3319_s30 + $0x798] sm:$0xff]  ;;  %v473_v55 = vld [vmem:[%s3312_s19 + $0x2a8] sm:$0xff] }
 0x13c   : > { %1850 = vmatpush1.msra.mxu1 %v674_v56  ;;  %1690 = vmatprep.subr.mxu0 %v543_v57  ;;  %v475_v56 = vld [vmem:[%s3312_s19 + $0x2b8] sm:$0xff]  ;;  %v630_v57 = vld [vmem:[%s3319_s30 + $0x390] sm:$0xff] }
 0x13d   : > { %1851 = vmatprep.subr.mxu1 %v671_v58  ;;  %1444 = vmatprep.mubr.f32.mxu0 %v433_v59  ;;  %v758_v58 = vld [vmem:[%s3319_s30 + $0x790] sm:$0xff]  ;;  %v472_v59 = vld [vmem:[%s3312_s19 + $0x2a0] sm:$0xff] }
 0x13e   : > { %1605 = vmatprep.mubr.f32.mxu1 %v435_v60  ;;  %1691 = vmatpush1.msra.mxu0 %v542_v61  ;;  %v474_v60 = vld [vmem:[%s3312_s19 + $0x2b0] sm:$0xff]  ;;  %v627_v61 = vld [vmem:[%s3319_s30 + $0x378] sm:$0xff] }
 0x13f   : > { %1852 = vmatpush1.msra.mxu1 %v670_v62  ;;  %1445 = vmatmul.mubr.f32.gmra.mxu0 %v432_v63  ;;  %v755_v62 = vld [vmem:[%s3319_s30 + $0x778] sm:$0xff]  ;;  %v626_v63 = vld [vmem:[%s3319_s30 + $0x370] sm:$0xff] }
 0x140   : > { %1606 = vmatmul.mubr.f32.gmra.mxu1 %v434_v0  ;;  %1692 = vmatprep.subr.mxu0 %v539_v1  ;;  %v754_v0 = vld [vmem:[%s3319_s30 + $0x770] sm:$0xff]  ;;  %v623_v1 = vld [vmem:[%s3319_s30 + $0x358] sm:$0xff] }
 0x141   : > { %1853 = vmatprep.subr.mxu1 %v667_v2  ;;  %1693 = vmatpush1.msra.mxu0 %v538_v3  ;;  %v751_v2 = vld [vmem:[%s3319_s30 + $0x758] sm:$0xff]  ;;  %v481_v3 = vld [vmem:[%s3312_s19 + $0x2e8] sm:$0xff] }
 0x142   : > { %1854 = vmatpush1.msra.mxu1 %v666_v4  ;;  %1694 = vmatprep.subr.mxu0 %v535_v5  ;;  %v483_v4 = vld [vmem:[%s3312_s19 + $0x2f8] sm:$0xff]  ;;  %v622_v5 = vld [vmem:[%s3319_s30 + $0x350] sm:$0xff] }
 0x143   : > { %1855 = vmatprep.subr.mxu1 %v663_v6  ;;  %1450 = vmatprep.mubr.f32.mxu0 %v441_v7  ;;  %v750_v6 = vld [vmem:[%s3319_s30 + $0x750] sm:$0xff]  ;;  %v480_v7 = vld [vmem:[%s3312_s19 + $0x2e0] sm:$0xff] }
 0x144   : > { %1611 = vmatprep.mubr.f32.mxu1 %v443_v8  ;;  %1695 = vmatpush1.msra.mxu0 %v534_v9  ;;  %v482_v8 = vld [vmem:[%s3312_s19 + $0x2f0] sm:$0xff]  ;;  %v619_v9 = vld [vmem:[%s3319_s30 + $0x338] sm:$0xff] }
 0x145   : > { %1856 = vmatpush1.msra.mxu1 %v662_v10  ;;  %1451 = vmatmul.mubr.f32.gmra.mxu0 %v440_v11  ;;  %v747_v10 = vld [vmem:[%s3319_s30 + $0x738] sm:$0xff]  ;;  %v618_v11 = vld [vmem:[%s3319_s30 + $0x330] sm:$0xff] }
 0x146   : > { %1612 = vmatmul.mubr.f32.gmra.mxu1 %v442_v12  ;;  %1696 = vmatprep.subr.mxu0 %v531_v13  ;;  %v746_v12 = vld [vmem:[%s3319_s30 + $0x730] sm:$0xff]  ;;  %v615_v13 = vld [vmem:[%s3319_s30 + $0x318] sm:$0xff] }
 0x147   : > { %1857 = vmatprep.subr.mxu1 %v659_v14  ;;  %1697 = vmatpush1.msra.mxu0 %v530_v15  ;;  %v743_v14 = vld [vmem:[%s3319_s30 + $0x718] sm:$0xff]  ;;  %v489_v15 = vld [vmem:[%s3312_s19 + $0x328] sm:$0xff] }
 0x148   : > { %1858 = vmatpush1.msra.mxu1 %v658_v16  ;;  %1698 = vmatprep.subr.mxu0 %v527_v17  ;;  %v491_v16 = vld [vmem:[%s3312_s19 + $0x338] sm:$0xff]  ;;  %v614_v17 = vld [vmem:[%s3319_s30 + $0x310] sm:$0xff] }
 0x149   : > { %1859 = vmatprep.subr.mxu1 %v655_v18  ;;  %1456 = vmatprep.mubr.f32.mxu0 %v449_v19  ;;  %v742_v18 = vld [vmem:[%s3319_s30 + $0x710] sm:$0xff]  ;;  %v488_v19 = vld [vmem:[%s3312_s19 + $0x320] sm:$0xff] }
 0x14a   : > { %1617 = vmatprep.mubr.f32.mxu1 %v451_v20  ;;  %1699 = vmatpush1.msra.mxu0 %v526_v21  ;;  %v490_v20 = vld [vmem:[%s3312_s19 + $0x330] sm:$0xff]  ;;  %v611_v21 = vld [vmem:[%s3319_s30 + $0x2f8] sm:$0xff] }
 0x14b   : > { %1860 = vmatpush1.msra.mxu1 %v654_v22  ;;  %1457 = vmatmul.mubr.f32.gmra.mxu0 %v448_v23  ;;  %v739_v22 = vld [vmem:[%s3319_s30 + $0x6f8] sm:$0xff]  ;;  %v610_v23 = vld [vmem:[%s3319_s30 + $0x2f0] sm:$0xff] }
 0x14c   : > { %1618 = vmatmul.mubr.f32.gmra.mxu1 %v450_v24  ;;  %1700 = vmatprep.subr.mxu0 %v523_v25  ;;  %v738_v24 = vld [vmem:[%s3319_s30 + $0x6f0] sm:$0xff]  ;;  %v607_v25 = vld [vmem:[%s3319_s30 + $0x2d8] sm:$0xff] }
 0x14d   : > { %1861 = vmatprep.subr.mxu1 %v651_v26  ;;  %1701 = vmatpush1.msra.mxu0 %v522_v27  ;;  %v735_v26 = vld [vmem:[%s3319_s30 + $0x6d8] sm:$0xff]  ;;  %v497_v27 = vld [vmem:[%s3312_s19 + $0x368] sm:$0xff] }
 0x14e   : > { %1862 = vmatpush1.msra.mxu1 %v650_v28  ;;  %1702 = vmatprep.subr.mxu0 %v519_v29  ;;  %v499_v28 = vld [vmem:[%s3312_s19 + $0x378] sm:$0xff]  ;;  %v606_v29 = vld [vmem:[%s3319_s30 + $0x2d0] sm:$0xff] }
 0x14f   : > { %1863 = vmatprep.subr.mxu1 %v647_v30  ;;  %1462 = vmatprep.mubr.f32.mxu0 %v457_v31  ;;  %v734_v30 = vld [vmem:[%s3319_s30 + $0x6d0] sm:$0xff]  ;;  %v496_v31 = vld [vmem:[%s3312_s19 + $0x360] sm:$0xff] }
 0x150   : > { %1623 = vmatprep.mubr.f32.mxu1 %v459_v32  ;;  %1703 = vmatpush1.msra.mxu0 %v518_v33  ;;  %v498_v32 = vld [vmem:[%s3312_s19 + $0x370] sm:$0xff]  ;;  %v603_v33 = vld [vmem:[%s3319_s30 + $0x2b8] sm:$0xff] }
 0x151   : > { %1864 = vmatpush1.msra.mxu1 %v646_v34  ;;  %1463 = vmatmul.mubr.f32.gmra.mxu0 %v456_v35  ;;  %v731_v34 = vld [vmem:[%s3319_s30 + $0x6b8] sm:$0xff]  ;;  %v602_v35 = vld [vmem:[%s3319_s30 + $0x2b0] sm:$0xff] }
 0x152   : > { %1624 = vmatmul.mubr.f32.gmra.mxu1 %v458_v36  ;;  %1704 = vmatprep.subr.mxu0 %v643_v37  ;;  %v730_v36 = vld [vmem:[%s3319_s30 + $0x6b0] sm:$0xff]  ;;  %v599_v37 = vld [vmem:[%s3319_s30 + $0x298] sm:$0xff] }
 0x153   : > { %1865 = vmatprep.subr.mxu1 %v771_v38  ;;  %1705 = vmatpush2.msra.mxu0 %v642_v39  ;;  %v727_v38 = vld [vmem:[%s3319_s30 + $0x698] sm:$0xff]  ;;  %v505_v39 = vld [vmem:[%s3312_s19 + $0x3a8] sm:$0xff] }
 0x154   : > { %1866 = vmatpush2.msra.mxu1 %v770_v40  ;;  %1706 = vmatprep.subr.mxu0 %v639_v41  ;;  %v507_v40 = vld [vmem:[%s3312_s19 + $0x3b8] sm:$0xff]  ;;  %v598_v41 = vld [vmem:[%s3319_s30 + $0x290] sm:$0xff] }
 0x155   : > { %1867 = vmatprep.subr.mxu1 %v767_v42  ;;  %1468 = vmatprep.mubr.f32.mxu0 %v465_v43  ;;  %v726_v42 = vld [vmem:[%s3319_s30 + $0x690] sm:$0xff]  ;;  %v504_v43 = vld [vmem:[%s3312_s19 + $0x3a0] sm:$0xff] }
 0x156   : > { %1629 = vmatprep.mubr.f32.mxu1 %v467_v44  ;;  %1707 = vmatpush2.msra.mxu0 %v638_v45  ;;  %v506_v44 = vld [vmem:[%s3312_s19 + $0x3b0] sm:$0xff]  ;;  %v595_v45 = vld [vmem:[%s3319_s30 + $0x278] sm:$0xff] }
 0x157   : > { %1868 = vmatpush2.msra.mxu1 %v766_v46  ;;  %1469 = vmatmul.mubr.f32.gmra.mxu0 %v464_v47  ;;  %v723_v46 = vld [vmem:[%s3319_s30 + $0x678] sm:$0xff]  ;;  %v594_v47 = vld [vmem:[%s3319_s30 + $0x270] sm:$0xff] }
 0x158   : > { %1630 = vmatmul.mubr.f32.gmra.mxu1 %v466_v48  ;;  %1708 = vmatprep.subr.mxu0 %v635_v49  ;;  %v722_v48 = vld [vmem:[%s3319_s30 + $0x670] sm:$0xff]  ;;  %v591_v49 = vld [vmem:[%s3319_s30 + $0x258] sm:$0xff] }
 0x159   : > { %1869 = vmatprep.subr.mxu1 %v763_v50  ;;  %1709 = vmatpush2.msra.mxu0 %v634_v51  ;;  %v719_v50 = vld [vmem:[%s3319_s30 + $0x658] sm:$0xff]  ;;  %v513_v51 = vld [vmem:[%s3312_s19 + $0x3e8] sm:$0xff] }
 0x15a   : > { %1870 = vmatpush2.msra.mxu1 %v762_v52  ;;  %1710 = vmatprep.subr.mxu0 %v631_v53  ;;  %v515_v52 = vld [vmem:[%s3312_s19 + $0x3f8] sm:$0xff]  ;;  %v590_v53 = vld [vmem:[%s3319_s30 + $0x250] sm:$0xff] }
 0x15b   : > { %1871 = vmatprep.subr.mxu1 %v759_v54  ;;  %1474 = vmatprep.mubr.f32.mxu0 %v473_v55  ;;  %v718_v54 = vld [vmem:[%s3319_s30 + $0x650] sm:$0xff]  ;;  %v512_v55 = vld [vmem:[%s3312_s19 + $0x3e0] sm:$0xff] }
 0x15c   : > { %1635 = vmatprep.mubr.f32.mxu1 %v475_v56  ;;  %1711 = vmatpush2.msra.mxu0 %v630_v57  ;;  %v514_v56 = vld [vmem:[%s3312_s19 + $0x3f0] sm:$0xff]  ;;  %v587_v57 = vld [vmem:[%s3319_s30 + $0x238] sm:$0xff] }
 0x15d   : > { %1872 = vmatpush2.msra.mxu1 %v758_v58  ;;  %1475 = vmatmul.mubr.f32.gmra.mxu0 %v472_v59  ;;  %v715_v58 = vld [vmem:[%s3319_s30 + $0x638] sm:$0xff]  ;;  %v586_v59 = vld [vmem:[%s3319_s30 + $0x230] sm:$0xff] }
 0x15e   : > { %1636 = vmatmul.mubr.f32.gmra.mxu1 %v474_v60  ;;  %1712 = vmatprep.subr.mxu0 %v627_v61  ;;  %v714_v60 = vld [vmem:[%s3319_s30 + $0x630] sm:$0xff]  ;;  %v583_v61 = vld [vmem:[%s3319_s30 + $0x218] sm:$0xff] }
 0x15f   : > { %1873 = vmatprep.subr.mxu1 %v755_v62  ;;  %1713 = vmatpush2.msra.mxu0 %v626_v63  ;;  %v711_v62 = vld [vmem:[%s3319_s30 + $0x618] sm:$0xff]  ;;  %v582_v63 = vld [vmem:[%s3319_s30 + $0x210] sm:$0xff] }
 0x160   : > { %1874 = vmatpush2.msra.mxu1 %v754_v0  ;;  %1714 = vmatprep.subr.mxu0 %v623_v1  ;;  %v710_v0 = vld [vmem:[%s3319_s30 + $0x610] sm:$0xff]  ;;  %v2881_v1 = vld [vmem:[%s3312_s19 + $0x8] sm:$0xff] }
 0x161   : > { %1875 = vmatprep.subr.mxu1 %v751_v2  ;;  %1480 = vmatprep.mubr.f32.mxu0 %v481_v3  ;;  %v835_v2 = vld [vmem:[%s3319_s30 + $0x9f8] sm:$0xff] }
 0x162   : > { %1641 = vmatprep.mubr.f32.mxu1 %v483_v4  ;;  %1715 = vmatpush2.msra.mxu0 %v622_v5  ;;  %v963_v3 = vld [vmem:[%s3319_s30 + $0xdf8] sm:$0xff]  ;;  %v834_v5 = vld [vmem:[%s3319_s30 + $0x9f0] sm:$0xff] }
 0x163   : > { %1876 = vmatpush2.msra.mxu1 %v750_v6  ;;  %1481 = vmatmul.mubr.f32.gmra.mxu0 %v480_v7  ;;  %v2882_v4 = vld [vmem:[%s3312_s19 + $0x18] sm:$0xff]  ;;  %v962_v6 = vld [vmem:[%s3319_s30 + $0xdf0] sm:$0xff]  ;;  %v2883_v7 = vld [vmem:[%s3312_s19] sm:$0xff] }
 0x164   : > { %1642 = vmatmul.mubr.f32.gmra.mxu1 %v482_v8  ;;  %1716 = vmatprep.subr.mxu0 %v619_v9  ;;  %v2884_v8 = vld [vmem:[%s3312_s19 + $0x10] sm:$0xff]  ;;  %v831_v9 = vld [vmem:[%s3319_s30 + $0x9d8] sm:$0xff] }
 0x165   : > { %1877 = vmatprep.subr.mxu1 %v747_v10  ;;  %1717 = vmatpush2.msra.mxu0 %v618_v11 }
 0x166   : > { %1878 = vmatpush2.msra.mxu1 %v746_v12  ;;  %1718 = vmatprep.subr.mxu0 %v615_v13  ;;  %v830_v12 = vld [vmem:[%s3319_s30 + $0x9d0] sm:$0xff]  ;;  %v959_v13 = vld [vmem:[%s3319_s30 + $0xdd8] sm:$0xff] }
 0x167   : > { %1879 = vmatprep.subr.mxu1 %v743_v14  ;;  %1486 = vmatprep.mubr.f32.mxu0 %v489_v15 }
 0x168   : > { %1647 = vmatprep.mubr.f32.mxu1 %v491_v16  ;;  %1719 = vmatpush2.msra.mxu0 %v614_v17  ;;  %v2885_v16 = vld [vmem:[%s3312_s19 + $0x48] sm:$0xff]  ;;  %v827_v17 = vld [vmem:[%s3319_s30 + $0x9b8] sm:$0xff] }
 0x169   : > { %1880 = vmatpush2.msra.mxu1 %v742_v18  ;;  %1487 = vmatmul.mubr.f32.gmra.mxu0 %v488_v19  ;;  %v2886_v18 = vld [vmem:[%s3312_s19 + $0x58] sm:$0xff]  ;;  %v958_v19 = vld [vmem:[%s3319_s30 + $0xdd0] sm:$0xff] }
 0x16a   : > { %1648 = vmatmul.mubr.f32.gmra.mxu1 %v490_v20  ;;  %1720 = vmatprep.subr.mxu0 %v611_v21  ;;  %v826_v20 = vld [vmem:[%s3319_s30 + $0x9b0] sm:$0xff]  ;;  %v2887_v21 = vld [vmem:[%s3312_s19 + $0x40] sm:$0xff] }
 0x16b   : > { %1881 = vmatprep.subr.mxu1 %v739_v22  ;;  %1721 = vmatpush2.msra.mxu0 %v610_v23  ;;  %v955_v22 = vld [vmem:[%s3319_s30 + $0xdb8] sm:$0xff] }
 0x16c   : > { %1882 = vmatpush2.msra.mxu1 %v738_v24  ;;  %1722 = vmatprep.subr.mxu0 %v607_v25  ;;  %v823_v23 = vld [vmem:[%s3319_s30 + $0x998] sm:$0xff]  ;;  %v2888_v24 = vld [vmem:[%s3312_s19 + $0x50] sm:$0xff] }
 0x16d   : > { %1883 = vmatprep.subr.mxu1 %v735_v26  ;;  %1492 = vmatprep.mubr.f32.mxu0 %v497_v27  ;;  %v954_v25 = vld [vmem:[%s3319_s30 + $0xdb0] sm:$0xff] }
 0x16e   : > { %1653 = vmatprep.mubr.f32.mxu1 %v499_v28  ;;  %1723 = vmatpush2.msra.mxu0 %v606_v29  ;;  %v822_v28 = vld [vmem:[%s3319_s30 + $0x990] sm:$0xff]  ;;  %v951_v29 = vld [vmem:[%s3319_s30 + $0xd98] sm:$0xff] }
 0x16f   : > { %1884 = vmatpush2.msra.mxu1 %v734_v30  ;;  %1493 = vmatmul.mubr.f32.gmra.mxu0 %v496_v31 }
 0x170   : > { %1654 = vmatmul.mubr.f32.gmra.mxu1 %v498_v32  ;;  %1724 = vmatprep.subr.mxu0 %v603_v33  ;;  %v2889_v32 = vld [vmem:[%s3312_s19 + $0x88] sm:$0xff]  ;;  %v819_v33 = vld [vmem:[%s3319_s30 + $0x978] sm:$0xff] }
 0x171   : > { %1885 = vmatprep.subr.mxu1 %v731_v34  ;;  %1725 = vmatpush2.msra.mxu0 %v602_v35  ;;  %v2890_v34 = vld [vmem:[%s3312_s19 + $0x98] sm:$0xff]  ;;  %v950_v35 = vld [vmem:[%s3319_s30 + $0xd90] sm:$0xff] }
 0x172   : > { %1886 = vmatpush2.msra.mxu1 %v730_v36  ;;  %1726 = vmatprep.subr.mxu0 %v599_v37  ;;  %v818_v36 = vld [vmem:[%s3319_s30 + $0x970] sm:$0xff]  ;;  %v2891_v37 = vld [vmem:[%s3312_s19 + $0x80] sm:$0xff] }
 0x173   : > { %1887 = vmatprep.subr.mxu1 %v727_v38  ;;  %1498 = vmatprep.mubr.f32.mxu0 %v505_v39  ;;  %v947_v38 = vld [vmem:[%s3319_s30 + $0xd78] sm:$0xff] }
 0x174   : > { %1659 = vmatprep.mubr.f32.mxu1 %v507_v40  ;;  %1727 = vmatpush2.msra.mxu0 %v598_v41  ;;  %v815_v39 = vld [vmem:[%s3319_s30 + $0x958] sm:$0xff]  ;;  %v2892_v40 = vld [vmem:[%s3312_s19 + $0x90] sm:$0xff] }
 0x175   : > { %1888 = vmatpush2.msra.mxu1 %v726_v42  ;;  %1499 = vmatmul.mubr.f32.gmra.mxu0 %v504_v43  ;;  %v946_v41 = vld [vmem:[%s3319_s30 + $0xd70] sm:$0xff] }
 0x176   : > { %1660 = vmatmul.mubr.f32.gmra.mxu1 %v506_v44  ;;  %1728 = vmatprep.subr.mxu0 %v595_v45  ;;  %v814_v44 = vld [vmem:[%s3319_s30 + $0x950] sm:$0xff] }
 0x177   : > { %1889 = vmatprep.subr.mxu1 %v723_v46  ;;  %1729 = vmatpush2.msra.mxu0 %v594_v47  ;;  %v943_v46 = vld [vmem:[%s3319_s30 + $0xd58] sm:$0xff] }
 0x178   : > { %1890 = vmatpush2.msra.mxu1 %v722_v48  ;;  %1730 = vmatprep.subr.mxu0 %v591_v49  ;;  %v2893_v49 = vld [vmem:[%s3312_s19 + $0xc8] sm:$0xff] }
 0x179   : > { %1891 = vmatprep.subr.mxu1 %v719_v50  ;;  %1504 = vmatprep.mubr.f32.mxu0 %v513_v51  ;;  %v811_v50 = vld [vmem:[%s3319_s30 + $0x938] sm:$0xff] }
 0x17a   : > { %1665 = vmatprep.mubr.f32.mxu1 %v515_v52  ;;  %1731 = vmatpush2.msra.mxu0 %v590_v53  ;;  %v2894_v51 = vld [vmem:[%s3312_s19 + $0xd8] sm:$0xff]  ;;  %v942_v52 = vld [vmem:[%s3319_s30 + $0xd50] sm:$0xff] }
 0x17b   : > { %1892 = vmatpush2.msra.mxu1 %v718_v54  ;;  %1505 = vmatmul.mubr.f32.gmra.mxu0 %v512_v55  ;;  %v810_v53 = vld [vmem:[%s3319_s30 + $0x930] sm:$0xff]  ;;  %v2895_v54 = vld [vmem:[%s3312_s19 + $0xc0] sm:$0xff]  ;;  %v939_v55 = vld [vmem:[%s3319_s30 + $0xd38] sm:$0xff] }
 0x17c   : > { %1666 = vmatmul.mubr.f32.gmra.mxu1 %v514_v56  ;;  %1732 = vmatprep.subr.mxu0 %v587_v57  ;;  %v807_v56 = vld [vmem:[%s3319_s30 + $0x918] sm:$0xff]  ;;  %v2896_v57 = vld [vmem:[%s3312_s19 + $0xd0] sm:$0xff] }
 0x17d   : > { %1893 = vmatprep.subr.mxu1 %v715_v58  ;;  %1733 = vmatpush2.msra.mxu0 %v586_v59  ;;  %v938_v58 = vld [vmem:[%s3319_s30 + $0xd30] sm:$0xff] }
 0x17e   : > { %1894 = vmatpush2.msra.mxu1 %v714_v60  ;;  %1734 = vmatprep.subr.mxu0 %v583_v61  ;;  %v806_v61 = vld [vmem:[%s3319_s30 + $0x910] sm:$0xff] }
 0x17f   : > { %1895 = vmatprep.subr.mxu1 %v711_v62  ;;  %1735 = vmatpush2.msra.mxu0 %v582_v63  ;;  %v935_v63 = vld [vmem:[%s3319_s30 + $0xd18] sm:$0xff] }
 0x180   : > { %1736 = vmatprep.mubr.f32.mxu0 %v2881_v1  ;;  %1896 = vmatpush2.msra.mxu1 %v710_v0 }
 0x181   : > { %1897 = vmatprep.mubr.f32.mxu1 %v2882_v4  ;;  %1737 = vmatmul.mubr.f32.vlgmr.msra.gmra.mxu0 %v2883_v7  ;;  %v3915_v10 = vpop.f32.mrf.mxu0  ;;  %v2898_v4 = vld [vmem:[%s3312_s19 + $0x118] sm:$0xff]  ;;  %v2899_v7 = vld [vmem:[%s3312_s19 + $0x100] sm:$0xff] }
 0x182   : > { %1898 = vmatmul.mubr.f32.vlgmr.msra.gmra.mxu1 %v2884_v8  ;;  %v3917_v11 = vpop.f32.mrf.mxu1  ;;  %1994 = vmatprep.subr.mxu0 %v835_v2  ;;  %v2897_v2 = vld [vmem:[%s3312_s19 + $0x108] sm:$0xff]  ;;  %v931_v8 = vld [vmem:[%s3319_s30 + $0xcf8] sm:$0xff] }
 0x183   : > { %2155 = vmatprep.subr.mxu1 %v963_v3  ;;  %1995 = vmatpush1.msra.mxu0 %v834_v5  ;;  %v3921_v14 = vpop.f32.mrf.mxu0  ;;  %v803_v3 = vld [vmem:[%s3319_s30 + $0x8f8] sm:$0xff]  ;;  %v934_v5 = vld [vmem:[%s3319_s30 + $0xd10] sm:$0xff] }
 0x184   : > { %2156 = vmatpush1.msra.mxu1 %v962_v6  ;;  %v3923_v15 = vpop.f32.mrf.mxu1  ;;  %1996 = vmatprep.subr.mxu0 %v831_v9  ;;  %v802_v6 = vld [vmem:[%s3319_s30 + $0x8f0] sm:$0xff]  ;;  %v799_v9 = vld [vmem:[%s3319_s30 + $0x8d8] sm:$0xff] }
 0x185   : > { %1742 = vmatprep.mubr.f32.mxu0 %v2885_v16  ;;  %1903 = vmatprep.mubr.f32.mxu1 %v2886_v18  ;;  %v798_v18 = vld [vmem:[%s3319_s30 + $0x8d0] sm:$0xff] }
 0x186   : > { %1997 = vmatpush1.msra.mxu0 %v830_v12  ;;  %2157 = vmatprep.subr.mxu1 %v959_v13  ;;  %v2900_v12 = vld [vmem:[%s3312_s19 + $0x110] sm:$0xff] }
 0x187   : > { %1743 = vmatmul.mubr.f32.gmra.mxu0 %v2887_v21  ;;  %1904 = vmatmul.mubr.f32.gmra.mxu1 %v2888_v24  ;;  %v3935_v26 = vpop.f32.mrf.mxu0  ;;  %v930_v13 = vld [vmem:[%s3319_s30 + $0xcf0] sm:$0xff]  ;;  %v795_v24 = vld [vmem:[%s3319_s30 + $0x8b8] sm:$0xff] }
 0x188   : > { %1998 = vmatprep.subr.mxu0 %v827_v17  ;;  %v3937_v27 = vpop.f32.mrf.mxu1  ;;  %2158 = vmatpush1.msra.mxu1 %v958_v19 }
 0x189   : > { %1999 = vmatpush1.msra.mxu0 %v826_v20  ;;  %2159 = vmatprep.subr.mxu1 %v955_v22  ;;  %v3941_v30 = vpop.f32.mrf.mxu0  ;;  %v927_v20 = vld [vmem:[%s3319_s30 + $0xcd8] sm:$0xff] }
 0x18a   : > { %2000 = vmatprep.subr.mxu0 %v823_v23  ;;  %v3943_v31 = vpop.f32.mrf.mxu1  ;;  %2160 = vmatpush1.msra.mxu1 %v954_v25  ;;  %v2901_v23 = vld [vmem:[%s3312_s19 + $0x148] sm:$0xff]  ;;  %v2902_v25 = vld [vmem:[%s3312_s19 + $0x158] sm:$0xff] }
 0x18b   : > { %1748 = vmatprep.mubr.f32.mxu0 %v2889_v32  ;;  %1909 = vmatprep.mubr.f32.mxu1 %v2890_v34  ;;  %v2903_v32 = vld [vmem:[%s3312_s19 + $0x140] sm:$0xff]  ;;  %v791_v34 = vld [vmem:[%s3319_s30 + $0x898] sm:$0xff] }
 0x18c   : > { %2001 = vmatpush1.msra.mxu0 %v822_v28  ;;  %2161 = vmatprep.subr.mxu1 %v951_v29  ;;  %v926_v28 = vld [vmem:[%s3319_s30 + $0xcd0] sm:$0xff] }
 0x18d   : > { %1749 = vmatmul.mubr.f32.gmra.mxu0 %v2891_v37  ;;  %1910 = vmatmul.mubr.f32.gmra.mxu1 %v2892_v40  ;;  %v1106_v42 = vpop.f32.mrf.mxu0  ;;  %v794_v29 = vld [vmem:[%s3319_s30 + $0x8b0] sm:$0xff] }
 0x18e   : > { %2002 = vmatprep.subr.mxu0 %v819_v33  ;;  %v1267_v43 = vpop.f32.mrf.mxu1  ;;  %2162 = vmatpush1.msra.mxu1 %v950_v35  ;;  %v923_v33 = vld [vmem:[%s3319_s30 + $0xcb8] sm:$0xff]  ;;  %v2904_v35 = vld [vmem:[%s3312_s19 + $0x150] sm:$0xff] }
 0x18f   : > { %2003 = vmatpush1.msra.mxu0 %v818_v36  ;;  %v3956_v45 = vadd.f32 %v1267_v43, %v1106_v42  ;;  %2163 = vmatprep.subr.mxu1 %v947_v38  ;;  %v3959_v47 = vpop.f32.mrf.mxu0  ;;  %v922_v36 = vld [vmem:[%s3319_s30 + $0xcb0] sm:$0xff] }
 0x190   : > { %2004 = vmatprep.subr.mxu0 %v815_v39  ;;  %v3961_v48 = vpop.f32.mrf.mxu1  ;;  %2164 = vmatpush1.msra.mxu1 %v946_v41  ;;  %v790_v39 = vld [vmem:[%s3319_s30 + $0x890] sm:$0xff]  ;;  %v919_v41 = vld [vmem:[%s3319_s30 + $0xc98] sm:$0xff] }
 0x191   : > { %1754 = vmatprep.mubr.f32.mxu0 %v2893_v49  ;;  %1915 = vmatprep.mubr.f32.mxu1 %v2894_v51  ;;  %v2906_v49 = vld [vmem:[%s3312_s19 + $0x198] sm:$0xff]  ;;  %v786_v51 = vld [vmem:[%s3319_s30 + $0x870] sm:$0xff] }
 0x192   : > { %2005 = vmatpush1.msra.mxu0 %v814_v44  ;;  %2165 = vmatprep.subr.mxu1 %v943_v46  ;;  %v2905_v44 = vld [vmem:[%s3312_s19 + $0x188] sm:$0xff]  ;;  %v787_v46 = vld [vmem:[%s3319_s30 + $0x878] sm:$0xff] }
 0x193   : > { %1755 = vmatmul.mubr.f32.gmra.mxu0 %v2895_v54  ;;  %1916 = vmatmul.mubr.f32.gmra.mxu1 %v2896_v57  ;;  %v1112_v59 = vpop.f32.mrf.mxu0  ;;  %v783_v54 = vld [vmem:[%s3319_s30 + $0x858] sm:$0xff] }
 0x194   : > { %2006 = vmatprep.subr.mxu0 %v811_v50  ;;  %v1273_v60 = vpop.f32.mrf.mxu1  ;;  %2166 = vmatpush1.msra.mxu1 %v942_v52  ;;  %v918_v50 = vld [vmem:[%s3319_s30 + $0xc90] sm:$0xff]  ;;  %v2907_v52 = vld [vmem:[%s3312_s19 + $0x180] sm:$0xff] }
 0x195   : > { %2007 = vmatpush1.msra.mxu0 %v810_v53  ;;  %v3974_v62 = vadd.f32 %v1273_v60, %v1112_v59  ;;  %2167 = vmatprep.subr.mxu1 %v939_v55  ;;  %v3977_v0 = vpop.f32.mrf.mxu0  ;;  %v915_v53 = vld [vmem:[%s3319_s30 + $0xc78] sm:$0xff]  ;;  %v2908_v55 = vld [vmem:[%s3312_s19 + $0x190] sm:$0xff] }
 0x196   : > { %2008 = vmatprep.subr.mxu0 %v807_v56  ;;  %v3979_v1 = vpop.f32.mrf.mxu1  ;;  %2168 = vmatpush1.msra.mxu1 %v938_v58  ;;  %v914_v56 = vld [vmem:[%s3319_s30 + $0xc70] sm:$0xff] }
 0x197   : > { %1760 = vmatprep.mubr.f32.mxu0 %v2897_v2  ;;  %1921 = vmatprep.mubr.f32.mxu1 %v2898_v4  ;;  %v782_v59 = vld [vmem:[%s3319_s30 + $0x850] sm:$0xff]  ;;  %v779_v4 = vld [vmem:[%s3319_s30 + $0x838] sm:$0xff] }
 0x198   : > { %2009 = vmatpush1.msra.mxu0 %v806_v61  ;;  %2169 = vmatprep.subr.mxu1 %v935_v63  ;;  %v911_v61 = vld [vmem:[%s3319_s30 + $0xc58] sm:$0xff] }
 0x199   : > { %1761 = vmatmul.mubr.f32.gmra.mxu0 %v2899_v7  ;;  %1922 = vmatmul.mubr.f32.gmra.mxu1 %v2900_v12  ;;  %v1118_v16 = vpop.f32.mrf.mxu0  ;;  %v778_v7 = vld [vmem:[%s3319_s30 + $0x830] sm:$0xff]  ;;  %v775_v12 = vld [vmem:[%s3319_s30 + $0x818] sm:$0xff] }
 0x19a   : > { %2010 = vmatprep.subr.mxu0 %v803_v3  ;;  %v1279_v17 = vpop.f32.mrf.mxu1  ;;  %2170 = vmatpush1.msra.mxu1 %v934_v5  ;;  %v2909_v3 = vld [vmem:[%s3312_s19 + $0x1c8] sm:$0xff]  ;;  %v2910_v5 = vld [vmem:[%s3312_s19 + $0x1d8] sm:$0xff] }
 0x19b   : > { %2011 = vmatpush1.msra.mxu0 %v802_v6  ;;  %v3992_v19 = vadd.f32 %v1279_v17, %v1118_v16  ;;  %2171 = vmatprep.subr.mxu1 %v931_v8  ;;  %v3995_v21 = vpop.f32.mrf.mxu0  ;;  %v910_v6 = vld [vmem:[%s3319_s30 + $0xc50] sm:$0xff]  ;;  %v2911_v8 = vld [vmem:[%s3312_s19 + $0x1c0] sm:$0xff] }
 0x19c   : > { %2012 = vmatprep.subr.mxu0 %v799_v9  ;;  %v3997_v22 = vpop.f32.mrf.mxu1  ;;  %2172 = vmatpush1.msra.mxu1 %v930_v13  ;;  %v907_v9 = vld [vmem:[%s3319_s30 + $0xc38] sm:$0xff]  ;;  %v2912_v13 = vld [vmem:[%s3312_s19 + $0x1d0] sm:$0xff] }
 0x19d   : > { %1766 = vmatprep.mubr.f32.mxu0 %v2901_v23  ;;  %1927 = vmatprep.mubr.f32.mxu1 %v2902_v25  ;;  %v906_v16 = vld [vmem:[%s3319_s30 + $0xc30] sm:$0xff] }
 0x19e   : > { %2013 = vmatpush1.msra.mxu0 %v798_v18  ;;  %2173 = vmatprep.subr.mxu1 %v927_v20  ;;  %v774_v20 = vld [vmem:[%s3319_s30 + $0x810] sm:$0xff] }
 0x19f   : > { %1767 = vmatmul.mubr.f32.gmra.mxu0 %v2903_v32  ;;  %1928 = vmatmul.mubr.f32.gmra.mxu1 %v2904_v35  ;;  %v1124_v37 = vpop.f32.mrf.mxu0  ;;  %v899_v32 = vld [vmem:[%s3319_s30 + $0xbf8] sm:$0xff]  ;;  %v898_v35 = vld [vmem:[%s3319_s30 + $0xbf0] sm:$0xff] }
 0x1a0   : > { %2014 = vmatprep.subr.mxu0 %v795_v24  ;;  %v1285_v38 = vpop.f32.mrf.mxu1  ;;  %2174 = vmatpush1.msra.mxu1 %v926_v28  ;;  %v903_v24 = vld [vmem:[%s3319_s30 + $0xc18] sm:$0xff] }
 0x1a1   : > { %2015 = vmatpush1.msra.mxu0 %v794_v29  ;;  %v4010_v40 = vadd.f32 %v1285_v38, %v1124_v37  ;;  %2175 = vmatprep.subr.mxu1 %v923_v33  ;;  %v4013_v42 = vpop.f32.mrf.mxu0  ;;  %v2913_v29 = vld [vmem:[%s3312_s19 + $0x208] sm:$0xff]  ;;  %v2914_v33 = vld [vmem:[%s3312_s19 + $0x218] sm:$0xff] }
 0x1a2   : > { %2016 = vmatprep.subr.mxu0 %v791_v34  ;;  %v4015_v43 = vpop.f32.mrf.mxu1  ;;  %2176 = vmatpush1.msra.mxu1 %v922_v36  ;;  %v902_v34 = vld [vmem:[%s3319_s30 + $0xc10] sm:$0xff]  ;;  %v2915_v36 = vld [vmem:[%s3312_s19 + $0x200] sm:$0xff]  ;;  %v1027_v37 = vld [vmem:[%s3319_s30 + $0xff8] sm:$0xff] }
 0x1a3   : > { %1772 = vmatprep.mubr.f32.mxu0 %v2905_v44  ;;  %1933 = vmatprep.mubr.f32.mxu1 %v2906_v49  ;;  %v895_v38 = vld [vmem:[%s3319_s30 + $0xbd8] sm:$0xff]  ;;  %v894_v49 = vld [vmem:[%s3319_s30 + $0xbd0] sm:$0xff] }
 0x1a4   : > { %2017 = vmatpush1.msra.mxu0 %v790_v39  ;;  %2177 = vmatprep.subr.mxu1 %v919_v41  ;;  %v2916_v39 = vld [vmem:[%s3312_s19 + $0x210] sm:$0xff] }
 0x1a5   : > { %1773 = vmatmul.mubr.f32.gmra.mxu0 %v2907_v52  ;;  %1934 = vmatmul.mubr.f32.gmra.mxu1 %v2908_v55  ;;  %v1130_v57 = vpop.f32.mrf.mxu0  ;;  %v1026_v41 = vld [vmem:[%s3319_s30 + $0xff0] sm:$0xff]  ;;  %v891_v55 = vld [vmem:[%s3319_s30 + $0xbb8] sm:$0xff] }
 0x1a6   : > { %2018 = vmatprep.subr.mxu0 %v787_v46  ;;  %v1291_v58 = vpop.f32.mrf.mxu1  ;;  %2178 = vmatpush1.msra.mxu1 %v918_v50 }
 0x1a7   : > { %2019 = vmatpush1.msra.mxu0 %v786_v51  ;;  %v4028_v60 = vadd.f32 %v1291_v58, %v1130_v57  ;;  %2179 = vmatprep.subr.mxu1 %v915_v53  ;;  %v4031_v63 = vpop.f32.mrf.mxu0  ;;  %v1023_v51 = vld [vmem:[%s3319_s30 + $0xfd8] sm:$0xff]  ;;  %v1022_v58 = vld [vmem:[%s3319_s30 + $0xfd0] sm:$0xff] }
 0x1a8   : > { %2020 = vmatprep.subr.mxu0 %v783_v54  ;;  %v4033_v2 = vpop.f32.mrf.mxu1  ;;  %2180 = vmatpush1.msra.mxu1 %v914_v56  ;;  %v2917_v54 = vld [vmem:[%s3312_s19 + $0x248] sm:$0xff]  ;;  %v2918_v57 = vld [vmem:[%s3312_s19 + $0x258] sm:$0xff] }
 0x1a9   : > { %1778 = vmatprep.mubr.f32.mxu0 %v2909_v3  ;;  %1939 = vmatprep.mubr.f32.mxu1 %v2910_v5  ;;  %v1019_v3 = vld [vmem:[%s3319_s30 + $0xfb8] sm:$0xff]  ;;  %v2920_v5 = vld [vmem:[%s3312_s19 + $0x250] sm:$0xff] }
 0x1aa   : > { %2021 = vmatpush1.msra.mxu0 %v782_v59  ;;  %2181 = vmatprep.subr.mxu1 %v911_v61  ;;  %v890_v59 = vld [vmem:[%s3319_s30 + $0xbb0] sm:$0xff]  ;;  %v2919_v61 = vld [vmem:[%s3312_s19 + $0x240] sm:$0xff] }
 0x1ab   : > { %1779 = vmatmul.mubr.f32.gmra.mxu0 %v2911_v8  ;;  %1940 = vmatmul.mubr.f32.gmra.mxu1 %v2912_v13  ;;  %v1136_v17 = vpop.f32.mrf.mxu0  ;;  %v1015_v13 = vld [vmem:[%s3319_s30 + $0xf98] sm:$0xff] }
 0x1ac   : > { %2022 = vmatprep.subr.mxu0 %v779_v4  ;;  %v1297_v18 = vpop.f32.mrf.mxu1  ;;  %2182 = vmatpush1.msra.mxu1 %v910_v6  ;;  %v887_v4 = vld [vmem:[%s3319_s30 + $0xb98] sm:$0xff]  ;;  %v1018_v6 = vld [vmem:[%s3319_s30 + $0xfb0] sm:$0xff] }
 0x1ad   : > { %2023 = vmatpush1.msra.mxu0 %v778_v7  ;;  %v4046_v23 = vadd.f32 %v1297_v18, %v1136_v17  ;;  %2183 = vmatprep.subr.mxu1 %v907_v9  ;;  %v4049_v25 = vpop.f32.mrf.mxu0  ;;  %v886_v9 = vld [vmem:[%s3319_s30 + $0xb90] sm:$0xff]  ;;  %v2921_v18 = vld [vmem:[%s3312_s19 + $0x288] sm:$0xff] }
 0x1ae   : > { %2024 = vmatprep.subr.mxu0 %v775_v12  ;;  %v4051_v28 = vpop.f32.mrf.mxu1  ;;  %2184 = vmatpush1.msra.mxu1 %v906_v16 }
 0x1af   : > { %1784 = vmatprep.mubr.f32.mxu0 %v2913_v29  ;;  %1945 = vmatprep.mubr.f32.mxu1 %v2914_v33  ;;  %v2922_v29 = vld [vmem:[%s3312_s19 + $0x298] sm:$0xff]  ;;  %v882_v33 = vld [vmem:[%s3319_s30 + $0xb70] sm:$0xff] }
 0x1b0   : > { %2025 = vmatpush1.msra.mxu0 %v774_v20  ;;  %2185 = vmatprep.subr.mxu1 %v903_v24  ;;  %v883_v20 = vld [vmem:[%s3319_s30 + $0xb78] sm:$0xff] }
 0x1b1   : > { %1785 = vmatmul.mubr.f32.gmra.mxu0 %v2915_v36  ;;  %1946 = vmatmul.mubr.f32.gmra.mxu1 %v2916_v39  ;;  %v1142_v44 = vpop.f32.mrf.mxu0  ;;  %v879_v36 = vld [vmem:[%s3319_s30 + $0xb58] sm:$0xff] }
 0x1b2   : > { %2026 = vmatprep.subr.mxu0 %v899_v32  ;;  %v1303_v46 = vpop.f32.mrf.mxu1  ;;  %2186 = vmatpush1.msra.mxu1 %v902_v34  ;;  %v1014_v32 = vld [vmem:[%s3319_s30 + $0xf90] sm:$0xff]  ;;  %v2923_v34 = vld [vmem:[%s3312_s19 + $0x280] sm:$0xff] }
 0x1b3   : > { %2027 = vmatpush2.msra.mxu0 %v898_v35  ;;  %v4064_v50 = vadd.f32 %v1303_v46, %v1142_v44  ;;  %2187 = vmatprep.subr.mxu1 %v1027_v37  ;;  %v1144_v52 = vpop.f32.mrf.mxu0  ;;  %v1011_v35 = vld [vmem:[%s3319_s30 + $0xf78] sm:$0xff]  ;;  %v2924_v37 = vld [vmem:[%s3312_s19 + $0x290] sm:$0xff] }
 0x1b4   : > { %2028 = vmatprep.subr.mxu0 %v895_v38  ;;  %v1305_v53 = vpop.f32.mrf.mxu1  ;;  %2188 = vmatpush2.msra.mxu1 %v1026_v41  ;;  %v1010_v38 = vld [vmem:[%s3319_s30 + $0xf70] sm:$0xff] }
 0x1b5   : > { %1790 = vmatprep.mubr.f32.mxu0 %v2917_v54  ;;  %v4069_v56 = vadd.f32 %v1305_v53, %v1144_v52  ;;  %1951 = vmatprep.mubr.f32.mxu1 %v2918_v57  ;;  %v878_v44 = vld [vmem:[%s3319_s30 + $0xb50] sm:$0xff]  ;;  %v2925_v53 = vld [vmem:[%s3312_s19 + $0x2c8] sm:$0xff]  ;;  %v875_v54 = vld [vmem:[%s3319_s30 + $0xb38] sm:$0xff] }
 0x1b6   : > { %2029 = vmatpush2.msra.mxu0 %v894_v49  ;;  %2189 = vmatprep.subr.mxu1 %v1023_v51  ;;  %v1007_v49 = vld [vmem:[%s3319_s30 + $0xf58] sm:$0xff] }
 0x1b7   : > { %1791 = vmatmul.mubr.f32.gmra.mxu0 %v2919_v61  ;;  %1952 = vmatmul.mubr.f32.gmra.mxu1 %v2920_v5  ;;  %v1148_v7 = vpop.f32.mrf.mxu0  ;;  %v2926_v57 = vld [vmem:[%s3312_s19 + $0x2d8] sm:$0xff]  ;;  %v2927_v61 = vld [vmem:[%s3312_s19 + $0x2c0] sm:$0xff]  ;;  %v2928_v5 = vld [vmem:[%s3312_s19 + $0x2d0] sm:$0xff] }
 0x1b8   : > { %2030 = vmatprep.subr.mxu0 %v891_v55  ;;  %v1309_v8 = vpop.f32.mrf.mxu1  ;;  %2190 = vmatpush2.msra.mxu1 %v1022_v58  ;;  %v1006_v58 = vld [vmem:[%s3319_s30 + $0xf50] sm:$0xff] }
 0x1b9   : > { %2031 = vmatpush2.msra.mxu0 %v890_v59  ;;  %v4080_v12 = vadd.f32 %v1309_v8, %v1148_v7  ;;  %2191 = vmatprep.subr.mxu1 %v1019_v3  ;;  %v1150_v16 = vpop.f32.mrf.mxu0  ;;  %v874_v59 = vld [vmem:[%s3319_s30 + $0xb30] sm:$0xff]  ;;  %v1003_v3 = vld [vmem:[%s3319_s30 + $0xf38] sm:$0xff] }
 0x1ba   : > { %2032 = vmatprep.subr.mxu0 %v887_v4  ;;  %v1311_v17 = vpop.f32.mrf.mxu1  ;;  %2192 = vmatpush2.msra.mxu1 %v1018_v6  ;;  %v871_v4 = vld [vmem:[%s3319_s30 + $0xb18] sm:$0xff]  ;;  %v1002_v6 = vld [vmem:[%s3319_s30 + $0xf30] sm:$0xff] }
 0x1bb   : > { %1796 = vmatprep.mubr.f32.mxu0 %v2921_v18  ;;  %v4085_v24 = vadd.f32 %v1311_v17, %v1150_v16  ;;  %1957 = vmatprep.mubr.f32.mxu1 %v2922_v29  ;;  %v999_v16 = vld [vmem:[%s3319_s30 + $0xf18] sm:$0xff] }
 0x1bc   : > { %2033 = vmatpush2.msra.mxu0 %v886_v9  ;;  %2193 = vmatprep.subr.mxu1 %v1015_v13  ;;  %v870_v9 = vld [vmem:[%s3319_s30 + $0xb10] sm:$0xff]  ;;  %v867_v29 = vld [vmem:[%s3319_s30 + $0xaf8] sm:$0xff] }
 0x1bd   : > { %1797 = vmatmul.mubr.f32.gmra.mxu0 %v2923_v34  ;;  %1958 = vmatmul.mubr.f32.gmra.mxu1 %v2924_v37  ;;  %v1154_v39 = vpop.f32.mrf.mxu0  ;;  %v998_v34 = vld [vmem:[%s3319_s30 + $0xf10] sm:$0xff]  ;;  %v995_v37 = vld [vmem:[%s3319_s30 + $0xef8] sm:$0xff] }
 0x1be   : > { %2034 = vmatprep.subr.mxu0 %v883_v20  ;;  %v1315_v41 = vpop.f32.mrf.mxu1  ;;  %2194 = vmatpush2.msra.mxu1 %v1014_v32  ;;  %v2929_v20 = vld [vmem:[%s3312_s19 + $0x308] sm:$0xff] }
 0x1bf   : > { %2035 = vmatpush2.msra.mxu0 %v882_v33  ;;  %v4096_v46 = vadd.f32 %v1315_v41, %v1154_v39  ;;  %2195 = vmatprep.subr.mxu1 %v1011_v35  ;;  %v1156_v51 = vpop.f32.mrf.mxu0  ;;  %v2930_v33 = vld [vmem:[%s3312_s19 + $0x318] sm:$0xff]  ;;  %v866_v35 = vld [vmem:[%s3319_s30 + $0xaf0] sm:$0xff] }
 0x1c0   : > { %2036 = vmatprep.subr.mxu0 %v879_v36  ;;  %v1317_v52 = vpop.f32.mrf.mxu1  ;;  %2196 = vmatpush2.msra.mxu1 %v1010_v38  ;;  %v2931_v36 = vld [vmem:[%s3312_s19 + $0x300] sm:$0xff]  ;;  %v863_v38 = vld [vmem:[%s3319_s30 + $0xad8] sm:$0xff]  ;;  %v2932_v39 = vld [vmem:[%s3312_s19 + $0x310] sm:$0xff] }
 0x1c1   : > { %1802 = vmatprep.mubr.f32.mxu0 %v2925_v53  ;;  %v4101_v55 = vadd.f32 %v1317_v52, %v1156_v51  ;;  %1963 = vmatprep.mubr.f32.mxu1 %v2926_v57  ;;  %v994_v41 = vld [vmem:[%s3319_s30 + $0xef0] sm:$0xff]  ;;  %v991_v53 = vld [vmem:[%s3319_s30 + $0xed8] sm:$0xff] }
 0x1c2   : > { %2037 = vmatpush2.msra.mxu0 %v878_v44  ;;  %2197 = vmatprep.subr.mxu1 %v1007_v49  ;;  %v862_v51 = vld [vmem:[%s3319_s30 + $0xad0] sm:$0xff] }
 0x1c3   : > { %1803 = vmatmul.mubr.f32.gmra.mxu0 %v2927_v61  ;;  %1964 = vmatmul.mubr.f32.gmra.mxu1 %v2928_v5  ;;  %v1160_v7 = vpop.f32.mrf.mxu0  ;;  %v858_v5 = vld [vmem:[%s3319_s30 + $0xab0] sm:$0xff] }
 0x1c4   : > { %2038 = vmatprep.subr.mxu0 %v875_v54  ;;  %v1321_v8 = vpop.f32.mrf.mxu1  ;;  %2198 = vmatpush2.msra.mxu1 %v1006_v58  ;;  %v2933_v58 = vld [vmem:[%s3312_s19 + $0x348] sm:$0xff] }
 0x1c5   : > { %2039 = vmatpush2.msra.mxu0 %v874_v59  ;;  %v4112_v13 = vadd.f32 %v1321_v8, %v1160_v7  ;;  %2199 = vmatprep.subr.mxu1 %v1003_v3  ;;  %v1162_v17 = vpop.f32.mrf.mxu0  ;;  %v859_v59 = vld [vmem:[%s3319_s30 + $0xab8] sm:$0xff] }
 0x1c6   : > { %2040 = vmatprep.subr.mxu0 %v871_v4  ;;  %v1323_v18 = vpop.f32.mrf.mxu1  ;;  %2200 = vmatpush2.msra.mxu1 %v1002_v6  ;;  %v2934_v3 = vld [vmem:[%s3312_s19 + $0x358] sm:$0xff]  ;;  %v990_v4 = vld [vmem:[%s3319_s30 + $0xed0] sm:$0xff]  ;;  %v2935_v6 = vld [vmem:[%s3312_s19 + $0x340] sm:$0xff] }
 0x1c7   : > { %1808 = vmatprep.mubr.f32.mxu0 %v2929_v20  ;;  %v4117_v32 = vadd.f32 %v1323_v18, %v1162_v17  ;;  %1969 = vmatprep.mubr.f32.mxu1 %v2930_v33  ;;  %v987_v7 = vld [vmem:[%s3319_s30 + $0xeb8] sm:$0xff]  ;;  %v854_v20 = vld [vmem:[%s3319_s30 + $0xa90] sm:$0xff] }
 0x1c8   : > { %2041 = vmatpush2.msra.mxu0 %v870_v9  ;;  %2201 = vmatprep.subr.mxu1 %v999_v16  ;;  %v855_v8 = vld [vmem:[%s3319_s30 + $0xa98] sm:$0xff]  ;;  %v2936_v9 = vld [vmem:[%s3312_s19 + $0x350] sm:$0xff] }
 0x1c9   : > { %1809 = vmatmul.mubr.f32.gmra.mxu0 %v2931_v36  ;;  %1970 = vmatmul.mubr.f32.gmra.mxu1 %v2932_v39  ;;  %v1166_v44 = vpop.f32.mrf.mxu0  ;;  %v986_v16 = vld [vmem:[%s3319_s30 + $0xeb0] sm:$0xff]  ;;  %v983_v33 = vld [vmem:[%s3319_s30 + $0xe98] sm:$0xff]  ;;  %v2937_v36 = vld [vmem:[%s3312_s19 + $0x388] sm:$0xff] }
 0x1ca   : > { %2042 = vmatprep.subr.mxu0 %v867_v29  ;;  %v1327_v49 = vpop.f32.mrf.mxu1  ;;  %2202 = vmatpush2.msra.mxu1 %v998_v34  ;;  %v2938_v39 = vld [vmem:[%s3312_s19 + $0x398] sm:$0xff] }
 0x1cb   : > { %2043 = vmatpush2.msra.mxu0 %v866_v35  ;;  %v4128_v52 = vadd.f32 %v1327_v49, %v1166_v44  ;;  %2203 = vmatprep.subr.mxu1 %v995_v37  ;;  %v1168_v54 = vpop.f32.mrf.mxu0  ;;  %v851_v37 = vld [vmem:[%s3319_s30 + $0xa78] sm:$0xff]  ;;  %v850_v44 = vld [vmem:[%s3319_s30 + $0xa70] sm:$0xff]  ;;  %v2939_v49 = vld [vmem:[%s3312_s19 + $0x380] sm:$0xff] }
 0x1cc   : > { %2044 = vmatprep.subr.mxu0 %v863_v38  ;;  %v1329_v57 = vpop.f32.mrf.mxu1  ;;  %2204 = vmatpush2.msra.mxu1 %v994_v41  ;;  %v982_v41 = vld [vmem:[%s3319_s30 + $0xe90] sm:$0xff] }
 0x1cd   : > { %1814 = vmatprep.mubr.f32.mxu0 %v2933_v58  ;;  %v4133_v61 = vadd.f32 %v1329_v57, %v1168_v54  ;;  %1975 = vmatprep.mubr.f32.mxu1 %v2934_v3  ;;  %v2940_v54 = vld [vmem:[%s3312_s19 + $0x390] sm:$0xff] }
 0x1ce   : > { %2045 = vmatpush2.msra.mxu0 %v862_v51  ;;  %2205 = vmatprep.subr.mxu1 %v991_v53  ;;  %v979_v51 = vld [vmem:[%s3319_s30 + $0xe78] sm:$0xff]  ;;  %v978_v57 = vld [vmem:[%s3319_s30 + $0xe70] sm:$0xff] }
 0x1cf   : > { %1815 = vmatmul.mubr.f32.gmra.mxu0 %v2935_v6  ;;  %1976 = vmatmul.mubr.f32.gmra.mxu1 %v2936_v9  ;;  %v1172_v17 = vpop.f32.mrf.mxu0  ;;  %v847_v53 = vld [vmem:[%s3319_s30 + $0xa58] sm:$0xff]  ;;  %v846_v3 = vld [vmem:[%s3319_s30 + $0xa50] sm:$0xff] }
 0x1d0   : > { %2046 = vmatprep.subr.mxu0 %v859_v59  ;;  %v1333_v18 = vpop.f32.mrf.mxu1  ;;  %2206 = vmatpush2.msra.mxu1 %v990_v4  ;;  %v843_v9 = vld [vmem:[%s3319_s30 + $0xa38] sm:$0xff] }
 0x1d1   : > { %2047 = vmatpush2.msra.mxu0 %v858_v5  ;;  %v4144_v29 = vadd.f32 %v1333_v18, %v1172_v17  ;;  %2207 = vmatprep.subr.mxu1 %v987_v7  ;;  %v1174_v34 = vpop.f32.mrf.mxu0  ;;  %v975_v5 = vld [vmem:[%s3319_s30 + $0xe58] sm:$0xff]  ;;  %v974_v18 = vld [vmem:[%s3319_s30 + $0xe50] sm:$0xff] }
 0x1d2   : > { %2048 = vmatprep.subr.mxu0 %v855_v8  ;;  %v1335_v35 = vpop.f32.mrf.mxu1  ;;  %2208 = vmatpush2.msra.mxu1 %v986_v16  ;;  %v2941_v8 = vld [vmem:[%s3312_s19 + $0x3c8] sm:$0xff]  ;;  %v2942_v17 = vld [vmem:[%s3312_s19 + $0x3d8] sm:$0xff] }
 0x1d3   : > { %1820 = vmatprep.mubr.f32.mxu0 %v2937_v36  ;;  %v4149_v38 = vadd.f32 %v1335_v35, %v1174_v34  ;;  %1981 = vmatprep.mubr.f32.mxu1 %v2938_v39  ;;  %v971_v34 = vld [vmem:[%s3319_s30 + $0xe38] sm:$0xff]  ;;  %v2944_v36 = vld [vmem:[%s3312_s19 + $0x3d0] sm:$0xff] }
 0x1d4   : > { %2049 = vmatpush2.msra.mxu0 %v854_v20  ;;  %2209 = vmatprep.subr.mxu1 %v983_v33  ;;  %v842_v20 = vld [vmem:[%s3319_s30 + $0xa30] sm:$0xff]  ;;  %v2943_v33 = vld [vmem:[%s3312_s19 + $0x3c0] sm:$0xff]  ;;  %v839_v35 = vld [vmem:[%s3319_s30 + $0xa18] sm:$0xff] }
 0x1d5   : > { %1821 = vmatmul.mubr.f32.gmra.mxu0 %v2939_v49  ;;  %1982 = vmatmul.mubr.f32.gmra.mxu1 %v2940_v54  ;;  %v1178_v58 = vpop.f32.mrf.mxu0  ;;  %v838_v39 = vld [vmem:[%s3319_s30 + $0xa10] sm:$0xff]  ;;  %v967_v49 = vld [vmem:[%s3319_s30 + $0xe18] sm:$0xff] }
 0x1d6   : > { %2050 = vmatprep.subr.mxu0 %v851_v37  ;;  %v1339_v59 = vpop.f32.mrf.mxu1  ;;  %2210 = vmatpush2.msra.mxu1 %v982_v41  ;;  %v970_v37 = vld [vmem:[%s3319_s30 + $0xe30] sm:$0xff] }
 0x1d7   : > { %2051 = vmatpush2.msra.mxu0 %v850_v44  ;;  %v4160_v4 = vadd.f32 %v1339_v59, %v1178_v58  ;;  %2211 = vmatprep.subr.mxu1 %v979_v51  ;;  %v1180_v6 = vpop.f32.mrf.mxu0  ;;  %v2945_v59 = vld [vmem:[%s3312_s19 + $0x28] sm:$0xff] }
 0x1d8   : > { %2052 = vmatprep.subr.mxu0 %v847_v53  ;;  %v1341_v7 = vpop.f32.mrf.mxu1  ;;  %2212 = vmatpush2.msra.mxu1 %v978_v57  ;;  %v966_v53 = vld [vmem:[%s3319_s30 + $0xe10] sm:$0xff] }
 0x1d9   : > { %1826 = vmatprep.mubr.f32.mxu0 %v2941_v8  ;;  %v4165_v16 = vadd.f32 %v1341_v7, %v1180_v6  ;;  %1987 = vmatprep.mubr.f32.mxu1 %v2942_v17  ;;  %v2947_v6 = vld [vmem:[%s3312_s19 + $0x38] sm:$0xff]  ;;  %v2948_v7 = vld [vmem:[%s3312_s19 + $0x68] sm:$0xff]  ;;  %v2949_v17 = vld [vmem:[%s3312_s19 + $0x30] sm:$0xff] }
 0x1da   : > { %2053 = vmatpush2.msra.mxu0 %v846_v3  ;;  %2213 = vmatprep.subr.mxu1 %v975_v5  ;;  %v1256_v3 = vadd.f32 %v3917_v11, %v3915_v10  ;;  %v2946_v5 = vld [vmem:[%s3312_s19 + $0x20] sm:$0xff]  ;;  %v324_v10 = vld [vmem:[#allocation2 + $0xb0] sm:$0xff] }
 0x1db   : > { %1827 = vmatmul.mubr.f32.gmra.mxu0 %v2943_v33  ;;  %1988 = vmatmul.mubr.f32.gmra.mxu1 %v2944_v36  ;;  %v1184_v41 = vpop.f32.mrf.mxu0  ;;  %v2950_v33 = vld [vmem:[%s3312_s19 + $0x78] sm:$0xff] }
 0x1dc   : > { %2054 = vmatprep.subr.mxu0 %v843_v9  ;;  %v1345_v44 = vpop.f32.mrf.mxu1  ;;  %2214 = vmatpush2.msra.mxu1 %v974_v18  ;;  %v1258_v18 = vadd.f32 %v3923_v15, %v3921_v14  ;;  %v2953_v14 = vld [vmem:[%s3312_s19 + $0x70] sm:$0xff] }
 0x1dd   : > { %2055 = vmatpush2.msra.mxu0 %v842_v20  ;;  %v4177_v51 = vadd.f32 %v1345_v44, %v1184_v41  ;;  %2215 = vmatprep.subr.mxu1 %v971_v34  ;;  %v1186_v54 = vpop.f32.mrf.mxu0  ;;  %v325_v41 = vld [vmem:[#allocation2 + $0x1b0] sm:$0xff]  ;;  %v1262_v44 = vadd.f32 %v3937_v27, %v3935_v26  ;;  %v2956_v26 = vld [vmem:[%s3312_s19 + $0xe8] sm:$0xff] }
 0x1de   : > { %2056 = vmatprep.subr.mxu0 %v839_v35  ;;  %v1347_v57 = vpop.f32.mrf.mxu1  ;;  %2216 = vmatpush2.msra.mxu1 %v970_v37  ;;  %v2951_v35 = vld [vmem:[%s3312_s19 + $0x60] sm:$0xff]  ;;  %v328_v27 = vld [vmem:[#allocation2 + $0x50] sm:$0xff] }
 0x1df   : > { %2057 = vmatpush2.msra.mxu0 %v838_v39  ;;  %v4180_v58 = vadd.f32 %v1347_v57, %v1186_v54  ;;  %2058 = vmatprep.mubr.f32.mxu0 %v2945_v59  ;;  %v2952_v39 = vld [vmem:[%s3312_s19 + $0xa8] sm:$0xff]  ;;  %v1264_v59 = vadd.f32 %v3943_v31, %v3941_v30  ;;  %v2958_v30 = vld [vmem:[%s3312_s19 + $0xf8] sm:$0xff] }
 0x1e0   : > { %2217 = vmatprep.subr.mxu1 %v967_v49  ;;  %2059 = vmatmul.mubr.f32.vlgmr.msra.gmra.mxu0 %v2946_v5  ;;  %v329_v31 = vld [vmem:[#allocation2 + $0x168] sm:$0xff] }
 0x1e1   : > { %2218 = vmatpush2.msra.mxu1 %v966_v53  ;;  %2219 = vmatprep.mubr.f32.mxu1 %v2947_v6  ;;  %v1416_v8 = vpop.f32.mrf.mxu0  ;;  %v2954_v53 = vld [vmem:[%s3312_s19 + $0xb8] sm:$0xff] }
 0x1e2   : > { %2064 = vmatprep.mubr.f32.mxu0 %v2948_v7  ;;  %v1577_v9 = vpop.f32.mrf.mxu1  ;;  %2220 = vmatmul.mubr.f32.vlgmr.msra.gmra.mxu1 %v2949_v17  ;;  %v1417_v20 = vadd.f32 %v1416_v8, %v1256_v3  ;;  %v2955_v3 = vld [vmem:[%s3312_s19 + $0xa0] sm:$0xff] }
 0x1e3   : > { %2225 = vmatprep.mubr.f32.mxu1 %v2950_v33  ;;  %v1418_v11 = vpop.f32.mrf.mxu0 }
 0x1e4   : > { %v1579_v34 = vpop.f32.mrf.mxu1  ;;  %2065 = vmatmul.mubr.f32.gmra.mxu0 %v2951_v35  ;;  %v1578_v36 = vadd.f32 %v1577_v9, %v1417_v20  ;;  %v1419_v37 = vadd.f32 %v1418_v11, %v1258_v18  ;;  %v2957_v9 = vld [vmem:[%s3312_s19 + $0xb0] sm:$0xff]  ;;  %v2959_v20 = vld [vmem:[%s3312_s19 + $0xe0] sm:$0xff]  ;;  %v2960_v11 = vld [vmem:[%s3312_s19 + $0x128] sm:$0xff] }
 0x1e5   : > { %2070 = vmatprep.mubr.f32.mxu0 %v2952_v39 }
 0x1e6   : > { %2226 = vmatmul.mubr.f32.gmra.mxu1 %v2953_v14  ;;  %v2316_v15 = vadd.f32 %v1578_v36, %v324_v10  ;;  %v1580_v49 = vadd.f32 %v1579_v34, %v1419_v37  ;;  %v1270_v36 = vadd.f32 %v3961_v48, %v3959_v47  ;;  %v2961_v37 = vld [vmem:[%s3312_s19 + $0xf0] sm:$0xff]  ;;  %v332_v14 = vld [vmem:[#allocation2 + $0x180] sm:$0xff]  ;;  %v2964_v48 = vld [vmem:[%s3312_s19 + $0x168] sm:$0xff] }
 0x1e7   : > { %2231 = vmatprep.mubr.f32.mxu1 %v2954_v53  ;;  %v1422_v54 = vpop.f32.mrf.mxu0  ;;  %v2963_v53 = vld [vmem:[%s3312_s19 + $0x120] sm:$0xff] }
 0x1e8   : > { %v1583_v57 = vpop.f32.mrf.mxu1  ;;  %2071 = vmatmul.mubr.f32.gmra.mxu0 %v2955_v3  ;;  %2380 = vst [vmem:[#allocation2 + $0xb0] sm:$0xff] %v2316_v15  ;;  %v2317_v5 = vadd.f32 %v1580_v49, %v325_v41  ;;  %v1423_v6 = vadd.f32 %v1422_v54, %v1262_v44  ;;  %v2962_v44 = vld [vmem:[%s3312_s19 + $0x138] sm:$0xff] }
 0x1e9   : > { %2076 = vmatprep.mubr.f32.mxu0 %v2956_v26  ;;  %v1424_v7 = vpop.f32.mrf.mxu0 }
 0x1ea   : > { %v1585_v8 = vpop.f32.mrf.mxu1  ;;  %2232 = vmatmul.mubr.f32.gmra.mxu1 %v2957_v9  ;;  %2381 = vst [vmem:[#allocation2 + $0x1b0] sm:$0xff] %v2317_v5  ;;  %v1584_v17 = vadd.f32 %v1583_v57, %v1423_v6  ;;  %v1425_v18 = vadd.f32 %v1424_v7, %v1264_v59  ;;  %v333_v57 = vld [vmem:[#allocation2 + $0x110] sm:$0xff]  ;;  %v2966_v5 = vld [vmem:[%s3312_s19 + $0x178] sm:$0xff]  ;;  %v2967_v7 = vld [vmem:[%s3312_s19 + $0x160] sm:$0xff] }
 0x1eb   : > { %2237 = vmatprep.mubr.f32.mxu1 %v2958_v30  ;;  %v2965_v59 = vld [vmem:[%s3312_s19 + $0x130] sm:$0xff] }
 0x1ec   : > { %2077 = vmatmul.mubr.f32.gmra.mxu0 %v2959_v20  ;;  %v2320_v33 = vadd.f32 %v1584_v17, %v328_v27  ;;  %v1586_v10 = vadd.f32 %v1585_v8, %v1425_v18  ;;  %v1276_v27 = vadd.f32 %v3979_v1, %v3977_v0  ;;  %v2968_v17 = vld [vmem:[%s3312_s19 + $0x1a8] sm:$0xff]  ;;  %v336_v18 = vld [vmem:[#allocation2 + $0x120] sm:$0xff]  ;;  %v2969_v20 = vld [vmem:[%s3312_s19 + $0x170] sm:$0xff] }
 0x1ed   : > { %2082 = vmatprep.mubr.f32.mxu0 %v2960_v11  ;;  %v1428_v34 = vpop.f32.mrf.mxu0  ;;  %v2970_v1 = vld [vmem:[%s3312_s19 + $0x1b8] sm:$0xff]  ;;  %v2971_v11 = vld [vmem:[%s3312_s19 + $0x1a0] sm:$0xff] }
 0x1ee   : > { %v1589_v35 = vpop.f32.mrf.mxu1  ;;  %2238 = vmatmul.mubr.f32.gmra.mxu1 %v2961_v37  ;;  %2384 = vst [vmem:[#allocation2 + $0x50] sm:$0xff] %v2320_v33  ;;  %v2321_v39 = vadd.f32 %v1586_v10, %v329_v31  ;;  %v1429_v41 = vadd.f32 %v1428_v34, %v3956_v45  ;;  %v337_v10 = vld [vmem:[#allocation2 + $0x150] sm:$0xff] }
 0x1ef   : > { %2243 = vmatprep.mubr.f32.mxu1 %v2962_v44  ;;  %v1430_v15 = vpop.f32.mrf.mxu0 }
 0x1f0   : > { %v1591_v49 = vpop.f32.mrf.mxu1  ;;  %2083 = vmatmul.mubr.f32.gmra.mxu0 %v2963_v53  ;;  %2385 = vst [vmem:[#allocation2 + $0x168] sm:$0xff] %v2321_v39  ;;  %v1590_v54 = vadd.f32 %v1589_v35, %v1429_v41  ;;  %v1431_v47 = vadd.f32 %v1430_v15, %v1270_v36  ;;  %v2972_v35 = vld [vmem:[%s3312_s19 + $0x1e8] sm:$0xff]  ;;  %v1282_v39 = vadd.f32 %v3997_v22, %v3995_v21  ;;  %v2973_v41 = vld [vmem:[%s3312_s19 + $0x1b0] sm:$0xff]  ;;  %v2974_v15 = vld [vmem:[%s3312_s19 + $0x1f8] sm:$0xff] }
 0x1f1   : > { %2088 = vmatprep.mubr.f32.mxu0 %v2964_v48  ;;  %v2976_v22 = vld [vmem:[%s3312_s19 + $0x228] sm:$0xff] }
 0x1f2   : > { %2244 = vmatmul.mubr.f32.gmra.mxu1 %v2965_v59  ;;  %v2324_v3 = vadd.f32 %v1590_v54, %v332_v14  ;;  %v1592_v45 = vadd.f32 %v1591_v49, %v1431_v47  ;;  %v340_v49 = vld [vmem:[#allocation2 + $0xe0] sm:$0xff]  ;;  %v2977_v59 = vld [vmem:[%s3312_s19 + $0x1f0] sm:$0xff] }
 0x1f3   : > { %2249 = vmatprep.mubr.f32.mxu1 %v2966_v5  ;;  %v1434_v6 = vpop.f32.mrf.mxu0  ;;  %v2975_v47 = vld [vmem:[%s3312_s19 + $0x1e0] sm:$0xff] }
 0x1f4   : > { %v1595_v26 = vpop.f32.mrf.mxu1  ;;  %2089 = vmatmul.mubr.f32.gmra.mxu0 %v2967_v7  ;;  %2388 = vst [vmem:[#allocation2 + $0x180] sm:$0xff] %v2324_v3  ;;  %v2325_v8 = vadd.f32 %v1592_v45, %v333_v57  ;;  %v1435_v9 = vadd.f32 %v1434_v6, %v3974_v62  ;;  %v341_v57 = vld [vmem:[#allocation2 + $0x188] sm:$0xff]  ;;  %v2978_v45 = vld [vmem:[%s3312_s19 + $0x238] sm:$0xff] }
 0x1f5   : > { %2094 = vmatprep.mubr.f32.mxu0 %v2968_v17  ;;  %v1436_v30 = vpop.f32.mrf.mxu0  ;;  %v344_v17 = vld [vmem:[#allocation2 + $0x80] sm:$0xff] }
 0x1f6   : > { %v1597_v31 = vpop.f32.mrf.mxu1  ;;  %2250 = vmatmul.mubr.f32.gmra.mxu1 %v2969_v20  ;;  %2389 = vst [vmem:[#allocation2 + $0x110] sm:$0xff] %v2325_v8  ;;  %v1596_v33 = vadd.f32 %v1595_v26, %v1435_v9  ;;  %v1437_v0 = vadd.f32 %v1436_v30, %v1276_v27  ;;  %v1288_v26 = vadd.f32 %v4015_v43, %v4013_v42  ;;  %v2979_v27 = vld [vmem:[%s3312_s19 + $0x220] sm:$0xff]  ;;  %v2980_v9 = vld [vmem:[%s3312_s19 + $0x268] sm:$0xff]  ;;  %v2982_v43 = vld [vmem:[%s3312_s19 + $0x278] sm:$0xff] }
 0x1f7   : > { %2255 = vmatprep.mubr.f32.mxu1 %v2970_v1 }
 0x1f8   : > { %2095 = vmatmul.mubr.f32.gmra.mxu0 %v2971_v11  ;;  %v2328_v34 = vadd.f32 %v1596_v33, %v336_v18  ;;  %v1598_v62 = vadd.f32 %v1597_v31, %v1437_v0  ;;  %v2981_v31 = vld [vmem:[%s3312_s19 + $0x230] sm:$0xff]  ;;  %v345_v33 = vld [vmem:[#allocation2 + $0x1a8] sm:$0xff]  ;;  %v2983_v0 = vld [vmem:[%s3312_s19 + $0x260] sm:$0xff] }
 0x1f9   : > { %2100 = vmatprep.mubr.f32.mxu0 %v2972_v35  ;;  %v1440_v36 = vpop.f32.mrf.mxu0  ;;  %v2985_v35 = vld [vmem:[%s3312_s19 + $0x270] sm:$0xff] }
 0x1fa   : > { %v1601_v37 = vpop.f32.mrf.mxu1  ;;  %2256 = vmatmul.mubr.f32.gmra.mxu1 %v2973_v41  ;;  %2392 = vst [vmem:[#allocation2 + $0x120] sm:$0xff] %v2328_v34  ;;  %v2329_v44 = vadd.f32 %v1598_v62, %v337_v10  ;;  %v1441_v14 = vadd.f32 %v1440_v36, %v3992_v19  ;;  %v2984_v10 = vld [vmem:[%s3312_s19 + $0x2a8] sm:$0xff]  ;;  %v1294_v62 = vadd.f32 %v4033_v2, %v4031_v63 }
 0x1fb   : > { %2261 = vmatprep.mubr.f32.mxu1 %v2974_v15  ;;  %v1442_v53 = vpop.f32.mrf.mxu0  ;;  %v348_v41 = vld [vmem:[#allocation2 + $0x1e8] sm:$0xff]  ;;  %v2987_v15 = vld [vmem:[%s3312_s19 + $0x2a0] sm:$0xff] }
 0x1fc   : > { %v1603_v54 = vpop.f32.mrf.mxu1  ;;  %2101 = vmatmul.mubr.f32.gmra.mxu0 %v2975_v47  ;;  %2393 = vst [vmem:[#allocation2 + $0x150] sm:$0xff] %v2329_v44  ;;  %v1602_v48 = vadd.f32 %v1601_v37, %v1441_v14  ;;  %v1443_v21 = vadd.f32 %v1442_v53, %v1282_v39  ;;  %v2986_v39 = vld [vmem:[%s3312_s19 + $0x2b8] sm:$0xff]  ;;  %v2988_v2 = vld [vmem:[%s3312_s19 + $0x2e8] sm:$0xff] }
 0x1fd   : > { %2106 = vmatprep.mubr.f32.mxu0 %v2976_v22  ;;  %v349_v53 = vld [vmem:[#allocation2 + $0xf8] sm:$0xff] }
 0x1fe   : > { %2262 = vmatmul.mubr.f32.gmra.mxu1 %v2977_v59  ;;  %v2332_v3 = vadd.f32 %v1602_v48, %v340_v49  ;;  %v1604_v19 = vadd.f32 %v1603_v54, %v1443_v21  ;;  %v2989_v54 = vld [vmem:[%s3312_s19 + $0x2b0] sm:$0xff]  ;;  %v2990_v48 = vld [vmem:[%s3312_s19 + $0x2f8] sm:$0xff]  ;;  %v2991_v59 = vld [vmem:[%s3312_s19 + $0x2e0] sm:$0xff] }
 0x1ff   : > { %2267 = vmatprep.mubr.f32.mxu1 %v2978_v45  ;;  %v1446_v5 = vpop.f32.mrf.mxu0  ;;  %v2992_v45 = vld [vmem:[%s3312_s19 + $0x328] sm:$0xff] }
 0x200   : > { %v1607_v6 = vpop.f32.mrf.mxu1  ;;  %2107 = vmatmul.mubr.f32.gmra.mxu0 %v2979_v27  ;;  %2396 = vst [vmem:[#allocation2 + $0xe0] sm:$0xff] %v2332_v3  ;;  %v2333_v7 = vadd.f32 %v1604_v19, %v341_v57  ;;  %v1447_v8 = vadd.f32 %v1446_v5, %v4010_v40  ;;  %v1300_v57 = vadd.f32 %v4051_v28, %v4049_v25  ;;  %v352_v5 = vld [vmem:[#allocation2 + $0x1e0] sm:$0xff]  ;;  %v2993_v27 = vld [vmem:[%s3312_s19 + $0x2f0] sm:$0xff]  ;;  %v2994_v28 = vld [vmem:[%s3312_s19 + $0x338] sm:$0xff] }
 0x201   : > { %2112 = vmatprep.mubr.f32.mxu0 %v2980_v9  ;;  %v1448_v18 = vpop.f32.mrf.mxu0  ;;  %v2995_v9 = vld [vmem:[%s3312_s19 + $0x320] sm:$0xff] }
 0x202   : > { %v1609_v30 = vpop.f32.mrf.mxu1  ;;  %2268 = vmatmul.mubr.f32.gmra.mxu1 %v2981_v31  ;;  %2397 = vst [vmem:[#allocation2 + $0x188] sm:$0xff] %v2333_v7  ;;  %v1608_v20 = vadd.f32 %v1607_v6, %v1447_v8  ;;  %v1449_v42 = vadd.f32 %v1448_v18, %v1288_v26  ;;  %v353_v8 = vld [vmem:[#allocation2] sm:$0xff]  ;;  %v2996_v18 = vld [vmem:[%s3312_s19 + $0x368] sm:$0xff] }
 0x203   : > { %2273 = vmatprep.mubr.f32.mxu1 %v2982_v43 }
 0x204   : > { %2113 = vmatmul.mubr.f32.gmra.mxu0 %v2983_v0  ;;  %v2336_v1 = vadd.f32 %v1608_v20, %v344_v17  ;;  %v1610_v40 = vadd.f32 %v1609_v30, %v1449_v42  ;;  %v2997_v20 = vld [vmem:[%s3312_s19 + $0x330] sm:$0xff]  ;;  %v356_v0 = vld [vmem:[#allocation2 + $0x148] sm:$0xff] }
 0x205   : > { %2118 = vmatprep.mubr.f32.mxu0 %v2984_v10  ;;  %v1452_v11 = vpop.f32.mrf.mxu0  ;;  %v2999_v10 = vld [vmem:[%s3312_s19 + $0x360] sm:$0xff] }
 0x206   : > { %v1613_v34 = vpop.f32.mrf.mxu1  ;;  %2274 = vmatmul.mubr.f32.gmra.mxu1 %v2985_v35  ;;  %2400 = vst [vmem:[#allocation2 + $0x80] sm:$0xff] %v2336_v1  ;;  %v2337_v36 = vadd.f32 %v1610_v40, %v345_v33  ;;  %v1453_v37 = vadd.f32 %v1452_v11, %v4028_v60  ;;  %v2998_v33 = vld [vmem:[%s3312_s19 + $0x378] sm:$0xff]  ;;  %v357_v35 = vld [vmem:[#allocation2 + $0x1d0] sm:$0xff] }
 0x207   : > { %2279 = vmatprep.mubr.f32.mxu1 %v2986_v39  ;;  %v1454_v44 = vpop.f32.mrf.mxu0  ;;  %v3002_v39 = vld [vmem:[%s3312_s19 + $0x3b8] sm:$0xff] }
 0x208   : > { %v1615_v14 = vpop.f32.mrf.mxu1  ;;  %2119 = vmatmul.mubr.f32.gmra.mxu0 %v2987_v15  ;;  %2401 = vst [vmem:[#allocation2 + $0x1a8] sm:$0xff] %v2337_v36  ;;  %v1614_v49 = vadd.f32 %v1613_v34, %v1453_v37  ;;  %v1455_v63 = vadd.f32 %v1454_v44, %v1294_v62  ;;  %v3000_v62 = vld [vmem:[%s3312_s19 + $0x3a8] sm:$0xff]  ;;  %v3001_v36 = vld [vmem:[%s3312_s19 + $0x370] sm:$0xff] }
 0x209   : > { %2124 = vmatprep.mubr.f32.mxu0 %v2988_v2 }
 0x20a   : > { %2280 = vmatmul.mubr.f32.gmra.mxu1 %v2989_v54  ;;  %v2340_v47 = vadd.f32 %v1614_v49, %v348_v41  ;;  %v1616_v60 = vadd.f32 %v1615_v14, %v1455_v63  ;;  %v3003_v14 = vld [vmem:[%s3312_s19 + $0x3a0] sm:$0xff]  ;;  %v3004_v49 = vld [vmem:[%s3312_s19 + $0x3e8] sm:$0xff]  ;;  %v3005_v54 = vld [vmem:[%s3312_s19 + $0x3b0] sm:$0xff] }
 0x20b   : > { %2285 = vmatprep.mubr.f32.mxu1 %v2990_v48  ;;  %v1458_v21 = vpop.f32.mrf.mxu0  ;;  %v360_v63 = vld [vmem:[#allocation2 + $0x40] sm:$0xff]  ;;  %v3006_v48 = vld [vmem:[%s3312_s19 + $0x3f8] sm:$0xff] }
 0x20c   : > { %v1619_v22 = vpop.f32.mrf.mxu1  ;;  %2125 = vmatmul.mubr.f32.gmra.mxu0 %v2991_v59  ;;  %2404 = vst [vmem:[#allocation2 + $0x1e8] sm:$0xff] %v2340_v47  ;;  %v2341_v3 = vadd.f32 %v1616_v60, %v349_v53  ;;  %v1459_v19 = vadd.f32 %v1458_v21, %v4046_v23  ;;  %v361_v21 = vld [vmem:[#allocation2 + $0x1f8] sm:$0xff] }
 0x20d   : > { %2130 = vmatprep.mubr.f32.mxu0 %v2992_v45  ;;  %v1460_v6 = vpop.f32.mrf.mxu0 }
 0x20e   : > { %v1621_v26 = vpop.f32.mrf.mxu1  ;;  %2286 = vmatmul.mubr.f32.gmra.mxu1 %v2993_v27  ;;  %2405 = vst [vmem:[#allocation2 + $0xf8] sm:$0xff] %v2341_v3  ;;  %v1620_v7 = vadd.f32 %v1619_v22, %v1459_v19  ;;  %v1461_v25 = vadd.f32 %v1460_v6, %v1300_v57  ;;  %v3007_v22 = vld [vmem:[%s3312_s19 + $0x3e0] sm:$0xff]  ;;  %v3008_v19 = vld [vmem:[%s3312_s19 + $0x3f0] sm:$0xff] }
 0x20f   : > { %2291 = vmatprep.mubr.f32.mxu1 %v2994_v28  ;;  %v364_v6 = vld [vmem:[#allocation2 + $0x1a0] sm:$0xff] }
 0x210   : > { %2131 = vmatmul.mubr.f32.gmra.mxu0 %v2995_v9  ;;  %v2344_v17 = vadd.f32 %v1620_v7, %v352_v5  ;;  %v1622_v23 = vadd.f32 %v1621_v26, %v1461_v25  ;;  %v365_v25 = vld [vmem:[#allocation2 + $0x1f0] sm:$0xff] }
 0x211   : > { %2136 = vmatprep.mubr.f32.mxu0 %v2996_v18  ;;  %v1464_v30 = vpop.f32.mrf.mxu0 }
 0x212   : > { %v1625_v31 = vpop.f32.mrf.mxu1  ;;  %2292 = vmatmul.mubr.f32.gmra.mxu1 %v2997_v20  ;;  %2408 = vst [vmem:[#allocation2 + $0x1e0] sm:$0xff] %v2344_v17  ;;  %v2345_v42 = vadd.f32 %v1622_v23, %v353_v8  ;;  %v1465_v43 = vadd.f32 %v1464_v30, %v4064_v50  ;;  %v368_v30 = vld [vmem:[#allocation2 + $0x70] sm:$0xff] }
 0x213   : > { %2297 = vmatprep.mubr.f32.mxu1 %v2998_v33  ;;  %v1466_v1 = vpop.f32.mrf.mxu0 }
 0x214   : > { %v1627_v40 = vpop.f32.mrf.mxu1  ;;  %2137 = vmatmul.mubr.f32.gmra.mxu0 %v2999_v10  ;;  %2409 = vst [vmem:[#allocation2] sm:$0xff] %v2345_v42  ;;  %v1626_v11 = vadd.f32 %v1625_v31, %v1465_v43  ;;  %v1467_v34 = vadd.f32 %v1466_v1, %v4069_v56  ;;  %v369_v43 = vld [vmem:[#allocation2 + $0x90] sm:$0xff] }
 0x215   : > { %2142 = vmatprep.mubr.f32.mxu0 %v3000_v62 }
 0x216   : > { %2298 = vmatmul.mubr.f32.gmra.mxu1 %v3001_v36  ;;  %v2348_v50 = vadd.f32 %v1626_v11, %v356_v0  ;;  %v1628_v37 = vadd.f32 %v1627_v40, %v1467_v34  ;;  %v372_v11 = vld [vmem:[#allocation2 + $0xb8] sm:$0xff]  ;;  %v373_v36 = vld [vmem:[#allocation2 + $0x88] sm:$0xff] }
 0x217   : > { %2303 = vmatprep.mubr.f32.mxu1 %v3002_v39  ;;  %v1470_v41 = vpop.f32.mrf.mxu0 }
 0x218   : > { %v1631_v44 = vpop.f32.mrf.mxu1  ;;  %2143 = vmatmul.mubr.f32.gmra.mxu0 %v3003_v14  ;;  %2412 = vst [vmem:[#allocation2 + $0x148] sm:$0xff] %v2348_v50  ;;  %v2349_v15 = vadd.f32 %v1628_v37, %v357_v35  ;;  %v1471_v56 = vadd.f32 %v1470_v41, %v4080_v12  ;;  %v376_v14 = vld [vmem:[#allocation2 + $0x170] sm:$0xff] }
 0x219   : > { %2148 = vmatprep.mubr.f32.mxu0 %v3004_v49  ;;  %v1472_v2 = vpop.f32.mrf.mxu0 }
 0x21a   : > { %v1633_v53 = vpop.f32.mrf.mxu1  ;;  %2304 = vmatmul.mubr.f32.gmra.mxu1 %v3005_v54  ;;  %2413 = vst [vmem:[#allocation2 + $0x1d0] sm:$0xff] %v2349_v15  ;;  %v1632_v47 = vadd.f32 %v1631_v44, %v1471_v56  ;;  %v1473_v60 = vadd.f32 %v1472_v2, %v4085_v24 }
 0x21b   : > { %2309 = vmatprep.mubr.f32.mxu1 %v3006_v48  ;;  %v380_v48 = vld [vmem:[#allocation2 + $0x198] sm:$0xff] }
 0x21c   : > { %2149 = vmatmul.mubr.f32.gmra.mxu0 %v3007_v22  ;;  %v2352_v57 = vadd.f32 %v1632_v47, %v360_v63  ;;  %v1634_v59 = vadd.f32 %v1633_v53, %v1473_v60  ;;  %v377_v63 = vld [vmem:[#allocation2 + $0x178] sm:$0xff] }
 0x21d   : > { %v1476_v12 = vpop.f32.mrf.mxu0 }
 0x21e   : > { %v1637_v3 = vpop.f32.mrf.mxu1  ;;  %2310 = vmatmul.mubr.f32.gmra.mxu1 %v3008_v19  ;;  %2416 = vst [vmem:[#allocation2 + $0x40] sm:$0xff] %v2352_v57  ;;  %v2353_v45 = vadd.f32 %v1634_v59, %v361_v21  ;;  %v1477_v5 = vadd.f32 %v1476_v12, %v4096_v46  ;;  %v381_v59 = vld [vmem:[#allocation2 + $0x38] sm:$0xff] }
 0x21f   : > { %v1478_v26 = vpop.f32.mrf.mxu0 }
 0x220   : > { %v1639_v27 = vpop.f32.mrf.mxu1  ;;  %2417 = vst [vmem:[#allocation2 + $0x1f8] sm:$0xff] %v2353_v45  ;;  %v1638_v24 = vadd.f32 %v1637_v3, %v1477_v5  ;;  %v1479_v7 = vadd.f32 %v1478_v26, %v4101_v55 }
 0x222   : > { %v2356_v28 = vadd.f32 %v1638_v24, %v364_v6  ;;  %v1640_v8 = vadd.f32 %v1639_v27, %v1479_v7  ;;  %v384_v6 = vld [vmem:[#allocation2 + $0x158] sm:$0xff]  ;;  %v385_v7 = vld [vmem:[#allocation2 + $0x10] sm:$0xff] }
 0x223   : > { %v1482_v9 = vpop.f32.mrf.mxu0 }
 0x224   : > { %v1643_v17 = vpop.f32.mrf.mxu1  ;;  %2420 = vst [vmem:[#allocation2 + $0x1a0] sm:$0xff] %v2356_v28  ;;  %v2357_v23 = vadd.f32 %v1640_v8, %v365_v25  ;;  %v1483_v18 = vadd.f32 %v1482_v9, %v4112_v13 }
 0x225   : > { %v1484_v31 = vpop.f32.mrf.mxu0 }
 0x226   : > { %v1645_v20 = vpop.f32.mrf.mxu1  ;;  %2421 = vst [vmem:[#allocation2 + $0x1f0] sm:$0xff] %v2357_v23  ;;  %v1644_v46 = vadd.f32 %v1643_v17, %v1483_v18  ;;  %v1485_v42 = vadd.f32 %v1484_v31, %v4117_v32 }
 0x228   : > { %v2360_v33 = vadd.f32 %v1644_v46, %v368_v30  ;;  %v1646_v0 = vadd.f32 %v1645_v20, %v1485_v42 }
 0x229   : > { %v1488_v55 = vpop.f32.mrf.mxu0 }
 0x22a   : > { %v1649_v1 = vpop.f32.mrf.mxu1  ;;  %2424 = vst [vmem:[#allocation2 + $0x70] sm:$0xff] %v2360_v33  ;;  %v2361_v40 = vadd.f32 %v1646_v0, %v369_v43  ;;  %v1489_v10 = vadd.f32 %v1488_v55, %v4128_v52 }
 0x22b   : > { %v1490_v34 = vpop.f32.mrf.mxu0 }
 0x22c   : > { %v1651_v62 = vpop.f32.mrf.mxu1  ;;  %2425 = vst [vmem:[#allocation2 + $0x90] sm:$0xff] %v2361_v40  ;;  %v1650_v13 = vadd.f32 %v1649_v1, %v1489_v10  ;;  %v1491_v35 = vadd.f32 %v1490_v34, %v4133_v61 }
 0x22e   : > { %v2364_v50 = vadd.f32 %v1650_v13, %v372_v11  ;;  %v1652_v37 = vadd.f32 %v1651_v62, %v1491_v35 }
 0x22f   : > { %v1494_v32 = vpop.f32.mrf.mxu0 }
 0x230   : > { %v1655_v39 = vpop.f32.mrf.mxu1  ;;  %2428 = vst [vmem:[#allocation2 + $0xb8] sm:$0xff] %v2364_v50  ;;  %v2365_v41 = vadd.f32 %v1652_v37, %v373_v36  ;;  %v1495_v44 = vadd.f32 %v1494_v32, %v4144_v29 }
 0x231   : > { %v1496_v15 = vpop.f32.mrf.mxu0 }
 0x232   : > { %v1657_v56 = vpop.f32.mrf.mxu1  ;;  %2429 = vst [vmem:[#allocation2 + $0x88] sm:$0xff] %v2365_v41  ;;  %v1656_v52 = vadd.f32 %v1655_v39, %v1495_v44  ;;  %v1497_v49 = vadd.f32 %v1496_v15, %v4149_v38 }
 0x234   : > { %v2368_v2 = vadd.f32 %v1656_v52, %v376_v14  ;;  %v1658_v53 = vadd.f32 %v1657_v56, %v1497_v49 }
 0x235   : > { %v1500_v61 = vpop.f32.mrf.mxu0 }
 0x236   : > { %v1661_v54 = vpop.f32.mrf.mxu1  ;;  %2432 = vst [vmem:[#allocation2 + $0x170] sm:$0xff] %v2368_v2  ;;  %v2369_v47 = vadd.f32 %v1658_v53, %v377_v63  ;;  %v1501_v60 = vadd.f32 %v1500_v61, %v4160_v4 }
 0x237   : > { %v1502_v21 = vpop.f32.mrf.mxu0 }
 0x238   : > { %v1663_v22 = vpop.f32.mrf.mxu1  ;;  %2433 = vst [vmem:[#allocation2 + $0x178] sm:$0xff] %v2369_v47  ;;  %v1662_v29 = vadd.f32 %v1661_v54, %v1501_v60  ;;  %v1503_v57 = vadd.f32 %v1502_v21, %v4165_v16 }
 0x23a   : > { %v2372_v12 = vadd.f32 %v1662_v29, %v380_v48  ;;  %v1664_v3 = vadd.f32 %v1663_v22, %v1503_v57 }
 0x23b   : > { %v1506_v38 = vpop.f32.mrf.mxu0 }
 0x23c   : > { %v1667_v19 = vpop.f32.mrf.mxu1  ;;  %2436 = vst [vmem:[#allocation2 + $0x198] sm:$0xff] %v2372_v12  ;;  %v2373_v45 = vadd.f32 %v1664_v3, %v381_v59  ;;  %v1507_v5 = vadd.f32 %v1506_v38, %v4177_v51 }
 0x23d   : > { %v1508_v26 = vpop.f32.mrf.mxu0 }
 0x23e   : > { %v1669_v27 = vpop.f32.mrf.mxu1  ;;  %2437 = vst [vmem:[#allocation2 + $0x38] sm:$0xff] %v2373_v45  ;;  %v1668_v4 = vadd.f32 %v1667_v19, %v1507_v5  ;;  %v1509_v24 = vadd.f32 %v1508_v26, %v4180_v58 }
 0x240   : > { %v2376_v25 = vadd.f32 %v1668_v4, %v384_v6  ;;  %v1670_v28 = vadd.f32 %v1669_v27, %v1509_v24 }
 0x241   : > { %v4288_v16 = vpop.f32.mrf.mxu0 }
 0x242   : > { %v4290_v8 = vpop.f32.mrf.mxu1  ;;  %2440 = vst [vmem:[#allocation2 + $0x158] sm:$0xff] %v2376_v25  ;;  %v2377_v9 = vadd.f32 %v1670_v28, %v385_v7 }
 0x243   : > { %v4292_v17 = vpop.f32.mrf.mxu0 }
 0x244   : > { %v4294_v23 = vpop.f32.mrf.mxu1  ;;  %2441 = vst [vmem:[#allocation2 + $0x10] sm:$0xff] %v2377_v9 }
 0x247   : > { %v4296_v51 = vpop.f32.mrf.mxu0  ;;  %v4298_v18 = vpop.f32.mrf.mxu1 }
 0x249   : > { %v4300_v30 = vpop.f32.mrf.mxu0  ;;  %v4302_v58 = vpop.f32.mrf.mxu1 }
 0x24d   : > { %v4304_v31 = vpop.f32.mrf.mxu0  ;;  %v4306_v20 = vpop.f32.mrf.mxu1 }
 0x24f   : > { %v4308_v46 = vpop.f32.mrf.mxu0  ;;  %v4310_v42 = vpop.f32.mrf.mxu1 }
 0x253   : > { %v4312_v43 = vpop.f32.mrf.mxu0  ;;  %v4314_v33 = vpop.f32.mrf.mxu1 }
 0x255   : > { %v4316_v0 = vpop.f32.mrf.mxu0  ;;  %v4318_v55 = vpop.f32.mrf.mxu1 }
 0x259   : > { %v4320_v1 = vpop.f32.mrf.mxu0  ;;  %v4322_v40 = vpop.f32.mrf.mxu1 }
 0x25b   : > { %v4324_v10 = vpop.f32.mrf.mxu0  ;;  %v4326_v11 = vpop.f32.mrf.mxu1 }
 0x25f   : > { %v4328_v34 = vpop.f32.mrf.mxu0  ;;  %v4330_v62 = vpop.f32.mrf.mxu1 }
 0x261   : > { %v4332_v13 = vpop.f32.mrf.mxu0  ;;  %v4334_v35 = vpop.f32.mrf.mxu1 }
 0x265   : > { %v4336_v36 = vpop.f32.mrf.mxu0  ;;  %v4338_v50 = vpop.f32.mrf.mxu1 }
 0x267   : > { %v4340_v37 = vpop.f32.mrf.mxu0  ;;  %v4342_v32 = vpop.f32.mrf.mxu1 }
 0x26b   : > { %v4344_v39 = vpop.f32.mrf.mxu0  ;;  %v4346_v41 = vpop.f32.mrf.mxu1 }
 0x26d   : > { %v4348_v44 = vpop.f32.mrf.mxu0  ;;  %v4350_v14 = vpop.f32.mrf.mxu1 }
 0x271   : > { %v4352_v15 = vpop.f32.mrf.mxu0  ;;  %v4354_v56 = vpop.f32.mrf.mxu1 }
 0x273   : > { %v4356_v52 = vpop.f32.mrf.mxu0  ;;  %v4358_v49 = vpop.f32.mrf.mxu1 }
 0x277   : > { %v4360_v63 = vpop.f32.mrf.mxu0  ;;  %v4362_v2 = vpop.f32.mrf.mxu1 }
 0x279   : > { %v4364_v53 = vpop.f32.mrf.mxu0  ;;  %v4366_v61 = vpop.f32.mrf.mxu1 }
 0x27d   : > { %v4368_v54 = vpop.f32.mrf.mxu0  ;;  %v4370_v47 = vpop.f32.mrf.mxu1 }
 0x27f   : > { %v4372_v60 = vpop.f32.mrf.mxu0  ;;  %v4374_v48 = vpop.f32.mrf.mxu1 }
 0x283   : > { %v4376_v21 = vpop.f32.mrf.mxu0  ;;  %v4378_v22 = vpop.f32.mrf.mxu1 }
 0x285   : > { %v4380_v29 = vpop.f32.mrf.mxu0  ;;  %v4382_v57 = vpop.f32.mrf.mxu1 }
 0x289   : > { %v4384_v59 = vpop.f32.mrf.mxu0  ;;  %v4386_v12 = vpop.f32.mrf.mxu1 }
 0x28a   : > { %4600 = vst [vmem:[#allocation15_spill] sm:$0xff] %v4384_v59  ;;  %4601 = vst [vmem:[#allocation16_spill] sm:$0xff] %v4386_v12  ;;  %v330_v59 = vld [vmem:[#allocation2 + $0x130] sm:$0xff] }
 0x28b   : > { %v4388_v3 = vpop.f32.mrf.mxu0  ;;  %v4390_v38 = vpop.f32.mrf.mxu1 }
 0x28c   : > { %4602 = vst [vmem:[#allocation17_spill] sm:$0xff] %v4388_v3  ;;  %4603 = vst [vmem:[#allocation18_spill] sm:$0xff] %v4390_v38  ;;  %v327_v38 = vld [vmem:[#allocation2 + $0x18] sm:$0xff] }
 0x28f   : > { %v4392_v19 = vpop.f32.mrf.mxu0  ;;  %v4394_v45 = vpop.f32.mrf.mxu1 }
 0x290   : > { %4604 = vst [vmem:[#allocation19_spill] sm:$0xff] %v4392_v19  ;;  %4605 = vst [vmem:[#allocation20_spill] sm:$0xff] %v4394_v45  ;;  %v326_v45 = vld [vmem:[#allocation2 + $0xd8] sm:$0xff] }
 0x291   : > { %v4396_v5 = vpop.f32.mrf.mxu0  ;;  %v4398_v6 = vpop.f32.mrf.mxu1 }
 0x292   : > { %4606 = vst [vmem:[#allocation21_spill] sm:$0xff] %v4396_v5  ;;  %4607 = vst [vmem:[#allocation22_spill] sm:$0xff] %v4398_v6  ;;  %v1900_v5 = vadd.f32 %v4290_v8, %v4288_v16 }
 0x295   : > { %v4400_v26 = vpop.f32.mrf.mxu0  ;;  %v4402_v27 = vpop.f32.mrf.mxu1 }
 0x296   : > { %4608 = vst [vmem:[#allocation23_spill] sm:$0xff] %v4400_v26  ;;  %4609 = vst [vmem:[#allocation24_spill] sm:$0xff] %v4402_v27  ;;  %v1902_v26 = vadd.f32 %v4294_v23, %v4292_v17 }
 0x297   : > { %v4404_v4 = vpop.f32.mrf.mxu0  ;;  %v4406_v24 = vpop.f32.mrf.mxu1 }
 0x298   : > { %4610 = vst [vmem:[#allocation25_spill] sm:$0xff] %v4404_v4  ;;  %4611 = vst [vmem:[#allocation26_spill] sm:$0xff] %v4406_v24 }
 0x29b   : > { %v4408_v7 = vpop.f32.mrf.mxu0  ;;  %v4410_v25 = vpop.f32.mrf.mxu1 }
 0x29c   : > { %4612 = vst [vmem:[#allocation27_spill] sm:$0xff] %v4408_v7  ;;  %4613 = vst [vmem:[#allocation28_spill] sm:$0xff] %v4410_v25  ;;  %v1906_v7 = vadd.f32 %v4298_v18, %v4296_v51 }
 0x29d   : > { %v4412_v28 = vpop.f32.mrf.mxu0  ;;  %v4414_v9 = vpop.f32.mrf.mxu1 }
 0x29e   : > { %4614 = vst [vmem:[#allocation29_spill] sm:$0xff] %v4412_v28  ;;  %4615 = vst [vmem:[#allocation30_spill] sm:$0xff] %v4414_v9  ;;  %v1908_v9 = vadd.f32 %v4302_v58, %v4300_v30 }
 0x2a0   : > { %v2060_v6 = vpop.f32.mrf.mxu0 }
 0x2a1   : > { %v2061_v27 = vadd.f32 %v2060_v6, %v1900_v5  ;;  %v1912_v5 = vadd.f32 %v4306_v20, %v4304_v31  ;;  %v1918_v31 = vadd.f32 %v4314_v33, %v4312_v43  ;;  %v1924_v43 = vadd.f32 %v4322_v40, %v4320_v1 }
 0x2a2   : > { %v2221_v4 = vpop.f32.mrf.mxu1  ;;  %v2062_v19 = vpop.f32.mrf.mxu0  ;;  %v1930_v1 = vadd.f32 %v4330_v62, %v4328_v34  ;;  %v1936_v34 = vadd.f32 %v4338_v50, %v4336_v36  ;;  %v1942_v36 = vadd.f32 %v4346_v41, %v4344_v39  ;;  %v1948_v39 = vadd.f32 %v4354_v56, %v4352_v15 }
 0x2a3   : > { %v2222_v24 = vadd.f32 %v2221_v4, %v2061_v27  ;;  %v2063_v25 = vadd.f32 %v2062_v19, %v1902_v26  ;;  %v331_v19 = vld [vmem:[#allocation2 + $0x48] sm:$0xff]  ;;  %v1914_v4 = vadd.f32 %v4310_v42, %v4308_v46  ;;  %v1920_v46 = vadd.f32 %v4318_v55, %v4316_v0 }
 0x2a4   : > { %v2223_v28 = vpop.f32.mrf.mxu1  ;;  %v2066_v3 = vpop.f32.mrf.mxu0  ;;  %v1926_v0 = vadd.f32 %v4326_v11, %v4324_v10  ;;  %v1932_v10 = vadd.f32 %v4334_v35, %v4332_v13  ;;  %v1938_v13 = vadd.f32 %v4342_v32, %v4340_v37  ;;  %v1944_v37 = vadd.f32 %v4350_v14, %v4348_v44 }
 0x2a5   : > { %v2318_v16 = vadd.f32 %v2222_v24, %v326_v45  ;;  %v2224_v8 = vadd.f32 %v2223_v28, %v2063_v25  ;;  %v2067_v12 = vadd.f32 %v2066_v3, %v1906_v7  ;;  %v334_v45 = vld [vmem:[#allocation2 + $0x118] sm:$0xff]  ;;  %v1950_v44 = vadd.f32 %v4358_v49, %v4356_v52 }
 0x2a6   : > { %v2227_v17 = vpop.f32.mrf.mxu1  ;;  %v2068_v23 = vpop.f32.mrf.mxu0  ;;  %v335_v25 = vld [vmem:[#allocation2 + $0x98] sm:$0xff]  ;;  %v1954_v15 = vadd.f32 %v4362_v2, %v4360_v63  ;;  %v1956_v52 = vadd.f32 %v4366_v61, %v4364_v53  ;;  %v1960_v63 = vadd.f32 %v4370_v47, %v4368_v54  ;;  %v1962_v53 = vadd.f32 %v4374_v48, %v4372_v60 }
 0x2a7   : > { %2382 = vst [vmem:[#allocation2 + $0xd8] sm:$0xff] %v2318_v16  ;;  %v2319_v6 = vadd.f32 %v2224_v8, %v327_v38  ;;  %v2228_v51 = vadd.f32 %v2227_v17, %v2067_v12  ;;  %v2069_v18 = vadd.f32 %v2068_v23, %v1908_v9  ;;  %v338_v8 = vld [vmem:[#allocation2 + $0x108] sm:$0xff]  ;;  %v1966_v54 = vadd.f32 %v4378_v22, %v4376_v21 }
 0x2a8   : > { %v2229_v26 = vpop.f32.mrf.mxu1  ;;  %v2072_v27 = vpop.f32.mrf.mxu0  ;;  %v1968_v60 = vadd.f32 %v4382_v57, %v4380_v29 }
 0x2a9   : > { %2383 = vst [vmem:[#allocation2 + $0x18] sm:$0xff] %v2319_v6  ;;  %v2322_v30 = vadd.f32 %v2228_v51, %v330_v59  ;;  %v2230_v58 = vadd.f32 %v2229_v26, %v2069_v18  ;;  %v2073_v3 = vadd.f32 %v2072_v27, %v1912_v5  ;;  %v339_v51 = vld [vmem:[#allocation2 + $0x60] sm:$0xff] }
 0x2aa   : > { %v2233_v24 = vpop.f32.mrf.mxu1  ;;  %v2074_v7 = vpop.f32.mrf.mxu0 }
 0x2ab   : > { %2386 = vst [vmem:[#allocation2 + $0x130] sm:$0xff] %v2322_v30  ;;  %v2323_v20 = vadd.f32 %v2230_v58, %v331_v19  ;;  %v2234_v12 = vadd.f32 %v2233_v24, %v2073_v3  ;;  %v2075_v38 = vadd.f32 %v2074_v7, %v1914_v4  ;;  %v342_v4 = vld [vmem:[#allocation2 + $0x138] sm:$0xff]  ;;  %v343_v24 = vld [vmem:[#allocation2 + $0x140] sm:$0xff] }
 0x2ac   : > { %v2235_v28 = vpop.f32.mrf.mxu1  ;;  %v2078_v9 = vpop.f32.mrf.mxu0 }
 0x2ad   : > { %2387 = vst [vmem:[#allocation2 + $0x48] sm:$0xff] %v2323_v20  ;;  %v2326_v42 = vadd.f32 %v2234_v12, %v334_v45  ;;  %v2236_v59 = vadd.f32 %v2235_v28, %v2075_v38  ;;  %v2079_v16 = vadd.f32 %v2078_v9, %v1918_v31  ;;  %v346_v38 = vld [vmem:[#allocation2 + $0x1b8] sm:$0xff] }
 0x2ae   : > { %v2239_v17 = vpop.f32.mrf.mxu1  ;;  %v2080_v23 = vpop.f32.mrf.mxu0 }
 0x2af   : > { %2390 = vst [vmem:[#allocation2 + $0x118] sm:$0xff] %v2326_v42  ;;  %v2327_v33 = vadd.f32 %v2236_v59, %v335_v25  ;;  %v2240_v5 = vadd.f32 %v2239_v17, %v2079_v16  ;;  %v2081_v6 = vadd.f32 %v2080_v23, %v1920_v46  ;;  %v347_v42 = vld [vmem:[#allocation2 + $0x28] sm:$0xff]  ;;  %v350_v23 = vld [vmem:[#allocation2 + $0x160] sm:$0xff] }
 0x2b0   : > { %v2241_v18 = vpop.f32.mrf.mxu1  ;;  %v2084_v19 = vpop.f32.mrf.mxu0 }
 0x2b1   : > { %2391 = vst [vmem:[#allocation2 + $0x98] sm:$0xff] %v2327_v33  ;;  %v2330_v55 = vadd.f32 %v2240_v5, %v338_v8  ;;  %v2242_v26 = vadd.f32 %v2241_v18, %v2081_v6  ;;  %v2085_v27 = vadd.f32 %v2084_v19, %v1924_v43 }
 0x2b2   : > { %v2245_v30 = vpop.f32.mrf.mxu1  ;;  %v2086_v58 = vpop.f32.mrf.mxu0 }
 0x2b3   : > { %2394 = vst [vmem:[#allocation2 + $0x108] sm:$0xff] %v2330_v55  ;;  %v2331_v40 = vadd.f32 %v2242_v26, %v339_v51  ;;  %v2246_v3 = vadd.f32 %v2245_v30, %v2085_v27  ;;  %v2087_v45 = vadd.f32 %v2086_v58, %v1926_v0  ;;  %v351_v51 = vld [vmem:[#allocation2 + $0x30] sm:$0xff] }
 0x2b4   : > { %v2247_v7 = vpop.f32.mrf.mxu1  ;;  %v2090_v31 = vpop.f32.mrf.mxu0  ;;  %v354_v26 = vld [vmem:[#allocation2 + $0xf0] sm:$0xff] }
 0x2b5   : > { %2395 = vst [vmem:[#allocation2 + $0x60] sm:$0xff] %v2331_v40  ;;  %v2334_v11 = vadd.f32 %v2246_v3, %v342_v4  ;;  %v2248_v20 = vadd.f32 %v2247_v7, %v2087_v45  ;;  %v2091_v12 = vadd.f32 %v2090_v31, %v1930_v1  ;;  %v355_v1 = vld [vmem:[#allocation2 + $0x8] sm:$0xff]  ;;  %v358_v7 = vld [vmem:[#allocation2 + $0x100] sm:$0xff] }
 0x2b6   : > { %v2251_v25 = vpop.f32.mrf.mxu1  ;;  %v2092_v28 = vpop.f32.mrf.mxu0 }
 0x2b7   : > { %2398 = vst [vmem:[#allocation2 + $0x138] sm:$0xff] %v2334_v11  ;;  %v2335_v62 = vadd.f32 %v2248_v20, %v343_v24  ;;  %v2252_v9 = vadd.f32 %v2251_v25, %v2091_v12  ;;  %v2093_v46 = vadd.f32 %v2092_v28, %v1932_v10  ;;  %v359_v12 = vld [vmem:[#allocation2 + $0xc8] sm:$0xff] }
 0x2b8   : > { %v2253_v59 = vpop.f32.mrf.mxu1  ;;  %v2096_v16 = vpop.f32.mrf.mxu0 }
 0x2b9   : > { %2399 = vst [vmem:[#allocation2 + $0x140] sm:$0xff] %v2335_v62  ;;  %v2338_v35 = vadd.f32 %v2252_v9, %v346_v38  ;;  %v2254_v8 = vadd.f32 %v2253_v59, %v2093_v46  ;;  %v2097_v17 = vadd.f32 %v2096_v16, %v1936_v34  ;;  %v362_v62 = vld [vmem:[#allocation2 + $0x20] sm:$0xff]  ;;  %v363_v16 = vld [vmem:[#allocation2 + $0x128] sm:$0xff] }
 0x2ba   : > { %v2257_v43 = vpop.f32.mrf.mxu1  ;;  %v2098_v33 = vpop.f32.mrf.mxu0 }
 0x2bb   : > { %2402 = vst [vmem:[#allocation2 + $0x1b8] sm:$0xff] %v2338_v35  ;;  %v2339_v50 = vadd.f32 %v2254_v8, %v347_v42  ;;  %v2258_v5 = vadd.f32 %v2257_v43, %v2097_v17  ;;  %v2099_v6 = vadd.f32 %v2098_v33, %v1938_v13 }
 0x2bc   : > { %v2259_v18 = vpop.f32.mrf.mxu1  ;;  %v2102_v19 = vpop.f32.mrf.mxu0 }
 0x2bd   : > { %2403 = vst [vmem:[#allocation2 + $0x28] sm:$0xff] %v2339_v50  ;;  %v2342_v32 = vadd.f32 %v2258_v5, %v350_v23  ;;  %v2260_v0 = vadd.f32 %v2259_v18, %v2099_v6  ;;  %v2103_v55 = vadd.f32 %v2102_v19, %v1942_v36  ;;  %v366_v23 = vld [vmem:[#allocation2 + $0xe8] sm:$0xff]  ;;  %v367_v5 = vld [vmem:[#allocation2 + $0x78] sm:$0xff] }
 0x2be   : > { %v2263_v27 = vpop.f32.mrf.mxu1  ;;  %v2104_v4 = vpop.f32.mrf.mxu0 }
 0x2bf   : > { %2406 = vst [vmem:[#allocation2 + $0x160] sm:$0xff] %v2342_v32  ;;  %v2343_v41 = vadd.f32 %v2260_v0, %v351_v51  ;;  %v2264_v30 = vadd.f32 %v2263_v27, %v2103_v55  ;;  %v2105_v58 = vadd.f32 %v2104_v4, %v1944_v37  ;;  %v370_v37 = vld [vmem:[#allocation2 + $0x1d8] sm:$0xff]  ;;  %v4616_v55 = vld [vmem:[#allocation15_spill] sm:$0xff] }
 0x2c0   : > { %v2265_v40 = vpop.f32.mrf.mxu1  ;;  %v2108_v3 = vpop.f32.mrf.mxu0 }
 0x2c1   : > { %2407 = vst [vmem:[#allocation2 + $0x30] sm:$0xff] %v2343_v41  ;;  %v2346_v14 = vadd.f32 %v2264_v30, %v354_v26  ;;  %v2266_v45 = vadd.f32 %v2265_v40, %v2105_v58  ;;  %v2109_v24 = vadd.f32 %v2108_v3, %v1948_v39  ;;  %v4617_v26 = vld [vmem:[#allocation16_spill] sm:$0xff]  ;;  %v4618_v58 = vld [vmem:[#allocation17_spill] sm:$0xff] }
 0x2c2   : > { %v2269_v31 = vpop.f32.mrf.mxu1  ;;  %v2110_v10 = vpop.f32.mrf.mxu0  ;;  %v1972_v21 = vadd.f32 %v4617_v26, %v4616_v55  ;;  %v371_v39 = vld [vmem:[#allocation2 + $0xd0] sm:$0xff]  ;;  %v4631_v55 = vld [vmem:[#allocation30_spill] sm:$0xff] }
 0x2c3   : > { %2410 = vst [vmem:[#allocation2 + $0xf0] sm:$0xff] %v2346_v14  ;;  %v2347_v56 = vadd.f32 %v2266_v45, %v355_v1  ;;  %v2270_v11 = vadd.f32 %v2269_v31, %v2109_v24  ;;  %v2111_v20 = vadd.f32 %v2110_v10, %v1950_v44  ;;  %v4619_v1 = vld [vmem:[#allocation18_spill] sm:$0xff]  ;;  %v374_v44 = vld [vmem:[#allocation2 + $0xa8] sm:$0xff] }
 0x2c4   : > { %v2271_v38 = vpop.f32.mrf.mxu1  ;;  %v2114_v25 = vpop.f32.mrf.mxu0  ;;  %v1974_v29 = vadd.f32 %v4619_v1, %v4618_v58  ;;  %v4620_v24 = vld [vmem:[#allocation19_spill] sm:$0xff] }
 0x2c5   : > { %2411 = vst [vmem:[#allocation2 + $0x8] sm:$0xff] %v2347_v56  ;;  %v2350_v49 = vadd.f32 %v2270_v11, %v358_v7  ;;  %v2272_v28 = vadd.f32 %v2271_v38, %v2111_v20  ;;  %v2115_v34 = vadd.f32 %v2114_v25, %v1954_v15  ;;  %v4621_v7 = vld [vmem:[#allocation20_spill] sm:$0xff]  ;;  %v4622_v38 = vld [vmem:[#allocation21_spill] sm:$0xff]  ;;  %v4623_v25 = vld [vmem:[#allocation22_spill] sm:$0xff] }
 0x2c6   : > { %v2275_v9 = vpop.f32.mrf.mxu1  ;;  %v2116_v46 = vpop.f32.mrf.mxu0  ;;  %v1978_v31 = vadd.f32 %v4621_v7, %v4620_v24  ;;  %v375_v11 = vld [vmem:[#allocation2 + $0x1c8] sm:$0xff] }
 0x2c7   : > { %2414 = vst [vmem:[#allocation2 + $0x100] sm:$0xff] %v2350_v49  ;;  %v2351_v2 = vadd.f32 %v2272_v28, %v359_v12  ;;  %v2276_v42 = vadd.f32 %v2275_v9, %v2115_v34  ;;  %v2117_v59 = vadd.f32 %v2116_v46, %v1956_v52  ;;  %v1980_v52 = vadd.f32 %v4623_v25, %v4622_v38 }
 0x2c8   : > { %v2277_v13 = vpop.f32.mrf.mxu1  ;;  %v2120_v35 = vpop.f32.mrf.mxu0 }
 0x2c9   : > { %2415 = vst [vmem:[#allocation2 + $0xc8] sm:$0xff] %v2351_v2  ;;  %v2354_v61 = vadd.f32 %v2276_v42, %v362_v62  ;;  %v2278_v8 = vadd.f32 %v2277_v13, %v2117_v59  ;;  %v2121_v17 = vadd.f32 %v2120_v35, %v1960_v63  ;;  %v378_v62 = vld [vmem:[#allocation2 + $0x68] sm:$0xff]  ;;  %v379_v35 = vld [vmem:[#allocation2 + $0x190] sm:$0xff] }
 0x2ca   : > { %v2281_v43 = vpop.f32.mrf.mxu1  ;;  %v2122_v33 = vpop.f32.mrf.mxu0  ;;  %v4624_v63 = vld [vmem:[#allocation23_spill] sm:$0xff]  ;;  %v4625_v2 = vld [vmem:[#allocation24_spill] sm:$0xff] }
 0x2cb   : > { %2418 = vst [vmem:[#allocation2 + $0x20] sm:$0xff] %v2354_v61  ;;  %v2355_v47 = vadd.f32 %v2278_v8, %v363_v16  ;;  %v2282_v36 = vadd.f32 %v2281_v43, %v2121_v17  ;;  %v2123_v50 = vadd.f32 %v2122_v33, %v1962_v53  ;;  %v1984_v42 = vadd.f32 %v4625_v2, %v4624_v63  ;;  %v4626_v8 = vld [vmem:[#allocation25_spill] sm:$0xff]  ;;  %v4627_v17 = vld [vmem:[#allocation26_spill] sm:$0xff] }
 0x2cc   : > { %v2283_v6 = vpop.f32.mrf.mxu1  ;;  %v2126_v51 = vpop.f32.mrf.mxu0 }
 0x2cd   : > { %2419 = vst [vmem:[#allocation2 + $0x128] sm:$0xff] %v2355_v47  ;;  %v2358_v48 = vadd.f32 %v2282_v36, %v366_v23  ;;  %v2284_v18 = vadd.f32 %v2283_v6, %v2123_v50  ;;  %v2127_v19 = vadd.f32 %v2126_v51, %v1966_v54  ;;  %v1986_v23 = vadd.f32 %v4627_v17, %v4626_v8  ;;  %v382_v47 = vld [vmem:[#allocation2 + $0xc0] sm:$0xff]  ;;  %v4629_v6 = vld [vmem:[#allocation28_spill] sm:$0xff] }
 0x2ce   : > { %v2287_v32 = vpop.f32.mrf.mxu1  ;;  %v2128_v0 = vpop.f32.mrf.mxu0 }
 0x2cf   : > { %2422 = vst [vmem:[#allocation2 + $0xe8] sm:$0xff] %v2358_v48  ;;  %v2359_v22 = vadd.f32 %v2284_v18, %v367_v5  ;;  %v2288_v27 = vadd.f32 %v2287_v32, %v2127_v19  ;;  %v2129_v4 = vadd.f32 %v2128_v0, %v1968_v60  ;;  %v4628_v5 = vld [vmem:[#allocation27_spill] sm:$0xff]  ;;  %v4630_v0 = vld [vmem:[#allocation29_spill] sm:$0xff] }
 0x2d0   : > { %v2289_v41 = vpop.f32.mrf.mxu1  ;;  %v2132_v30 = vpop.f32.mrf.mxu0  ;;  %v1990_v51 = vadd.f32 %v4629_v6, %v4628_v5  ;;  %v383_v19 = vld [vmem:[#allocation2 + $0x1c0] sm:$0xff]  ;;  %v1992_v26 = vadd.f32 %v4631_v55, %v4630_v0 }
 0x2d1   : > { %2423 = vst [vmem:[#allocation2 + $0x78] sm:$0xff] %v2359_v22  ;;  %v2362_v57 = vadd.f32 %v2288_v27, %v370_v37  ;;  %v2290_v40 = vadd.f32 %v2289_v41, %v2129_v4  ;;  %v2133_v3 = vadd.f32 %v2132_v30, %v1972_v21  ;;  %v386_v4 = vld [vmem:[#allocation2 + $0x58] sm:$0xff] }
 0x2d2   : > { %v2293_v14 = vpop.f32.mrf.mxu1  ;;  %v2134_v45 = vpop.f32.mrf.mxu0 }
 0x2d3   : > { %2426 = vst [vmem:[#allocation2 + $0x1d8] sm:$0xff] %v2362_v57  ;;  %v2363_v10 = vadd.f32 %v2290_v40, %v371_v39  ;;  %v2294_v15 = vadd.f32 %v2293_v14, %v2133_v3  ;;  %v2135_v56 = vadd.f32 %v2134_v45, %v1974_v29  ;;  %v387_v29 = vld [vmem:[#allocation2 + $0xa0] sm:$0xff] }
 0x2d4   : > { %v2295_v20 = vpop.f32.mrf.mxu1  ;;  %v2138_v12 = vpop.f32.mrf.mxu0 }
 0x2d5   : > { %2427 = vst [vmem:[#allocation2 + $0xd0] sm:$0xff] %v2363_v10  ;;  %v2366_v49 = vadd.f32 %v2294_v15, %v374_v44  ;;  %v2296_v28 = vadd.f32 %v2295_v20, %v2135_v56  ;;  %v2139_v34 = vadd.f32 %v2138_v12, %v1978_v31 }
 0x2d6   : > { %v2299_v9 = vpop.f32.mrf.mxu1  ;;  %v2140_v46 = vpop.f32.mrf.mxu0 }
 0x2d7   : > { %2430 = vst [vmem:[#allocation2 + $0xa8] sm:$0xff] %v2366_v49  ;;  %v2367_v59 = vadd.f32 %v2296_v28, %v375_v11  ;;  %v2300_v16 = vadd.f32 %v2299_v9, %v2139_v34  ;;  %v2141_v13 = vadd.f32 %v2140_v46, %v1980_v52 }
 0x2d8   : > { %v2301_v53 = vpop.f32.mrf.mxu1  ;;  %v2144_v61 = vpop.f32.mrf.mxu0 }
 0x2d9   : > { %2431 = vst [vmem:[#allocation2 + $0x1c8] sm:$0xff] %v2367_v59  ;;  %v2370_v43 = vadd.f32 %v2300_v16, %v378_v62  ;;  %v2302_v33 = vadd.f32 %v2301_v53, %v2141_v13  ;;  %v2145_v54 = vadd.f32 %v2144_v61, %v1984_v42 }
 0x2da   : > { %v2305_v36 = vpop.f32.mrf.mxu1  ;;  %v2146_v50 = vpop.f32.mrf.mxu0 }
 0x2db   : > { %2434 = vst [vmem:[#allocation2 + $0x68] sm:$0xff] %v2370_v43  ;;  %v2371_v60 = vadd.f32 %v2302_v33, %v379_v35  ;;  %v2306_v48 = vadd.f32 %v2305_v36, %v2145_v54  ;;  %v2147_v18 = vadd.f32 %v2146_v50, %v1986_v23 }
 0x2dc   : > { %v2307_v37 = vpop.f32.mrf.mxu1  ;;  %v2150_v32 = vpop.f32.mrf.mxu0 }
 0x2dd   : > { %2435 = vst [vmem:[#allocation2 + $0x190] sm:$0xff] %v2371_v60  ;;  %v2374_v21 = vadd.f32 %v2306_v48, %v382_v47  ;;  %v2308_v22 = vadd.f32 %v2307_v37, %v2147_v18  ;;  %v2151_v27 = vadd.f32 %v2150_v32, %v1990_v51 }
 0x2de   : > { %v2311_v39 = vpop.f32.mrf.mxu1  ;;  %v2152_v41 = vpop.f32.mrf.mxu0 }
 0x2df   : > { %2438 = vst [vmem:[#allocation2 + $0xc0] sm:$0xff] %v2374_v21  ;;  %v2375_v30 = vadd.f32 %v2308_v22, %v383_v19  ;;  %v2312_v58 = vadd.f32 %v2311_v39, %v2151_v27  ;;  %v2153_v1 = vadd.f32 %v2152_v41, %v1992_v26 }
 0x2e0   : > { %v2313_v57 = vpop.f32.mrf.mxu1 }
 0x2e1   : > { %2439 = vst [vmem:[#allocation2 + $0x1c0] sm:$0xff] %v2375_v30  ;;  %v2378_v40 = vadd.f32 %v2312_v58, %v386_v4  ;;  %v2314_v3 = vadd.f32 %v2313_v57, %v2153_v1  ;;  %2447 = sbr.rel (%p2787_p3) target bundleno = 784 (0x310), region = 52 }
 0x2e3   : > { %2442 = vst [vmem:[#allocation2 + $0x58] sm:$0xff] %v2378_v40  ;;  %v2379_v44 = vadd.f32 %v2314_v3, %v387_v29 }
 0x2e5   : > { %2443 = vst [vmem:[#allocation2 + $0xa0] sm:$0xff] %v2379_v44 }
 0x2e6   : > { %v2514_v14 = vlaneseq  ;;  %v2512_v45 = vld [vmem:[#allocation8] sm:$0xf]  ;;  %v2448_v7 = vld [vmem:[#allocation2 + $0xb0] sm:$0xff]  ;;  %v2450_v10 = vld [vmem:[#allocation2 + $0xd8] sm:$0xff] }
 0x2e7   : > { %v2449_v31 = vld [vmem:[#allocation2 + $0x1b0] sm:$0xff]  ;;  %v2451_v15 = vld [vmem:[#allocation2 + $0x18] sm:$0xff]  ;;  %v2453_v25 = vld [vmem:[#allocation2 + $0x168] sm:$0xff] }
 0x2e8   : > { %v2515_v24 = vshrl.u32 %v2514_v14, 7  ;;  %v2452_v38 = vld [vmem:[#allocation2 + $0x50] sm:$0xff]  ;;  %v2455_v49 = vld [vmem:[#allocation2 + $0x48] sm:$0xff]  ;;  %v2456_v28 = vld [vmem:[#allocation2 + $0x180] sm:$0xff] }
 0x2e9   : > { %v2454_v52 = vld [vmem:[#allocation2 + $0x130] sm:$0xff]  ;;  %v2458_v62 = vld [vmem:[#allocation2 + $0x118] sm:$0xff]  ;;  %v2460_v59 = vld [vmem:[#allocation2 + $0x120] sm:$0xff] }
 0x2ea   : > { %v2516_v56 = vsub.s32 0, %v2515_v24  ;;  %v2520_v11 = vsub.s32 1, %v2515_v24  ;;  %v2524_v20 = vsub.s32 2, %v2515_v24  ;;  %v2528_v12 = vsub.s32 3, %v2515_v24  ;;  %v2457_v34 = vld [vmem:[#allocation2 + $0x110] sm:$0xff]  ;;  %v2459_v9 = vld [vmem:[#allocation2 + $0x98] sm:$0xff] }
 0x2eb   : > { %v2461_v16 = vld [vmem:[#allocation2 + $0x150] sm:$0xff]  ;;  %v2462_v13 = vld [vmem:[#allocation2 + $0x108] sm:$0xff]  ;;  %v2463_v35 = vld [vmem:[#allocation2 + $0x60] sm:$0xff] }
 0x2ec   : > { %v4481_v46 = vrot.slane %v2512_v45, %v2516_v56  ;;  %v4483_v63 = vrot.slane %v2512_v45, %v2520_v11  ;;  %v4485_v2 = vrot.slane %v2512_v45, %v2524_v20  ;;  %v4487_v42 = vrot.slane %v2512_v45, %v2528_v12  ;;  %v2464_v53 = vld [vmem:[#allocation2 + $0xe0] sm:$0xff]  ;;  %v2465_v61 = vld [vmem:[#allocation2 + $0x188] sm:$0xff]  ;;  %v2466_v8 = vld [vmem:[#allocation2 + $0x138] sm:$0xff] }
 0x2ed   : > { %v2467_v17 = vld [vmem:[#allocation2 + $0x140] sm:$0xff]  ;;  %v2469_v36 = vld [vmem:[#allocation2 + $0x1a8] sm:$0xff]  ;;  %v2470_v50 = vld [vmem:[#allocation2 + $0x1b8] sm:$0xff] }
 0x2ee   : > { %v2534_v23 = vadd.f32 %v4481_v46, %v2448_v7  ;;  %v2535_v43 = vadd.f32 %v4483_v63, %v2449_v31  ;;  %v2536_v33 = vadd.f32 %v4485_v2, %v2450_v10  ;;  %v2537_v54 = vadd.f32 %v4487_v42, %v2451_v15  ;;  %v2468_v47 = vld [vmem:[#allocation2 + $0x80] sm:$0xff]  ;;  %v2471_v5 = vld [vmem:[#allocation2 + $0x28] sm:$0xff]  ;;  %v2473_v19 = vld [vmem:[#allocation2 + $0xf8] sm:$0xff] }
 0x2ef   : > { %v2538_v6 = vadd.f32 %v4481_v46, %v2452_v38  ;;  %v2539_v51 = vadd.f32 %v4483_v63, %v2453_v25  ;;  %v2540_v60 = vadd.f32 %v4485_v2, %v2454_v52  ;;  %v2541_v48 = vadd.f32 %v4487_v42, %v2455_v49  ;;  %v2472_v18 = vld [vmem:[#allocation2 + $0x1e8] sm:$0xff]  ;;  %v2474_v37 = vld [vmem:[#allocation2 + $0x160] sm:$0xff]  ;;  %v2475_v32 = vld [vmem:[#allocation2 + $0x30] sm:$0xff] }
 0x2f0   : > { %2598 = vst [vmem:[#allocation9] sm:$0xff] %v2534_v23  ;;  %2599 = vst [vmem:[#allocation9 + $0x8] sm:$0xff] %v2535_v43  ;;  %v2542_v0 = vadd.f32 %v4481_v46, %v2456_v28  ;;  %v2543_v55 = vadd.f32 %v4483_v63, %v2457_v34  ;;  %v2544_v26 = vadd.f32 %v4485_v2, %v2458_v62  ;;  %v2476_v22 = vld [vmem:[#allocation2 + $0x1e0] sm:$0xff]  ;;  %v2478_v4 = vld [vmem:[#allocation2 + $0xf0] sm:$0xff] }
 0x2f1   : > { %2600 = vst [vmem:[#allocation9 + $0x10] sm:$0xff] %v2536_v33  ;;  %2601 = vst [vmem:[#allocation9 + $0x18] sm:$0xff] %v2537_v54  ;;  %v2545_v21 = vadd.f32 %v4487_v42, %v2459_v9  ;;  %v2477_v27 = vld [vmem:[#allocation2] sm:$0xff]  ;;  %v2546_v39 = vadd.f32 %v4481_v46, %v2460_v59  ;;  %v2547_v41 = vadd.f32 %v4483_v63, %v2461_v16  ;;  %v2479_v1 = vld [vmem:[#allocation2 + $0x8] sm:$0xff] }
 0x2f2   : > { %2602 = vst [vmem:[#allocation9 + $0x20] sm:$0xff] %v2538_v6  ;;  %2603 = vst [vmem:[#allocation9 + $0x28] sm:$0xff] %v2539_v51  ;;  %v2548_v30 = vadd.f32 %v4485_v2, %v2462_v13  ;;  %v2549_v58 = vadd.f32 %v4487_v42, %v2463_v35  ;;  %v2480_v29 = vld [vmem:[#allocation2 + $0x148] sm:$0xff]  ;;  %v2481_v57 = vld [vmem:[#allocation2 + $0x1d0] sm:$0xff]  ;;  %v2550_v40 = vadd.f32 %v4481_v46, %v2464_v53 }
 0x2f3   : > { %2604 = vst [vmem:[#allocation9 + $0x30] sm:$0xff] %v2540_v60  ;;  %2605 = vst [vmem:[#allocation9 + $0x38] sm:$0xff] %v2541_v48  ;;  %v2551_v3 = vadd.f32 %v4483_v63, %v2465_v61  ;;  %v2552_v44 = vadd.f32 %v4485_v2, %v2466_v8  ;;  %v2553_v14 = vadd.f32 %v4487_v42, %v2467_v17  ;;  %v2482_v45 = vld [vmem:[#allocation2 + $0x100] sm:$0xff]  ;;  %v2483_v24 = vld [vmem:[#allocation2 + $0xc8] sm:$0xff] }
 0x2f4   : > { %2606 = vst [vmem:[#allocation9 + $0x40] sm:$0xff] %v2542_v0  ;;  %2607 = vst [vmem:[#allocation9 + $0x48] sm:$0xff] %v2543_v55  ;;  %v2484_v7 = vld [vmem:[#allocation2 + $0x40] sm:$0xff]  ;;  %v2554_v31 = vadd.f32 %v4481_v46, %v2468_v47  ;;  %v2555_v10 = vadd.f32 %v4483_v63, %v2469_v36  ;;  %v2556_v15 = vadd.f32 %v4485_v2, %v2470_v50  ;;  %v2485_v11 = vld [vmem:[#allocation2 + $0x1f8] sm:$0xff] }
 0x2f5   : > { %2608 = vst [vmem:[#allocation9 + $0x50] sm:$0xff] %v2544_v26  ;;  %2609 = vst [vmem:[#allocation9 + $0x58] sm:$0xff] %v2545_v21  ;;  %v2557_v56 = vadd.f32 %v4487_v42, %v2471_v5  ;;  %v2486_v20 = vld [vmem:[#allocation2 + $0x20] sm:$0xff]  ;;  %v2487_v12 = vld [vmem:[#allocation2 + $0x128] sm:$0xff]  ;;  %v2558_v38 = vadd.f32 %v4481_v46, %v2472_v18  ;;  %v2559_v25 = vadd.f32 %v4483_v63, %v2473_v19 }
 0x2f6   : > { %2610 = vst [vmem:[#allocation9 + $0x60] sm:$0xff] %v2546_v39  ;;  %2611 = vst [vmem:[#allocation9 + $0x68] sm:$0xff] %v2547_v41  ;;  %v2560_v52 = vadd.f32 %v4485_v2, %v2474_v37  ;;  %v2561_v49 = vadd.f32 %v4487_v42, %v2475_v32  ;;  %v2488_v28 = vld [vmem:[#allocation2 + $0x1a0] sm:$0xff]  ;;  %v2489_v34 = vld [vmem:[#allocation2 + $0x1f0] sm:$0xff]  ;;  %v2562_v9 = vadd.f32 %v4481_v46, %v2476_v22 }
 0x2f7   : > { %2612 = vst [vmem:[#allocation9 + $0x70] sm:$0xff] %v2548_v30  ;;  %2613 = vst [vmem:[#allocation9 + $0x78] sm:$0xff] %v2549_v58  ;;  %v2490_v62 = vld [vmem:[#allocation2 + $0xe8] sm:$0xff]  ;;  %v2563_v59 = vadd.f32 %v4483_v63, %v2477_v27  ;;  %v2564_v16 = vadd.f32 %v4485_v2, %v2478_v4  ;;  %v2565_v13 = vadd.f32 %v4487_v42, %v2479_v1  ;;  %v2491_v35 = vld [vmem:[#allocation2 + $0x78] sm:$0xff] }
 0x2f8   : > { %2614 = vst [vmem:[#allocation9 + $0x80] sm:$0xff] %v2550_v40  ;;  %2615 = vst [vmem:[#allocation9 + $0x88] sm:$0xff] %v2551_v3  ;;  %v2492_v53 = vld [vmem:[#allocation2 + $0x70] sm:$0xff]  ;;  %v2566_v8 = vadd.f32 %v4481_v46, %v2480_v29  ;;  %v2567_v17 = vadd.f32 %v4483_v63, %v2481_v57  ;;  %v2568_v23 = vadd.f32 %v4485_v2, %v2482_v45  ;;  %v2494_v33 = vld [vmem:[#allocation2 + $0x1d8] sm:$0xff] }
 0x2f9   : > { %2616 = vst [vmem:[#allocation9 + $0x90] sm:$0xff] %v2552_v44  ;;  %2617 = vst [vmem:[#allocation9 + $0x98] sm:$0xff] %v2553_v14  ;;  %v2493_v61 = vld [vmem:[#allocation2 + $0x90] sm:$0xff]  ;;  %v2569_v43 = vadd.f32 %v4487_v42, %v2483_v24  ;;  %v2496_v47 = vld [vmem:[#allocation2 + $0xb8] sm:$0xff]  ;;  %v2570_v36 = vadd.f32 %v4481_v46, %v2484_v7  ;;  %v2571_v50 = vadd.f32 %v4483_v63, %v2485_v11 }
 0x2fa   : > { %2618 = vst [vmem:[#allocation9 + $0xa0] sm:$0xff] %v2554_v31  ;;  %2619 = vst [vmem:[#allocation9 + $0xa8] sm:$0xff] %v2555_v10  ;;  %v2495_v54 = vld [vmem:[#allocation2 + $0xd0] sm:$0xff]  ;;  %v2572_v5 = vadd.f32 %v4485_v2, %v2486_v20  ;;  %v2573_v6 = vadd.f32 %v4487_v42, %v2487_v12  ;;  %v2497_v51 = vld [vmem:[#allocation2 + $0x88] sm:$0xff]  ;;  %v2574_v18 = vadd.f32 %v4481_v46, %v2488_v28 }
 0x2fb   : > { %2620 = vst [vmem:[#allocation9 + $0xb0] sm:$0xff] %v2556_v15  ;;  %2621 = vst [vmem:[#allocation9 + $0xb8] sm:$0xff] %v2557_v56  ;;  %v2498_v60 = vld [vmem:[#allocation2 + $0xa8] sm:$0xff]  ;;  %v2575_v19 = vadd.f32 %v4483_v63, %v2489_v34  ;;  %v2576_v37 = vadd.f32 %v4485_v2, %v2490_v62  ;;  %v2577_v32 = vadd.f32 %v4487_v42, %v2491_v35  ;;  %v2500_v0 = vld [vmem:[#allocation2 + $0x170] sm:$0xff] }
 0x2fc   : > { %2622 = vst [vmem:[#allocation9 + $0xc0] sm:$0xff] %v2558_v38  ;;  %2623 = vst [vmem:[#allocation9 + $0xc8] sm:$0xff] %v2559_v25  ;;  %v2499_v48 = vld [vmem:[#allocation2 + $0x1c8] sm:$0xff]  ;;  %v2501_v55 = vld [vmem:[#allocation2 + $0x178] sm:$0xff]  ;;  %v2578_v21 = vadd.f32 %v4481_v46, %v2492_v53  ;;  %v2579_v22 = vadd.f32 %v4483_v63, %v2493_v61  ;;  %v2580_v27 = vadd.f32 %v4485_v2, %v2494_v33 }
 0x2fd   : > { %2624 = vst [vmem:[#allocation9 + $0xd0] sm:$0xff] %v2560_v52  ;;  %2625 = vst [vmem:[#allocation9 + $0xd8] sm:$0xff] %v2561_v49  ;;  %v2502_v26 = vld [vmem:[#allocation2 + $0x68] sm:$0xff]  ;;  %v2581_v4 = vadd.f32 %v4487_v42, %v2495_v54  ;;  %v2503_v39 = vld [vmem:[#allocation2 + $0x190] sm:$0xff]  ;;  %v2582_v58 = vadd.f32 %v4481_v46, %v2496_v47  ;;  %v2583_v1 = vadd.f32 %v4483_v63, %v2497_v51 }
 0x2fe   : > { %2626 = vst [vmem:[#allocation9 + $0xe0] sm:$0xff] %v2562_v9  ;;  %2627 = vst [vmem:[#allocation9 + $0xe8] sm:$0xff] %v2563_v59  ;;  %v2504_v41 = vld [vmem:[#allocation2 + $0x198] sm:$0xff]  ;;  %v2584_v29 = vadd.f32 %v4485_v2, %v2498_v60  ;;  %v2585_v57 = vadd.f32 %v4487_v42, %v2499_v48  ;;  %v2506_v40 = vld [vmem:[#allocation2 + $0xc0] sm:$0xff]  ;;  %v2586_v14 = vadd.f32 %v4481_v46, %v2500_v0 }
 0x2ff   : > { %2628 = vst [vmem:[#allocation9 + $0xf0] sm:$0xff] %v2564_v16  ;;  %2629 = vst [vmem:[#allocation9 + $0xf8] sm:$0xff] %v2565_v13  ;;  %v2505_v30 = vld [vmem:[#allocation2 + $0x38] sm:$0xff]  ;;  %v2507_v3 = vld [vmem:[#allocation2 + $0x1c0] sm:$0xff]  ;;  %v2587_v45 = vadd.f32 %v4483_v63, %v2501_v55  ;;  %v2588_v24 = vadd.f32 %v4485_v2, %v2502_v26  ;;  %v2589_v7 = vadd.f32 %v4487_v42, %v2503_v39 }
 0x300   : > { %2630 = vst [vmem:[#allocation9 + $0x100] sm:$0xff] %v2566_v8  ;;  %2631 = vst [vmem:[#allocation9 + $0x108] sm:$0xff] %v2567_v17  ;;  %v2508_v44 = vld [vmem:[#allocation2 + $0x158] sm:$0xff]  ;;  %v2509_v31 = vld [vmem:[#allocation2 + $0x10] sm:$0xff]  ;;  %v2590_v56 = vadd.f32 %v4481_v46, %v2504_v41  ;;  %v2591_v11 = vadd.f32 %v4483_v63, %v2505_v30  ;;  %v2592_v20 = vadd.f32 %v4485_v2, %v2506_v40 }
 0x301   : > { %2632 = vst [vmem:[#allocation9 + $0x110] sm:$0xff] %v2568_v23  ;;  %2633 = vst [vmem:[#allocation9 + $0x118] sm:$0xff] %v2569_v43  ;;  %v2510_v10 = vld [vmem:[#allocation2 + $0x58] sm:$0xff]  ;;  %v2511_v15 = vld [vmem:[#allocation2 + $0xa0] sm:$0xff]  ;;  %v2593_v12 = vadd.f32 %v4487_v42, %v2507_v3  ;;  %v2594_v38 = vadd.f32 %v4481_v46, %v2508_v44  ;;  %v2595_v25 = vadd.f32 %v4483_v63, %v2509_v31 }
 0x302   : > { %2634 = vst [vmem:[#allocation9 + $0x120] sm:$0xff] %v2570_v36  ;;  %2635 = vst [vmem:[#allocation9 + $0x128] sm:$0xff] %v2571_v50  ;;  %v2596_v52 = vadd.f32 %v4485_v2, %v2510_v10  ;;  %v2597_v49 = vadd.f32 %v4487_v42, %v2511_v15 }
 0x303   : > { %2636 = vst [vmem:[#allocation9 + $0x130] sm:$0xff] %v2572_v5  ;;  %2637 = vst [vmem:[#allocation9 + $0x138] sm:$0xff] %v2573_v6 }
 0x304   : > { %2638 = vst [vmem:[#allocation9 + $0x140] sm:$0xff] %v2574_v18  ;;  %2639 = vst [vmem:[#allocation9 + $0x148] sm:$0xff] %v2575_v19 }
 0x305   : > { %2640 = vst [vmem:[#allocation9 + $0x150] sm:$0xff] %v2576_v37  ;;  %2641 = vst [vmem:[#allocation9 + $0x158] sm:$0xff] %v2577_v32 }
 0x306   : > { %2642 = vst [vmem:[#allocation9 + $0x160] sm:$0xff] %v2578_v21  ;;  %2643 = vst [vmem:[#allocation9 + $0x168] sm:$0xff] %v2579_v22 }
 0x307   : > { %2644 = vst [vmem:[#allocation9 + $0x170] sm:$0xff] %v2580_v27  ;;  %2645 = vst [vmem:[#allocation9 + $0x178] sm:$0xff] %v2581_v4 }
 0x308   : > { %2646 = vst [vmem:[#allocation9 + $0x180] sm:$0xff] %v2582_v58  ;;  %2647 = vst [vmem:[#allocation9 + $0x188] sm:$0xff] %v2583_v1 }
 0x309   : > { %2648 = vst [vmem:[#allocation9 + $0x190] sm:$0xff] %v2584_v29  ;;  %2649 = vst [vmem:[#allocation9 + $0x198] sm:$0xff] %v2585_v57 }
 0x30a   : > { %2650 = vst [vmem:[#allocation9 + $0x1a0] sm:$0xff] %v2586_v14  ;;  %2651 = vst [vmem:[#allocation9 + $0x1a8] sm:$0xff] %v2587_v45 }
 0x30b   : > { %2652 = vst [vmem:[#allocation9 + $0x1b0] sm:$0xff] %v2588_v24  ;;  %2653 = vst [vmem:[#allocation9 + $0x1b8] sm:$0xff] %v2589_v7 }
 0x30c   : > { %2654 = vst [vmem:[#allocation9 + $0x1c0] sm:$0xff] %v2590_v56  ;;  %2655 = vst [vmem:[#allocation9 + $0x1c8] sm:$0xff] %v2591_v11 }
 0x30d   : > { %2656 = vst [vmem:[#allocation9 + $0x1d0] sm:$0xff] %v2592_v20  ;;  %2657 = vst [vmem:[#allocation9 + $0x1d8] sm:$0xff] %v2593_v12 }
 0x30e   : > { %2658 = vst [vmem:[#allocation9 + $0x1e0] sm:$0xff] %v2594_v38  ;;  %2659 = vst [vmem:[#allocation9 + $0x1e8] sm:$0xff] %v2595_v25 }
 0x30f   : > { %2660 = vst [vmem:[#allocation9 + $0x1f0] sm:$0xff] %v2596_v52  ;;  %2661 = vst [vmem:[#allocation9 + $0x1f8] sm:$0xff] %v2597_v49 }
 0x310 PF: > { %p2821_p0 = scmp.eq.s32.totalorder %s3240_s18, 7  ;;  %s3188_s15 = smov [#allocation9]  }
 0x311   : > { %s2672_s20 = sshll.u32 %s3188_s15, 4  ;;  %s2673_s20 = int_to_ptr.vmem [resolvable:$true] %s2672_s20 }
 0x312   : > { %s3091_s21 = scalar_lea.vmem %s2673_s20, 8192  ;;  %p3098_p7 = scmp.lt.s32.totalorder %s2673_s20, %s2673_s20 }
 0x313   : > { %p3092_p1 = scmp.ne.s32.totalorder %s2673_s20, %s3091_s21  ;;  %p3099_p4 = scmp.lt.s32.totalorder %s3091_s21, %s3091_s21 }
 0x315   : > { %p3093_p2 = pnand %p3092_p1, %p2821_p0  ;;  %p3100_p6 = por %p3099_p4, %p3098_p7 }
 0x317   : > { %p3094_p5 = pneg %p3093_p2 }
 0x319   : > { %p3101_p9 = pnand %p3100_p6, %p3094_p5 }
 0x31b   : > { %3104 = shalt.err (!%p3101_p9)
}
 0x31c   : > { %s3189_s4 = smov 512   ;;  %s3190_s5 = smov 32  }
 0x31d   : > { %2804 = dma.vmem_to_hbm [thread:$0]  (%p2821_p0), %s2673_s20, 8192, %s4586_s3, [#allocation5], %s3189_s4, %s3189_s4, %s3190_s5  }
 0x31e   : > { %3152 = dma.done.wait (%p2821_p0), [#allocation5], 8192  }
 0x31f   : > { %3154 = vsyncadd (%p2821_p0), [#allocation5], 4294959104 }
 0x320 PF: > { %s20_s17 = sadd.s32 1, %s3177_s17   ;;  %s4632_s10 = smov %s3289_s12 }
 0x321   : > { %p17_p10 = scmp.ge.s32.totalorder %s20_s17, 10   ;;  %s4633_s26 = sld [smem:[#allocation14_spill]] }
 0x322   : > { %s4634_s12 = smov %s3161_s13  ;;  %s4635_s13 = smov %s3165_s14 }
 0x323   : > { %s4636_s14 = smov %s4632_s10  ;;  %s4637_s15 = smov %s3173_s16 }
 0x324   :  { %19 = sbr.rel (!%p17_p10) target bundleno = 10 (0xa), region = 95 }
 0x327   : > { %s4638_s16 = smov %s4633_s26 }
 0x329   :  { %2688 = vsyncpa [#allocation4], 1 }
 0x32a   :  { %2690 = vsyncpa [#allocation4 + $0x1], 1 }
 0x32b   :  { %2691 = vsyncpa [#allocation7], 1 }
 0x32c   :  { %2693 = vsyncpa [#allocation7 + $0x1], 1 }
 0x32d   :  { %2694 = vsyncpa [#allocation5], 1 }
 0x32e   :  { %2696 = vsyncpa [#allocation5 + $0x1], 1 }

</bundles_post_ra>
